<compile_context>
chip_gen: v5e
topology: v5e:2x2
jax: 0.10.0
libtpu: 0.0.40
codegen_flags: <defaults>
</compile_context>

<pallas_src>
import numpy as np

import jax
import jax.numpy as jnp
from jax.experimental import pallas as pl
from jax.experimental.pallas import tpu as pltpu

LANE = 128


# ---------------------------------------------------------------------------
# Host-side, one-time weight folding (layout shuffles baked into the weights)
# ---------------------------------------------------------------------------
def _bn_scale_shift(gamma, beta, mean, var, eps=1e-5):
    gamma, beta = np.asarray(gamma, np.float32), np.asarray(beta, np.float32)
    mean, var = np.asarray(mean, np.float32), np.asarray(var, np.float32)
    scale = gamma / np.sqrt(var + eps)
    shift = beta - mean * scale
    return scale.astype(np.float32), shift.astype(np.float32)


def _blocked_conv_weights(w, b_out):
    """Fold a Conv2d(k=3, s=2, p=1, bias=False) weight (Cout, Cin, 3, 3) into 4
    matmul weights acting on (2*b_out x 2*b_out)-pixel input cells (row-major
    (r, s, cin) channel packing) and producing (b_out x b_out)-pixel output
    cells (row-major (p, q, cout) packing).  Leading-axis order of the result
    is the neighbour-cell shift: [(-1,-1), (-1,0), (0,-1), (0,0)]."""
    w = np.asarray(w, np.float32)
    cout, cin = w.shape[0], w.shape[1]
    b_in = 2 * b_out
    out = np.zeros((4, b_in * b_in * cin, b_out * b_out * cout), np.float32)
    shift_id = {(-1, -1): 0, (-1, 0): 1, (0, -1): 2, (0, 0): 3}
    for p in range(b_out):
        for q in range(b_out):
            col = (p * b_out + q) * cout
            for kh in range(3):
                for kw in range(3):
                    r = 2 * p + kh - 1                  # input sub-row in cell
                    s = 2 * q + kw - 1                  # input sub-col in cell
                    di = -1 if r < 0 else 0
                    dj = -1 if s < 0 else 0
                    rr = r + b_in if r < 0 else r
                    ss = s + b_in if s < 0 else s
                    t = shift_id[(di, dj)]
                    row = (rr * b_in + ss) * cin
                    out[t, row:row + cin, col:col + cout] += w[:, :, kh, kw].T
    return out


def _blocked_convT_weights(w, block):
    """Fold a ConvTranspose2d(k=2, s=2, bias=False) weight (Cin, Cout, 2, 2)
    into one matmul weight acting on (block x block)-pixel input cells
    (row-major (r, s, cin)) and producing (2*block x 2*block)-pixel output
    cells (row-major (r2, s2, cout)); a k2s2 transposed conv never crosses a
    cell boundary, so no neighbour shifts are needed."""
    w = np.asarray(w, np.float32)
    cin, cout = w.shape[0], w.shape[1]
    b2 = 2 * block
    out = np.zeros((block * block * cin, b2 * b2 * cout), np.float32)
    for r in range(block):
        for s in range(block):
            row = (r * block + s) * cin
            for kh in range(2):
                for kw in range(2):
                    r2, s2 = 2 * r + kh, 2 * s + kw
                    col = (r2 * b2 + s2) * cout
                    out[row:row + cin, col:col + cout] += w[:, :, kh, kw]
    return out


def prepare_params(params, latent_dim=50):
    """One-time repack of the PyTorch-layout parameters into kernel layouts."""
    lat_pad = ((latent_dim + LANE - 1) // LANE) * LANE

    # Encoder convs: 8x8-pixel input cells -> 4x4 cells -> 2x2 cells.
    w4_0 = _blocked_conv_weights(params["w_conv0"], b_out=4)      # (4, 192, 256)
    w4_1 = _blocked_conv_weights(params["w_conv1"], b_out=2)      # (4, 256, 128)
    s0, h0 = _bn_scale_shift(*params["bn0"])                      # 16 ch
    s1, h1 = _bn_scale_shift(*params["bn1"])                      # 32 ch
    s0, h0 = np.tile(s0, 16), np.tile(h0, 16)                     # (256,)
    s1, h1 = np.tile(s1, 4), np.tile(h1, 4)                       # (128,)

    # Encoder Linear: nn.Flatten(1) of NCHW (32,8,8) -> our (u, v, c) ordering,
    # latent padded to a full 128-lane width (extra columns are zero).
    w_enc = np.asarray(params["w_enc"], np.float32)               # (L, 2048) NCHW cols
    w_enc = w_enc.reshape(latent_dim, 32, 8, 8).transpose(2, 3, 1, 0)
    w_enc = w_enc.reshape(2048, latent_dim)
    w_enc = np.pad(w_enc, ((0, 0), (0, lat_pad - latent_dim)))
    b_enc = np.pad(np.asarray(params["b_enc"], np.float32), (0, lat_pad - latent_dim))

    # Decoder Linear: rows permuted so the output comes out in (u, v, c) order;
    # padded latent rows are zero so the padded latent lanes contribute nothing.
    w_dec = np.asarray(params["w_dec"], np.float32)               # (2048, L) NCHW rows
    w_dec = w_dec.reshape(32, 8, 8, latent_dim).transpose(1, 2, 0, 3)
    w_dec = w_dec.reshape(2048, latent_dim).T                     # (L, 2048)
    w_dec = np.pad(w_dec, ((0, lat_pad - latent_dim), (0, 0)))    # (128, 2048)
    b_dec = np.asarray(params["b_dec"], np.float32)
    b_dec = b_dec.reshape(32, 8, 8).transpose(1, 2, 0).reshape(2048)

    # Decoder transposed convs on 2x2-pixel / 4x4-pixel cells.
    wt0 = _blocked_convT_weights(params["w_tconv0"], block=2)     # (128, 256)
    wt0 = wt0.reshape(4, 32, 256)                                 # quadrant-indexed
    wt1 = _blocked_convT_weights(params["w_tconv1"], block=4)     # (256, 192)
    s2, h2 = _bn_scale_shift(*params["bn2"])                      # 16 ch
    s3, h3 = _bn_scale_shift(*params["bn3"])                      # 3 ch
    s2, h2 = np.tile(s2, 16), np.tile(h2, 16)                     # (256,)
    s3, h3 = np.tile(s3, 64), np.tile(h3, 64)                     # (192,)

    f32, bf16 = jnp.float32, jnp.bfloat16
    row = lambda a: jnp.asarray(np.asarray(a).reshape(1, -1), f32)
    return dict(
        w4_conv0=jnp.asarray(w4_0, bf16), s0=row(s0), h0=row(h0),
        w4_conv1=jnp.asarray(w4_1, bf16), s1=row(s1), h1=row(h1),
        w_enc=jnp.asarray(w_enc, bf16), b_enc=row(b_enc),
        w_dec=jnp.asarray(w_dec, bf16), b_dec=row(b_dec),
        wt0=jnp.asarray(wt0, bf16), s2=row(s2), h2=row(h2),
        wt1=jnp.asarray(wt1, bf16), s3=row(s3), h3=row(h3),
    )


# ---------------------------------------------------------------------------
# Pallas kernels
# ---------------------------------------------------------------------------
def _shifted(x):
    """(up-left, up, left, self) neighbour-cell views with zeros past the edge."""
    gh, gw, k = x.shape
    zr = jnp.zeros((1, gw, k), x.dtype)
    zc = jnp.zeros((gh, 1, k), x.dtype)
    x_u = jnp.concatenate([zr, x[:gh - 1]], axis=0)
    x_l = jnp.concatenate([zc, x[:, :gw - 1]], axis=1)
    x_ul = jnp.concatenate([zc, x_u[:, :gw - 1]], axis=1)
    return x_ul, x_u, x_l, x


def _blocked_conv_bn_relu(x, w4_ref, scale, shift):
    """Conv(k3,s2,p1) + BN(eval) + ReLU on cell-blocked input: 4 accumulating
    bf16 MXU matmuls over the neighbour-cell shifts, f32 accumulation."""
    gh, gw, k = x.shape
    g = gh * gw
    parts = _shifted(x)
    acc = None
    for t in range(4):
        v = parts[t].reshape(g, k).astype(jnp.bfloat16)
        d = jnp.dot(v, w4_ref[t], preferred_element_type=jnp.float32)
        acc = d if acc is None else acc + d
    return jnp.maximum(acc * scale + shift, 0.0)          # (g, out_cols) f32


def _encoder_kernel(x_ref, w0_ref, s0_ref, h0_ref, w1_ref, s1_ref, h1_ref,
                    pool_ref, code_ref):
    x = x_ref[0]                                           # (8, 8, 192)
    gh, gw = x.shape[0], x.shape[1]
    # Conv0 + BN + ReLU : 8x8-pixel cells -> 4x4-pixel cells x 16ch (256 cols)
    y0 = _blocked_conv_bn_relu(x, w0_ref, s0_ref[...], h0_ref[...])
    y0 = y0.reshape(gh, gw, -1)
    # Conv1 + BN + ReLU : 4x4-pixel cells -> 2x2-pixel cells x 32ch (128 cols)
    y1 = _blocked_conv_bn_relu(y0, w1_ref, s1_ref[...], h1_ref[...])
    # MaxPool2d(2,2): the four 2x2 sub-pixels are the four 32-wide lane groups,
    # scanned in PyTorch (kh, kw) order; strict '>' == first-max-wins.
    c = y1.shape[1] // 4
    best = y1[:, :c]
    code = jnp.zeros(best.shape, jnp.int32)
    for k in range(1, 4):
        cand = y1[:, k * c:(k + 1) * c]
        take = cand > best
        best = jnp.where(take, cand, best)
        code = jnp.where(take, k, code)
    pool_ref[0] = best
    code_ref[0] = code


def _linear_kernel(x_ref, w_ref, b_ref, o_ref):
    acc = jnp.dot(x_ref[...].astype(jnp.bfloat16), w_ref[...],
                  preferred_element_type=jnp.float32)
    o_ref[...] = acc + b_ref[...]


def _decoder_kernel(v_ref, code_ref, wt0_ref, s0_ref, h0_ref,
                    wt1_ref, s1_ref, h1_ref, o_ref):
    v = v_ref[0]                                           # (64, 32) decoder_lin out
    code = code_ref[0]                                     # (64, 32) argmax quadrant
    # MaxUnpool2d(2,2) fused into ConvTranspose2d(32->16,k2,s2)+BN+ReLU: the
    # value of quadrant k only flows through block k of the block-diag weight.
    acc = None
    for k in range(4):
        vk = jnp.where(code == k, v, 0.0).astype(jnp.bfloat16)
        d = jnp.dot(vk, wt0_ref[k], preferred_element_type=jnp.float32)
        acc = d if acc is None else acc + d
    y0 = jnp.maximum(acc * s0_ref[...] + h0_ref[...], 0.0)            # (64, 256)
    # ConvTranspose2d(16->3,k2,s2) + BN + ReLU as one block-diag matmul.
    y1 = jnp.dot(y0.astype(jnp.bfloat16), wt1_ref[...],
                 preferred_element_type=jnp.float32)                  # (64, 192)
    o_ref[0] = jnp.maximum(y1 * s1_ref[...] + h1_ref[...], 0.0)


# ---------------------------------------------------------------------------
# pallas_call wrappers (gridded, parallel, bf16 weights, cost estimates)
# ---------------------------------------------------------------------------
def _encoder_stack(xb, w4_0, s0, h0, w4_1, s1, h1):
    n = xb.shape[0]
    flops = 2 * 64 * 4 * (w4_0.shape[1] * w4_0.shape[2]
                          + w4_1.shape[1] * w4_1.shape[2]) * n
    bytes_accessed = xb.size * 4 + (w4_0.size + w4_1.size) * 2 + n * 64 * 32 * 8
    return pl.pallas_call(
        _encoder_kernel,
        grid=(n,),
        in_specs=[
            pl.BlockSpec((1,) + xb.shape[1:], lambda i: (i, 0, 0, 0)),
            pl.BlockSpec(w4_0.shape, lambda i: (0, 0, 0)),
            pl.BlockSpec(s0.shape, lambda i: (0, 0)),
            pl.BlockSpec(h0.shape, lambda i: (0, 0)),
            pl.BlockSpec(w4_1.shape, lambda i: (0, 0, 0)),
            pl.BlockSpec(s1.shape, lambda i: (0, 0)),
            pl.BlockSpec(h1.shape, lambda i: (0, 0)),
        ],
        out_specs=(pl.BlockSpec((1, 64, 32), lambda i: (i, 0, 0)),
                   pl.BlockSpec((1, 64, 32), lambda i: (i, 0, 0))),
        out_shape=(jax.ShapeDtypeStruct((n, 64, 32), jnp.float32),
                   jax.ShapeDtypeStruct((n, 64, 32), jnp.int32)),
        compiler_params=pltpu.CompilerParams(dimension_semantics=("parallel",)),
        cost_estimate=pl.CostEstimate(flops=int(flops), transcendentals=0,
                                      bytes_accessed=int(bytes_accessed)),
    )(xb, w4_0, s0, h0, w4_1, s1, h1)


def _fused_linear(x, w, b):
    m, k = x.shape
    n = w.shape[1]
    tm = m if m <= 512 else 512
    return pl.pallas_call(
        _linear_kernel,
        grid=(pl.cdiv(m, tm),),
        in_specs=[pl.BlockSpec((tm, k), lambda i: (i, 0)),
                  pl.BlockSpec((k, n), lambda i: (0, 0)),
                  pl.BlockSpec((1, n), lambda i: (0, 0))],
        out_specs=pl.BlockSpec((tm, n), lambda i: (i, 0)),
        out_shape=jax.ShapeDtypeStruct((m, n), jnp.float32),
        compiler_params=pltpu.CompilerParams(dimension_semantics=("parallel",)),
        cost_estimate=pl.CostEstimate(
            flops=int(2 * m * k * n), transcendentals=0,
            bytes_accessed=int(4 * m * k + 2 * k * n + 4 * m * n)),
    )(x, w, b)


def _decoder_stack(v, code, wt0, s2, h2, wt1, s3, h3):
    n = v.shape[0]
    flops = 2 * 64 * (4 * wt0.shape[1] * wt0.shape[2]
                      + wt1.shape[0] * wt1.shape[1]) * n
    bytes_accessed = (v.size + code.size) * 4 + (wt0.size + wt1.size) * 2 \
        + n * 64 * 192 * 4
    return pl.pallas_call(
        _decoder_kernel,
        grid=(n,),
        in_specs=[
            pl.BlockSpec((1, 64, 32), lambda i: (i, 0, 0)),
            pl.BlockSpec((1, 64, 32), lambda i: (i, 0, 0)),
            pl.BlockSpec(wt0.shape, lambda i: (0, 0, 0)),
            pl.BlockSpec(s2.shape, lambda i: (0, 0)),
            pl.BlockSpec(h2.shape, lambda i: (0, 0)),
            pl.BlockSpec(wt1.shape, lambda i: (0, 0)),
            pl.BlockSpec(s3.shape, lambda i: (0, 0)),
            pl.BlockSpec(h3.shape, lambda i: (0, 0)),
        ],
        out_specs=pl.BlockSpec((1, 64, 192), lambda i: (i, 0, 0)),
        out_shape=jax.ShapeDtypeStruct((n, 64, 192), jnp.float32),
        compiler_params=pltpu.CompilerParams(dimension_semantics=("parallel",)),
        cost_estimate=pl.CostEstimate(flops=int(flops), transcendentals=0,
                                      bytes_accessed=int(bytes_accessed)),
    )(v, code, wt0, s2, h2, wt1, s3, h3)


# ---------------------------------------------------------------------------
# Full forward pass
# ---------------------------------------------------------------------------
def autoencoder_conv_forward(sample_nhwc, prep, latent_dim=50):
    n = sample_nhwc.shape[0]
    # torch.permute(sample, (0,3,1,2)) and all later layout shuffles are folded
    # into the blocked weights; the only real XLA copy is this 8x8-pixel cell
    # blocking of the input (and the inverse un-blocking of the output).
    xb = sample_nhwc.reshape(n, 8, 8, 8, 8, 3).transpose(0, 1, 3, 2, 4, 5)
    xb = xb.reshape(n, 8, 8, 192)

    # K1: conv0+BN+ReLU + conv1+BN+ReLU + MaxPool(2,2)  ->  pooled values + argmax
    pooled, code = _encoder_stack(xb, prep["w4_conv0"], prep["s0"], prep["h0"],
                                  prep["w4_conv1"], prep["s1"], prep["h1"])

    # K2: Flatten + Linear(2048, latent)   (NCHW flatten order baked into w_enc)
    latent_pad = _fused_linear(pooled.reshape(n, 2048), prep["w_enc"], prep["b_enc"])

    # K3: Linear(latent, 2048) + Unflatten (order baked into w_dec)
    dec = _fused_linear(latent_pad, prep["w_dec"], prep["b_dec"])       # (n, 2048)

    # K4: MaxUnpool(2,2) + ConvT0+BN+ReLU + ConvT1+BN+ReLU   (Dropout = identity)
    outb = _decoder_stack(dec.reshape(n, 64, 32), code,
                          prep["wt0"], prep["s2"], prep["h2"],
                          prep["wt1"], prep["s3"], prep["h3"])          # (n, 64, 192)

    rec = outb.reshape(n, 8, 8, 8, 8, 3).transpose(0, 1, 3, 2, 4, 5)
    rec = rec.reshape(n, 64, 64, 3)
    # decoder_sigmoid exists in __init__ but forward() never applies it.
    return rec, latent_pad[:, :latent_dim]


# ---------------------------------------------------------------------------
# Deterministic synthetic parameters (PyTorch layouts, shapes from __init__)
# ---------------------------------------------------------------------------
def init_params(latent_dim=50):
    keys = iter(jax.random.split(jax.random.PRNGKey(0), 64))

    def normal(shape, s=0.1):
        return s * jax.random.normal(next(keys), shape, jnp.float32)

    def bn(c):
        gamma = 1.0 + 0.1 * jax.random.normal(next(keys), (c,), jnp.float32)
        beta = normal((c,))
        running_mean = normal((c,))
        running_var = jax.random.uniform(next(keys), (c,), jnp.float32, 0.5, 1.5)
        return (gamma, beta, running_mean, running_var)

    return dict(
        w_conv0=normal((16, 3, 3, 3)),        # Conv2d(3,16,3,s2,p1)
        bn0=bn(16),
        w_conv1=normal((32, 16, 3, 3)),       # Conv2d(16,32,3,s2,p1)
        bn1=bn(32),
        w_enc=normal((latent_dim, 2048)),     # Linear(2048, latent)
        b_enc=normal((latent_dim,)),
        w_dec=normal((2048, latent_dim)),     # Linear(latent, 2048)
        b_dec=normal((2048,)),
        w_tconv0=normal((32, 16, 2, 2)),      # ConvTranspose2d(32,16,2,s2)
        bn2=bn(16),
        w_tconv1=normal((16, 3, 2, 2)),       # ConvTranspose2d(16,3,2,s2)
        bn3=bn(3),
    )


if __name__ == "__main__":
    latent_dim = 50
    params = init_params(latent_dim)
    prep = prepare_params(params, latent_dim)

    # Input must be (N, 64, 64, 3) NHWC so that Flatten -> Linear(2048) matches.
    sample = jax.random.uniform(jax.random.PRNGKey(0), (2, 64, 64, 3), jnp.float32)

    fwd = jax.jit(lambda s, p: autoencoder_conv_forward(s, p, latent_dim=latent_dim))
    recon, latent = fwd(sample, prep)
    jax.block_until_ready((recon, latent))

    assert recon.shape == (2, 64, 64, 3), recon.shape
    assert latent.shape == (2, latent_dim), latent.shape
    assert recon.dtype == jnp.float32 and latent.dtype == jnp.float32
    print("KERNEL_OK")
</pallas_src>

<mosaic_0001>
module attributes {stable_mosaic.version = 11 : i64} {
  func.func @_encoder_kernel(%arg0: i32, %arg1: memref<1x8x8x192xf32, #tpu.memory_space<vmem>>, %arg2: memref<4x192x256xbf16, #tpu.memory_space<vmem>>, %arg3: memref<1x256xf32, #tpu.memory_space<vmem>>, %arg4: memref<1x256xf32, #tpu.memory_space<vmem>>, %arg5: memref<4x256x128xbf16, #tpu.memory_space<vmem>>, %arg6: memref<1x128xf32, #tpu.memory_space<vmem>>, %arg7: memref<1x128xf32, #tpu.memory_space<vmem>>, %arg8: memref<1x64x32xf32, #tpu.memory_space<vmem>>, %arg9: memref<1x64x32xi32, #tpu.memory_space<vmem>>) attributes {dimension_semantics = [#tpu.dimension_semantics<parallel>], iteration_bounds = array<i64: 2>, scalar_prefetch = 0 : i64, scratch_operands = 0 : i64, tpu.core_type = #tpu.core_type<tc>, window_params = [{transform_indices = @transform_0, window_bounds = array<i64: 1, 8, 8, 192>}, {pipeline_mode = #tpu.pipeline_mode<synchronous>, transform_indices = @transform_1, window_bounds = array<i64: 4, 192, 256>}, {pipeline_mode = #tpu.pipeline_mode<synchronous>, transform_indices = @transform_2, window_bounds = array<i64: 1, 256>}, {pipeline_mode = #tpu.pipeline_mode<synchronous>, transform_indices = @transform_3, window_bounds = array<i64: 1, 256>}, {pipeline_mode = #tpu.pipeline_mode<synchronous>, transform_indices = @transform_4, window_bounds = array<i64: 4, 256, 128>}, {pipeline_mode = #tpu.pipeline_mode<synchronous>, transform_indices = @transform_5, window_bounds = array<i64: 1, 128>}, {pipeline_mode = #tpu.pipeline_mode<synchronous>, transform_indices = @transform_6, window_bounds = array<i64: 1, 128>}, {transform_indices = @transform_7, window_bounds = array<i64: 1, 64, 32>}, {transform_indices = @transform_8, window_bounds = array<i64: 1, 64, 32>}]} {
    %c0 = arith.constant 0 : index
    %c0_0 = arith.constant 0 : index
    %c0_1 = arith.constant 0 : index
    %c0_2 = arith.constant 0 : index
    %0 = vector.load %arg1[%c0, %c0_0, %c0_1, %c0_2] : memref<1x8x8x192xf32, #tpu.memory_space<vmem>>, vector<1x8x8x192xf32>
    %1 = vector.shape_cast %0 : vector<1x8x8x192xf32> to vector<8x8x192xf32>
    %c0_3 = arith.constant 0 : index
    %c0_4 = arith.constant 0 : index
    %2 = vector.load %arg3[%c0_3, %c0_4] : memref<1x256xf32, #tpu.memory_space<vmem>>, vector<1x256xf32>
    %c0_5 = arith.constant 0 : index
    %c0_6 = arith.constant 0 : index
    %3 = vector.load %arg4[%c0_5, %c0_6] : memref<1x256xf32, #tpu.memory_space<vmem>>, vector<1x256xf32>
    %cst = arith.constant 0.000000e+00 : f32
    %4 = vector.broadcast %cst : f32 to vector<1x8x192xf32>
    %cst_7 = arith.constant 0.000000e+00 : f32
    %5 = vector.broadcast %cst_7 : f32 to vector<8x1x192xf32>
    %6 = vector.extract_strided_slice %1 {offsets = [0, 0, 0], sizes = [7, 8, 192], strides = [1, 1, 1]} : vector<8x8x192xf32> to vector<7x8x192xf32>
    %7 = tpu.concatenate %4, %6 in 0 : vector<1x8x192xf32>, vector<7x8x192xf32> -> vector<8x8x192xf32>
    %8 = vector.extract_strided_slice %1 {offsets = [0, 0, 0], sizes = [8, 7, 192], strides = [1, 1, 1]} : vector<8x8x192xf32> to vector<8x7x192xf32>
    %9 = tpu.concatenate %5, %8 in 1 : vector<8x1x192xf32>, vector<8x7x192xf32> -> vector<8x8x192xf32>
    %10 = vector.extract_strided_slice %7 {offsets = [0, 0, 0], sizes = [8, 7, 192], strides = [1, 1, 1]} : vector<8x8x192xf32> to vector<8x7x192xf32>
    %11 = tpu.concatenate %5, %10 in 1 : vector<8x1x192xf32>, vector<8x7x192xf32> -> vector<8x8x192xf32>
    %12 = vector.shape_cast %11 : vector<8x8x192xf32> to vector<64x192xf32>
    %13 = arith.truncf %12 : vector<64x192xf32> to vector<64x192xbf16>
    %c0_8 = arith.constant 0 : index
    %c0_9 = arith.constant 0 : index
    %c0_10 = arith.constant 0 : index
    %14 = vector.load %arg2[%c0_8, %c0_9, %c0_10] : memref<4x192x256xbf16, #tpu.memory_space<vmem>>, vector<1x192x256xbf16>
    %15 = vector.shape_cast %14 : vector<1x192x256xbf16> to vector<192x256xbf16>
    %cst_11 = arith.constant dense<0.000000e+00> : vector<64x256xf32>
    %16 = tpu.matmul %13, %15, %cst_11 {dimension_numbers = #tpu.dot_dimension_numbers<[1], [0], [0], [1], [0, 0, 1, 1], [], []>} : vector<64x192xbf16>, vector<192x256xbf16>, vector<64x256xf32> -> vector<64x256xf32>
    %17 = vector.shape_cast %7 : vector<8x8x192xf32> to vector<64x192xf32>
    %18 = arith.truncf %17 : vector<64x192xf32> to vector<64x192xbf16>
    %c1 = arith.constant 1 : index
    %c0_12 = arith.constant 0 : index
    %c0_13 = arith.constant 0 : index
    %19 = vector.load %arg2[%c1, %c0_12, %c0_13] : memref<4x192x256xbf16, #tpu.memory_space<vmem>>, vector<1x192x256xbf16>
    %20 = vector.shape_cast %19 : vector<1x192x256xbf16> to vector<192x256xbf16>
    %cst_14 = arith.constant dense<0.000000e+00> : vector<64x256xf32>
    %21 = tpu.matmul %18, %20, %cst_14 {dimension_numbers = #tpu.dot_dimension_numbers<[1], [0], [0], [1], [0, 0, 1, 1], [], []>} : vector<64x192xbf16>, vector<192x256xbf16>, vector<64x256xf32> -> vector<64x256xf32>
    %22 = arith.addf %16, %21 : vector<64x256xf32>
    %23 = vector.shape_cast %9 : vector<8x8x192xf32> to vector<64x192xf32>
    %24 = arith.truncf %23 : vector<64x192xf32> to vector<64x192xbf16>
    %c2 = arith.constant 2 : index
    %c0_15 = arith.constant 0 : index
    %c0_16 = arith.constant 0 : index
    %25 = vector.load %arg2[%c2, %c0_15, %c0_16] : memref<4x192x256xbf16, #tpu.memory_space<vmem>>, vector<1x192x256xbf16>
    %26 = vector.shape_cast %25 : vector<1x192x256xbf16> to vector<192x256xbf16>
    %cst_17 = arith.constant dense<0.000000e+00> : vector<64x256xf32>
    %27 = tpu.matmul %24, %26, %cst_17 {dimension_numbers = #tpu.dot_dimension_numbers<[1], [0], [0], [1], [0, 0, 1, 1], [], []>} : vector<64x192xbf16>, vector<192x256xbf16>, vector<64x256xf32> -> vector<64x256xf32>
    %28 = arith.addf %22, %27 : vector<64x256xf32>
    %29 = vector.shape_cast %1 : vector<8x8x192xf32> to vector<64x192xf32>
    %30 = arith.truncf %29 : vector<64x192xf32> to vector<64x192xbf16>
    %c3 = arith.constant 3 : index
    %c0_18 = arith.constant 0 : index
    %c0_19 = arith.constant 0 : index
    %31 = vector.load %arg2[%c3, %c0_18, %c0_19] : memref<4x192x256xbf16, #tpu.memory_space<vmem>>, vector<1x192x256xbf16>
    %32 = vector.shape_cast %31 : vector<1x192x256xbf16> to vector<192x256xbf16>
    %cst_20 = arith.constant dense<0.000000e+00> : vector<64x256xf32>
    %33 = tpu.matmul %30, %32, %cst_20 {dimension_numbers = #tpu.dot_dimension_numbers<[1], [0], [0], [1], [0, 0, 1, 1], [], []>} : vector<64x192xbf16>, vector<192x256xbf16>, vector<64x256xf32> -> vector<64x256xf32>
    %34 = arith.addf %28, %33 : vector<64x256xf32>
    %35 = vector.broadcast %2 : vector<1x256xf32> to vector<64x256xf32>
    %36 = arith.mulf %34, %35 : vector<64x256xf32>
    %37 = vector.broadcast %3 : vector<1x256xf32> to vector<64x256xf32>
    %38 = arith.addf %36, %37 : vector<64x256xf32>
    %cst_21 = arith.constant 0.000000e+00 : f32
    %39 = vector.broadcast %cst_21 : f32 to vector<64x256xf32>
    %40 = arith.maximumf %38, %39 : vector<64x256xf32>
    %41 = vector.shape_cast %40 : vector<64x256xf32> to vector<8x8x256xf32>
    %c0_22 = arith.constant 0 : index
    %c0_23 = arith.constant 0 : index
    %42 = vector.load %arg6[%c0_22, %c0_23] : memref<1x128xf32, #tpu.memory_space<vmem>>, vector<1x128xf32>
    %c0_24 = arith.constant 0 : index
    %c0_25 = arith.constant 0 : index
    %43 = vector.load %arg7[%c0_24, %c0_25] : memref<1x128xf32, #tpu.memory_space<vmem>>, vector<1x128xf32>
    %cst_26 = arith.constant 0.000000e+00 : f32
    %44 = vector.broadcast %cst_26 : f32 to vector<1x8x256xf32>
    %cst_27 = arith.constant 0.000000e+00 : f32
    %45 = vector.broadcast %cst_27 : f32 to vector<8x1x256xf32>
    %46 = vector.extract_strided_slice %41 {offsets = [0, 0, 0], sizes = [7, 8, 256], strides = [1, 1, 1]} : vector<8x8x256xf32> to vector<7x8x256xf32>
    %47 = tpu.concatenate %44, %46 in 0 : vector<1x8x256xf32>, vector<7x8x256xf32> -> vector<8x8x256xf32>
    %48 = vector.extract_strided_slice %41 {offsets = [0, 0, 0], sizes = [8, 7, 256], strides = [1, 1, 1]} : vector<8x8x256xf32> to vector<8x7x256xf32>
    %49 = tpu.concatenate %45, %48 in 1 : vector<8x1x256xf32>, vector<8x7x256xf32> -> vector<8x8x256xf32>
    %50 = vector.extract_strided_slice %47 {offsets = [0, 0, 0], sizes = [8, 7, 256], strides = [1, 1, 1]} : vector<8x8x256xf32> to vector<8x7x256xf32>
    %51 = tpu.concatenate %45, %50 in 1 : vector<8x1x256xf32>, vector<8x7x256xf32> -> vector<8x8x256xf32>
    %52 = vector.shape_cast %51 : vector<8x8x256xf32> to vector<64x256xf32>
    %53 = arith.truncf %52 : vector<64x256xf32> to vector<64x256xbf16>
    %c0_28 = arith.constant 0 : index
    %c0_29 = arith.constant 0 : index
    %c0_30 = arith.constant 0 : index
    %54 = vector.load %arg5[%c0_28, %c0_29, %c0_30] : memref<4x256x128xbf16, #tpu.memory_space<vmem>>, vector<1x256x128xbf16>
    %55 = vector.shape_cast %54 : vector<1x256x128xbf16> to vector<256x128xbf16>
    %cst_31 = arith.constant dense<0.000000e+00> : vector<64x128xf32>
    %56 = tpu.matmul %53, %55, %cst_31 {dimension_numbers = #tpu.dot_dimension_numbers<[1], [0], [0], [1], [0, 0, 1, 1], [], []>} : vector<64x256xbf16>, vector<256x128xbf16>, vector<64x128xf32> -> vector<64x128xf32>
    %57 = vector.shape_cast %47 : vector<8x8x256xf32> to vector<64x256xf32>
    %58 = arith.truncf %57 : vector<64x256xf32> to vector<64x256xbf16>
    %c1_32 = arith.constant 1 : index
    %c0_33 = arith.constant 0 : index
    %c0_34 = arith.constant 0 : index
    %59 = vector.load %arg5[%c1_32, %c0_33, %c0_34] : memref<4x256x128xbf16, #tpu.memory_space<vmem>>, vector<1x256x128xbf16>
    %60 = vector.shape_cast %59 : vector<1x256x128xbf16> to vector<256x128xbf16>
    %cst_35 = arith.constant dense<0.000000e+00> : vector<64x128xf32>
    %61 = tpu.matmul %58, %60, %cst_35 {dimension_numbers = #tpu.dot_dimension_numbers<[1], [0], [0], [1], [0, 0, 1, 1], [], []>} : vector<64x256xbf16>, vector<256x128xbf16>, vector<64x128xf32> -> vector<64x128xf32>
    %62 = arith.addf %56, %61 : vector<64x128xf32>
    %63 = vector.shape_cast %49 : vector<8x8x256xf32> to vector<64x256xf32>
    %64 = arith.truncf %63 : vector<64x256xf32> to vector<64x256xbf16>
    %c2_36 = arith.constant 2 : index
    %c0_37 = arith.constant 0 : index
    %c0_38 = arith.constant 0 : index
    %65 = vector.load %arg5[%c2_36, %c0_37, %c0_38] : memref<4x256x128xbf16, #tpu.memory_space<vmem>>, vector<1x256x128xbf16>
    %66 = vector.shape_cast %65 : vector<1x256x128xbf16> to vector<256x128xbf16>
    %cst_39 = arith.constant dense<0.000000e+00> : vector<64x128xf32>
    %67 = tpu.matmul %64, %66, %cst_39 {dimension_numbers = #tpu.dot_dimension_numbers<[1], [0], [0], [1], [0, 0, 1, 1], [], []>} : vector<64x256xbf16>, vector<256x128xbf16>, vector<64x128xf32> -> vector<64x128xf32>
    %68 = arith.addf %62, %67 : vector<64x128xf32>
    %69 = vector.shape_cast %41 : vector<8x8x256xf32> to vector<64x256xf32>
    %70 = arith.truncf %69 : vector<64x256xf32> to vector<64x256xbf16>
    %c3_40 = arith.constant 3 : index
    %c0_41 = arith.constant 0 : index
    %c0_42 = arith.constant 0 : index
    %71 = vector.load %arg5[%c3_40, %c0_41, %c0_42] : memref<4x256x128xbf16, #tpu.memory_space<vmem>>, vector<1x256x128xbf16>
    %72 = vector.shape_cast %71 : vector<1x256x128xbf16> to vector<256x128xbf16>
    %cst_43 = arith.constant dense<0.000000e+00> : vector<64x128xf32>
    %73 = tpu.matmul %70, %72, %cst_43 {dimension_numbers = #tpu.dot_dimension_numbers<[1], [0], [0], [1], [0, 0, 1, 1], [], []>} : vector<64x256xbf16>, vector<256x128xbf16>, vector<64x128xf32> -> vector<64x128xf32>
    %74 = arith.addf %68, %73 : vector<64x128xf32>
    %75 = vector.broadcast %42 : vector<1x128xf32> to vector<64x128xf32>
    %76 = arith.mulf %74, %75 : vector<64x128xf32>
    %77 = vector.broadcast %43 : vector<1x128xf32> to vector<64x128xf32>
    %78 = arith.addf %76, %77 : vector<64x128xf32>
    %cst_44 = arith.constant 0.000000e+00 : f32
    %79 = vector.broadcast %cst_44 : f32 to vector<64x128xf32>
    %80 = arith.maximumf %78, %79 : vector<64x128xf32>
    %81 = vector.extract_strided_slice %80 {offsets = [0, 0], sizes = [64, 32], strides = [1, 1]} : vector<64x128xf32> to vector<64x32xf32>
    %c0_i32 = arith.constant 0 : i32
    %82 = vector.broadcast %c0_i32 : i32 to vector<64x32xi32>
    %83 = vector.extract_strided_slice %80 {offsets = [0, 32], sizes = [64, 32], strides = [1, 1]} : vector<64x128xf32> to vector<64x32xf32>
    %84 = arith.cmpf ogt, %83, %81 : vector<64x32xf32>
    %85 = arith.select %84, %83, %81 : vector<64x32xi1>, vector<64x32xf32>
    %c1_i32 = arith.constant 1 : i32
    %86 = vector.broadcast %c1_i32 : i32 to vector<64x32xi32>
    %87 = arith.select %84, %86, %82 : vector<64x32xi1>, vector<64x32xi32>
    %88 = vector.extract_strided_slice %80 {offsets = [0, 64], sizes = [64, 32], strides = [1, 1]} : vector<64x128xf32> to vector<64x32xf32>
    %89 = arith.cmpf ogt, %88, %85 : vector<64x32xf32>
    %90 = arith.select %89, %88, %85 : vector<64x32xi1>, vector<64x32xf32>
    %c2_i32 = arith.constant 2 : i32
    %91 = vector.broadcast %c2_i32 : i32 to vector<64x32xi32>
    %92 = arith.select %89, %91, %87 : vector<64x32xi1>, vector<64x32xi32>
    %93 = vector.extract_strided_slice %80 {offsets = [0, 96], sizes = [64, 32], strides = [1, 1]} : vector<64x128xf32> to vector<64x32xf32>
    %94 = arith.cmpf ogt, %93, %90 : vector<64x32xf32>
    %95 = arith.select %94, %93, %90 : vector<64x32xi1>, vector<64x32xf32>
    %c3_i32 = arith.constant 3 : i32
    %96 = vector.broadcast %c3_i32 : i32 to vector<64x32xi32>
    %97 = arith.select %94, %96, %92 : vector<64x32xi1>, vector<64x32xi32>
    %c0_45 = arith.constant 0 : index
    %c0_46 = arith.constant 0 : index
    %c0_47 = arith.constant 0 : index
    %98 = vector.load %arg8[%c0_45, %c0_46, %c0_47] : memref<1x64x32xf32, #tpu.memory_space<vmem>>, vector<1x64x32xf32>
    %99 = vector.shape_cast %98 : vector<1x64x32xf32> to vector<64x32xf32>
    %100 = vector.shape_cast %95 : vector<64x32xf32> to vector<1x64x32xf32>
    tpu.vector_store %arg8[%c0_45, %c0_46, %c0_47], %100 {strides = array<i32>} : memref<1x64x32xf32, #tpu.memory_space<vmem>>, vector<1x64x32xf32>,
    %c0_48 = arith.constant 0 : index
    %c0_49 = arith.constant 0 : index
    %c0_50 = arith.constant 0 : index
    %101 = vector.load %arg9[%c0_48, %c0_49, %c0_50] : memref<1x64x32xi32, #tpu.memory_space<vmem>>, vector<1x64x32xi32>
    %102 = vector.shape_cast %101 : vector<1x64x32xi32> to vector<64x32xi32>
    %103 = vector.shape_cast %97 : vector<64x32xi32> to vector<1x64x32xi32>
    tpu.vector_store %arg9[%c0_48, %c0_49, %c0_50], %103 {strides = array<i32>} : memref<1x64x32xi32, #tpu.memory_space<vmem>>, vector<1x64x32xi32>,
    return
  }
  func.func @transform_0(%arg0: i32) -> (i32, i32, i32, i32) {
    %c0_i32 = arith.constant 0 : i32
    %c0_i32_0 = arith.constant 0 : i32
    %c0_i32_1 = arith.constant 0 : i32
    %c0_i32_2 = arith.constant 0 : i32
    return %arg0, %c0_i32, %c0_i32_0, %c0_i32_1 : i32, i32, i32, i32
  }
  func.func @transform_1(%arg0: i32) -> (i32, i32, i32) {
    %c0_i32 = arith.constant 0 : i32
    %c0_i32_0 = arith.constant 0 : i32
    %c0_i32_1 = arith.constant 0 : i32
    %c0_i32_2 = arith.constant 0 : i32
    return %c0_i32, %c0_i32_0, %c0_i32_1 : i32, i32, i32
  }
  func.func @transform_2(%arg0: i32) -> (i32, i32) {
    %c0_i32 = arith.constant 0 : i32
    %c0_i32_0 = arith.constant 0 : i32
    %c0_i32_1 = arith.constant 0 : i32
    return %c0_i32, %c0_i32_0 : i32, i32
  }
  func.func @transform_3(%arg0: i32) -> (i32, i32) {
    %c0_i32 = arith.constant 0 : i32
    %c0_i32_0 = arith.constant 0 : i32
    %c0_i32_1 = arith.constant 0 : i32
    return %c0_i32, %c0_i32_0 : i32, i32
  }
  func.func @transform_4(%arg0: i32) -> (i32, i32, i32) {
    %c0_i32 = arith.constant 0 : i32
    %c0_i32_0 = arith.constant 0 : i32
    %c0_i32_1 = arith.constant 0 : i32
    %c0_i32_2 = arith.constant 0 : i32
    return %c0_i32, %c0_i32_0, %c0_i32_1 : i32, i32, i32
  }
  func.func @transform_5(%arg0: i32) -> (i32, i32) {
    %c0_i32 = arith.constant 0 : i32
    %c0_i32_0 = arith.constant 0 : i32
    %c0_i32_1 = arith.constant 0 : i32
    return %c0_i32, %c0_i32_0 : i32, i32
  }
  func.func @transform_6(%arg0: i32) -> (i32, i32) {
    %c0_i32 = arith.constant 0 : i32
    %c0_i32_0 = arith.constant 0 : i32
    %c0_i32_1 = arith.constant 0 : i32
    return %c0_i32, %c0_i32_0 : i32, i32
  }
  func.func @transform_7(%arg0: i32) -> (i32, i32, i32) {
    %c0_i32 = arith.constant 0 : i32
    %c0_i32_0 = arith.constant 0 : i32
    %c0_i32_1 = arith.constant 0 : i32
    return %arg0, %c0_i32, %c0_i32_0 : i32, i32, i32
  }
  func.func @transform_8(%arg0: i32) -> (i32, i32, i32) {
    %c0_i32 = arith.constant 0 : i32
    %c0_i32_0 = arith.constant 0 : i32
    %c0_i32_1 = arith.constant 0 : i32
    return %arg0, %c0_i32, %c0_i32_0 : i32, i32, i32
  }
}

module attributes {stable_mosaic.version = 11 : i64} {
  func.func @_linear_kernel(%arg0: i32, %arg1: memref<2x2048xf32, #tpu.memory_space<vmem>>, %arg2: memref<2048x128xbf16, #tpu.memory_space<vmem>>, %arg3: memref<1x128xf32, #tpu.memory_space<vmem>>, %arg4: memref<2x128xf32, #tpu.memory_space<vmem>>) attributes {dimension_semantics = [#tpu.dimension_semantics<parallel>], iteration_bounds = array<i64: 1>, scalar_prefetch = 0 : i64, scratch_operands = 0 : i64, tpu.core_type = #tpu.core_type<tc>, window_params = [{transform_indices = @transform_0, window_bounds = array<i64: 2, 2048>}, {pipeline_mode = #tpu.pipeline_mode<synchronous>, transform_indices = @transform_1, window_bounds = array<i64: 2048, 128>}, {pipeline_mode = #tpu.pipeline_mode<synchronous>, transform_indices = @transform_2, window_bounds = array<i64: 1, 128>}, {transform_indices = @transform_3, window_bounds = array<i64: 2, 128>}]} {
    %c0 = arith.constant 0 : index
    %c0_0 = arith.constant 0 : index
    %0 = vector.load %arg1[%c0, %c0_0] : memref<2x2048xf32, #tpu.memory_space<vmem>>, vector<2x2048xf32>
    %1 = arith.truncf %0 : vector<2x2048xf32> to vector<2x2048xbf16>
    %c0_1 = arith.constant 0 : index
    %c0_2 = arith.constant 0 : index
    %2 = vector.load %arg2[%c0_1, %c0_2] : memref<2048x128xbf16, #tpu.memory_space<vmem>>, vector<2048x128xbf16>
    %cst = arith.constant dense<0.000000e+00> : vector<2x128xf32>
    %3 = tpu.matmul %1, %2, %cst {dimension_numbers = #tpu.dot_dimension_numbers<[1], [0], [0], [1], [0, 0, 1, 1], [], []>} : vector<2x2048xbf16>, vector<2048x128xbf16>, vector<2x128xf32> -> vector<2x128xf32>
    %c0_3 = arith.constant 0 : index
    %c0_4 = arith.constant 0 : index
    %4 = vector.load %arg3[%c0_3, %c0_4] : memref<1x128xf32, #tpu.memory_space<vmem>>, vector<1x128xf32>
    %5 = vector.broadcast %4 : vector<1x128xf32> to vector<2x128xf32>
    %6 = arith.addf %3, %5 : vector<2x128xf32>
    %c0_5 = arith.constant 0 : index
    %c0_6 = arith.constant 0 : index
    %7 = vector.load %arg4[%c0_5, %c0_6] : memref<2x128xf32, #tpu.memory_space<vmem>>, vector<2x128xf32>
    tpu.vector_store %arg4[%c0_5, %c0_6], %6 {strides = array<i32>} : memref<2x128xf32, #tpu.memory_space<vmem>>, vector<2x128xf32>,
    return
  }
  func.func @transform_0(%arg0: i32) -> (i32, i32) {
    %c0_i32 = arith.constant 0 : i32
    %c0_i32_0 = arith.constant 0 : i32
    return %arg0, %c0_i32 : i32, i32
  }
  func.func @transform_1(%arg0: i32) -> (i32, i32) {
    %c0_i32 = arith.constant 0 : i32
    %c0_i32_0 = arith.constant 0 : i32
    %c0_i32_1 = arith.constant 0 : i32
    return %c0_i32, %c0_i32_0 : i32, i32
  }
  func.func @transform_2(%arg0: i32) -> (i32, i32) {
    %c0_i32 = arith.constant 0 : i32
    %c0_i32_0 = arith.constant 0 : i32
    %c0_i32_1 = arith.constant 0 : i32
    return %c0_i32, %c0_i32_0 : i32, i32
  }
  func.func @transform_3(%arg0: i32) -> (i32, i32) {
    %c0_i32 = arith.constant 0 : i32
    %c0_i32_0 = arith.constant 0 : i32
    return %arg0, %c0_i32 : i32, i32
  }
}

module attributes {stable_mosaic.version = 11 : i64} {
  func.func @_linear_kernel(%arg0: i32, %arg1: memref<2x128xf32, #tpu.memory_space<vmem>>, %arg2: memref<128x2048xbf16, #tpu.memory_space<vmem>>, %arg3: memref<1x2048xf32, #tpu.memory_space<vmem>>, %arg4: memref<2x2048xf32, #tpu.memory_space<vmem>>) attributes {dimension_semantics = [#tpu.dimension_semantics<parallel>], iteration_bounds = array<i64: 1>, scalar_prefetch = 0 : i64, scratch_operands = 0 : i64, tpu.core_type = #tpu.core_type<tc>, window_params = [{transform_indices = @transform_0, window_bounds = array<i64: 2, 128>}, {pipeline_mode = #tpu.pipeline_mode<synchronous>, transform_indices = @transform_1, window_bounds = array<i64: 128, 2048>}, {pipeline_mode = #tpu.pipeline_mode<synchronous>, transform_indices = @transform_2, window_bounds = array<i64: 1, 2048>}, {transform_indices = @transform_3, window_bounds = array<i64: 2, 2048>}]} {
    %c0 = arith.constant 0 : index
    %c0_0 = arith.constant 0 : index
    %0 = vector.load %arg1[%c0, %c0_0] : memref<2x128xf32, #tpu.memory_space<vmem>>, vector<2x128xf32>
    %1 = arith.truncf %0 : vector<2x128xf32> to vector<2x128xbf16>
    %c0_1 = arith.constant 0 : index
    %c0_2 = arith.constant 0 : index
    %2 = vector.load %arg2[%c0_1, %c0_2] : memref<128x2048xbf16, #tpu.memory_space<vmem>>, vector<128x2048xbf16>
    %cst = arith.constant dense<0.000000e+00> : vector<2x2048xf32>
    %3 = tpu.matmul %1, %2, %cst {dimension_numbers = #tpu.dot_dimension_numbers<[1], [0], [0], [1], [0, 0, 1, 1], [], []>} : vector<2x128xbf16>, vector<128x2048xbf16>, vector<2x2048xf32> -> vector<2x2048xf32>
    %c0_3 = arith.constant 0 : index
    %c0_4 = arith.constant 0 : index
    %4 = vector.load %arg3[%c0_3, %c0_4] : memref<1x2048xf32, #tpu.memory_space<vmem>>, vector<1x2048xf32>
    %5 = vector.broadcast %4 : vector<1x2048xf32> to vector<2x2048xf32>
    %6 = arith.addf %3, %5 : vector<2x2048xf32>
    %c0_5 = arith.constant 0 : index
    %c0_6 = arith.constant 0 : index
    %7 = vector.load %arg4[%c0_5, %c0_6] : memref<2x2048xf32, #tpu.memory_space<vmem>>, vector<2x2048xf32>
    tpu.vector_store %arg4[%c0_5, %c0_6], %6 {strides = array<i32>} : memref<2x2048xf32, #tpu.memory_space<vmem>>, vector<2x2048xf32>,
    return
  }
  func.func @transform_0(%arg0: i32) -> (i32, i32) {
    %c0_i32 = arith.constant 0 : i32
    %c0_i32_0 = arith.constant 0 : i32
    return %arg0, %c0_i32 : i32, i32
  }
  func.func @transform_1(%arg0: i32) -> (i32, i32) {
    %c0_i32 = arith.constant 0 : i32
    %c0_i32_0 = arith.constant 0 : i32
    %c0_i32_1 = arith.constant 0 : i32
    return %c0_i32, %c0_i32_0 : i32, i32
  }
  func.func @transform_2(%arg0: i32) -> (i32, i32) {
    %c0_i32 = arith.constant 0 : i32
    %c0_i32_0 = arith.constant 0 : i32
    %c0_i32_1 = arith.constant 0 : i32
    return %c0_i32, %c0_i32_0 : i32, i32
  }
  func.func @transform_3(%arg0: i32) -> (i32, i32) {
    %c0_i32 = arith.constant 0 : i32
    %c0_i32_0 = arith.constant 0 : i32
    return %arg0, %c0_i32 : i32, i32
  }
}

module attributes {stable_mosaic.version = 11 : i64} {
  func.func @_decoder_kernel(%arg0: i32, %arg1: memref<1x64x32xf32, #tpu.memory_space<vmem>>, %arg2: memref<1x64x32xi32, #tpu.memory_space<vmem>>, %arg3: memref<4x32x256xbf16, #tpu.memory_space<vmem>>, %arg4: memref<1x256xf32, #tpu.memory_space<vmem>>, %arg5: memref<1x256xf32, #tpu.memory_space<vmem>>, %arg6: memref<256x192xbf16, #tpu.memory_space<vmem>>, %arg7: memref<1x192xf32, #tpu.memory_space<vmem>>, %arg8: memref<1x192xf32, #tpu.memory_space<vmem>>, %arg9: memref<1x64x192xf32, #tpu.memory_space<vmem>>) attributes {dimension_semantics = [#tpu.dimension_semantics<parallel>], iteration_bounds = array<i64: 2>, scalar_prefetch = 0 : i64, scratch_operands = 0 : i64, tpu.core_type = #tpu.core_type<tc>, window_params = [{transform_indices = @transform_0, window_bounds = array<i64: 1, 64, 32>}, {transform_indices = @transform_1, window_bounds = array<i64: 1, 64, 32>}, {pipeline_mode = #tpu.pipeline_mode<synchronous>, transform_indices = @transform_2, window_bounds = array<i64: 4, 32, 256>}, {pipeline_mode = #tpu.pipeline_mode<synchronous>, transform_indices = @transform_3, window_bounds = array<i64: 1, 256>}, {pipeline_mode = #tpu.pipeline_mode<synchronous>, transform_indices = @transform_4, window_bounds = array<i64: 1, 256>}, {pipeline_mode = #tpu.pipeline_mode<synchronous>, transform_indices = @transform_5, window_bounds = array<i64: 256, 192>}, {pipeline_mode = #tpu.pipeline_mode<synchronous>, transform_indices = @transform_6, window_bounds = array<i64: 1, 192>}, {pipeline_mode = #tpu.pipeline_mode<synchronous>, transform_indices = @transform_7, window_bounds = array<i64: 1, 192>}, {transform_indices = @transform_8, window_bounds = array<i64: 1, 64, 192>}]} {
    %c0 = arith.constant 0 : index
    %c0_0 = arith.constant 0 : index
    %c0_1 = arith.constant 0 : index
    %0 = vector.load %arg1[%c0, %c0_0, %c0_1] : memref<1x64x32xf32, #tpu.memory_space<vmem>>, vector<1x64x32xf32>
    %1 = vector.shape_cast %0 : vector<1x64x32xf32> to vector<64x32xf32>
    %c0_2 = arith.constant 0 : index
    %c0_3 = arith.constant 0 : index
    %c0_4 = arith.constant 0 : index
    %2 = vector.load %arg2[%c0_2, %c0_3, %c0_4] : memref<1x64x32xi32, #tpu.memory_space<vmem>>, vector<1x64x32xi32>
    %3 = vector.shape_cast %2 : vector<1x64x32xi32> to vector<64x32xi32>
    %c0_i32 = arith.constant 0 : i32
    %4 = vector.broadcast %c0_i32 : i32 to vector<64x32xi32>
    %5 = arith.cmpi eq, %3, %4 : vector<64x32xi32>
    %cst = arith.constant 0.000000e+00 : f32
    %6 = vector.broadcast %cst : f32 to vector<64x32xf32>
    %7 = arith.select %5, %1, %6 : vector<64x32xi1>, vector<64x32xf32>
    %8 = arith.truncf %7 : vector<64x32xf32> to vector<64x32xbf16>
    %c0_5 = arith.constant 0 : index
    %c0_6 = arith.constant 0 : index
    %c0_7 = arith.constant 0 : index
    %9 = vector.load %arg3[%c0_5, %c0_6, %c0_7] : memref<4x32x256xbf16, #tpu.memory_space<vmem>>, vector<1x32x256xbf16>
    %10 = vector.shape_cast %9 : vector<1x32x256xbf16> to vector<32x256xbf16>
    %cst_8 = arith.constant dense<0.000000e+00> : vector<64x256xf32>
    %11 = tpu.matmul %8, %10, %cst_8 {dimension_numbers = #tpu.dot_dimension_numbers<[1], [0], [0], [1], [0, 0, 1, 1], [], []>} : vector<64x32xbf16>, vector<32x256xbf16>, vector<64x256xf32> -> vector<64x256xf32>
    %c1_i32 = arith.constant 1 : i32
    %12 = vector.broadcast %c1_i32 : i32 to vector<64x32xi32>
    %13 = arith.cmpi eq, %3, %12 : vector<64x32xi32>
    %cst_9 = arith.constant 0.000000e+00 : f32
    %14 = vector.broadcast %cst_9 : f32 to vector<64x32xf32>
    %15 = arith.select %13, %1, %14 : vector<64x32xi1>, vector<64x32xf32>
    %16 = arith.truncf %15 : vector<64x32xf32> to vector<64x32xbf16>
    %c1 = arith.constant 1 : index
    %c0_10 = arith.constant 0 : index
    %c0_11 = arith.constant 0 : index
    %17 = vector.load %arg3[%c1, %c0_10, %c0_11] : memref<4x32x256xbf16, #tpu.memory_space<vmem>>, vector<1x32x256xbf16>
    %18 = vector.shape_cast %17 : vector<1x32x256xbf16> to vector<32x256xbf16>
    %cst_12 = arith.constant dense<0.000000e+00> : vector<64x256xf32>
    %19 = tpu.matmul %16, %18, %cst_12 {dimension_numbers = #tpu.dot_dimension_numbers<[1], [0], [0], [1], [0, 0, 1, 1], [], []>} : vector<64x32xbf16>, vector<32x256xbf16>, vector<64x256xf32> -> vector<64x256xf32>
    %20 = arith.addf %11, %19 : vector<64x256xf32>
    %c2_i32 = arith.constant 2 : i32
    %21 = vector.broadcast %c2_i32 : i32 to vector<64x32xi32>
    %22 = arith.cmpi eq, %3, %21 : vector<64x32xi32>
    %cst_13 = arith.constant 0.000000e+00 : f32
    %23 = vector.broadcast %cst_13 : f32 to vector<64x32xf32>
    %24 = arith.select %22, %1, %23 : vector<64x32xi1>, vector<64x32xf32>
    %25 = arith.truncf %24 : vector<64x32xf32> to vector<64x32xbf16>
    %c2 = arith.constant 2 : index
    %c0_14 = arith.constant 0 : index
    %c0_15 = arith.constant 0 : index
    %26 = vector.load %arg3[%c2, %c0_14, %c0_15] : memref<4x32x256xbf16, #tpu.memory_space<vmem>>, vector<1x32x256xbf16>
    %27 = vector.shape_cast %26 : vector<1x32x256xbf16> to vector<32x256xbf16>
    %cst_16 = arith.constant dense<0.000000e+00> : vector<64x256xf32>
    %28 = tpu.matmul %25, %27, %cst_16 {dimension_numbers = #tpu.dot_dimension_numbers<[1], [0], [0], [1], [0, 0, 1, 1], [], []>} : vector<64x32xbf16>, vector<32x256xbf16>, vector<64x256xf32> -> vector<64x256xf32>
    %29 = arith.addf %20, %28 : vector<64x256xf32>
    %c3_i32 = arith.constant 3 : i32
    %30 = vector.broadcast %c3_i32 : i32 to vector<64x32xi32>
    %31 = arith.cmpi eq, %3, %30 : vector<64x32xi32>
    %cst_17 = arith.constant 0.000000e+00 : f32
    %32 = vector.broadcast %cst_17 : f32 to vector<64x32xf32>
    %33 = arith.select %31, %1, %32 : vector<64x32xi1>, vector<64x32xf32>
    %34 = arith.truncf %33 : vector<64x32xf32> to vector<64x32xbf16>
    %c3 = arith.constant 3 : index
    %c0_18 = arith.constant 0 : index
    %c0_19 = arith.constant 0 : index
    %35 = vector.load %arg3[%c3, %c0_18, %c0_19] : memref<4x32x256xbf16, #tpu.memory_space<vmem>>, vector<1x32x256xbf16>
    %36 = vector.shape_cast %35 : vector<1x32x256xbf16> to vector<32x256xbf16>
    %cst_20 = arith.constant dense<0.000000e+00> : vector<64x256xf32>
    %37 = tpu.matmul %34, %36, %cst_20 {dimension_numbers = #tpu.dot_dimension_numbers<[1], [0], [0], [1], [0, 0, 1, 1], [], []>} : vector<64x32xbf16>, vector<32x256xbf16>, vector<64x256xf32> -> vector<64x256xf32>
    %38 = arith.addf %29, %37 : vector<64x256xf32>
    %c0_21 = arith.constant 0 : index
    %c0_22 = arith.constant 0 : index
    %39 = vector.load %arg4[%c0_21, %c0_22] : memref<1x256xf32, #tpu.memory_space<vmem>>, vector<1x256xf32>
    %40 = vector.broadcast %39 : vector<1x256xf32> to vector<64x256xf32>
    %41 = arith.mulf %38, %40 : vector<64x256xf32>
    %c0_23 = arith.constant 0 : index
    %c0_24 = arith.constant 0 : index
    %42 = vector.load %arg5[%c0_23, %c0_24] : memref<1x256xf32, #tpu.memory_space<vmem>>, vector<1x256xf32>
    %43 = vector.broadcast %42 : vector<1x256xf32> to vector<64x256xf32>
    %44 = arith.addf %41, %43 : vector<64x256xf32>
    %cst_25 = arith.constant 0.000000e+00 : f32
    %45 = vector.broadcast %cst_25 : f32 to vector<64x256xf32>
    %46 = arith.maximumf %44, %45 : vector<64x256xf32>
    %47 = arith.truncf %46 : vector<64x256xf32> to vector<64x256xbf16>
    %c0_26 = arith.constant 0 : index
    %c0_27 = arith.constant 0 : index
    %48 = vector.load %arg6[%c0_26, %c0_27] : memref<256x192xbf16, #tpu.memory_space<vmem>>, vector<256x192xbf16>
    %cst_28 = arith.constant dense<0.000000e+00> : vector<64x192xf32>
    %49 = tpu.matmul %47, %48, %cst_28 {dimension_numbers = #tpu.dot_dimension_numbers<[1], [0], [0], [1], [0, 0, 1, 1], [], []>} : vector<64x256xbf16>, vector<256x192xbf16>, vector<64x192xf32> -> vector<64x192xf32>
    %c0_29 = arith.constant 0 : index
    %c0_30 = arith.constant 0 : index
    %50 = vector.load %arg7[%c0_29, %c0_30] : memref<1x192xf32, #tpu.memory_space<vmem>>, vector<1x192xf32>
    %51 = vector.broadcast %50 : vector<1x192xf32> to vector<64x192xf32>
    %52 = arith.mulf %49, %51 : vector<64x192xf32>
    %c0_31 = arith.constant 0 : index
    %c0_32 = arith.constant 0 : index
    %53 = vector.load %arg8[%c0_31, %c0_32] : memref<1x192xf32, #tpu.memory_space<vmem>>, vector<1x192xf32>
    %54 = vector.broadcast %53 : vector<1x192xf32> to vector<64x192xf32>
    %55 = arith.addf %52, %54 : vector<64x192xf32>
    %cst_33 = arith.constant 0.000000e+00 : f32
    %56 = vector.broadcast %cst_33 : f32 to vector<64x192xf32>
    %57 = arith.maximumf %55, %56 : vector<64x192xf32>
    %c0_34 = arith.constant 0 : index
    %c0_35 = arith.constant 0 : index
    %c0_36 = arith.constant 0 : index
    %58 = vector.load %arg9[%c0_34, %c0_35, %c0_36] : memref<1x64x192xf32, #tpu.memory_space<vmem>>, vector<1x64x192xf32>
    %59 = vector.shape_cast %58 : vector<1x64x192xf32> to vector<64x192xf32>
    %60 = vector.shape_cast %57 : vector<64x192xf32> to vector<1x64x192xf32>
    tpu.vector_store %arg9[%c0_34, %c0_35, %c0_36], %60 {strides = array<i32>} : memref<1x64x192xf32, #tpu.memory_space<vmem>>, vector<1x64x192xf32>,
    return
  }
  func.func @transform_0(%arg0: i32) -> (i32, i32, i32) {
    %c0_i32 = arith.constant 0 : i32
    %c0_i32_0 = arith.constant 0 : i32
    %c0_i32_1 = arith.constant 0 : i32
    return %arg0, %c0_i32, %c0_i32_0 : i32, i32, i32
  }
  func.func @transform_1(%arg0: i32) -> (i32, i32, i32) {
    %c0_i32 = arith.constant 0 : i32
    %c0_i32_0 = arith.constant 0 : i32
    %c0_i32_1 = arith.constant 0 : i32
    return %arg0, %c0_i32, %c0_i32_0 : i32, i32, i32
  }
  func.func @transform_2(%arg0: i32) -> (i32, i32, i32) {
    %c0_i32 = arith.constant 0 : i32
    %c0_i32_0 = arith.constant 0 : i32
    %c0_i32_1 = arith.constant 0 : i32
    %c0_i32_2 = arith.constant 0 : i32
    return %c0_i32, %c0_i32_0, %c0_i32_1 : i32, i32, i32
  }
  func.func @transform_3(%arg0: i32) -> (i32, i32) {
    %c0_i32 = arith.constant 0 : i32
    %c0_i32_0 = arith.constant 0 : i32
    %c0_i32_1 = arith.constant 0 : i32
    return %c0_i32, %c0_i32_0 : i32, i32
  }
  func.func @transform_4(%arg0: i32) -> (i32, i32) {
    %c0_i32 = arith.constant 0 : i32
    %c0_i32_0 = arith.constant 0 : i32
    %c0_i32_1 = arith.constant 0 : i32
    return %c0_i32, %c0_i32_0 : i32, i32
  }
  func.func @transform_5(%arg0: i32) -> (i32, i32) {
    %c0_i32 = arith.constant 0 : i32
    %c0_i32_0 = arith.constant 0 : i32
    %c0_i32_1 = arith.constant 0 : i32
    return %c0_i32, %c0_i32_0 : i32, i32
  }
  func.func @transform_6(%arg0: i32) -> (i32, i32) {
    %c0_i32 = arith.constant 0 : i32
    %c0_i32_0 = arith.constant 0 : i32
    %c0_i32_1 = arith.constant 0 : i32
    return %c0_i32, %c0_i32_0 : i32, i32
  }
  func.func @transform_7(%arg0: i32) -> (i32, i32) {
    %c0_i32 = arith.constant 0 : i32
    %c0_i32_0 = arith.constant 0 : i32
    %c0_i32_1 = arith.constant 0 : i32
    return %c0_i32, %c0_i32_0 : i32, i32
  }
  func.func @transform_8(%arg0: i32) -> (i32, i32, i32) {
    %c0_i32 = arith.constant 0 : i32
    %c0_i32_0 = arith.constant 0 : i32
    %c0_i32_1 = arith.constant 0 : i32
    return %arg0, %c0_i32, %c0_i32_0 : i32, i32, i32
  }
}

</mosaic_0001>

<bundles_post_ra>
// kernel: _lambda_.4
= control target key start
LH: loop header
LB: loop body
LE: loop exit
PB: predicated region body
PF: predicated region fallthrough
CT: control target
= control target key end

     0   :  { %s4110_s27 = smov 0   ;;  %s5777_s0 = inlined_call_operand.vmem [shape: f32[2,8,8,192], index: 0, kind: input, shape index: {}]   ;;  %s5778_s1 = inlined_call_operand.vmem [shape: bf16[4,192,256], index: 1, kind: input, shape index: {}]   ;;  %s5779_s2 = inlined_call_operand.vmem [shape: f32[1,256], index: 2, kind: input, shape index: {}]   ;;  %s5780_s3 = inlined_call_operand.vmem [shape: f32[1,256], index: 3, kind: input, shape index: {}]   ;;  %s5781_s4 = inlined_call_operand.vmem [shape: bf16[4,256,128], index: 4, kind: input, shape index: {}]   ;;  %s5782_s5 = inlined_call_operand.vmem [shape: f32[1,128], index: 5, kind: input, shape index: {}]   ;;  %s5783_s6 = inlined_call_operand.vmem [shape: f32[1,128], index: 6, kind: input, shape index: {}]   ;;  %s5784_s7 = inlined_call_operand.vmem [shape: f32[2,64,32], index: 7, kind: output, shape index: {0}]   ;;  %s5785_s8 = inlined_call_operand.vmem [shape: s32[2,64,32], index: 8, kind: output, shape index: {1}]  }
   0x1 LB: > { %s2865_s28 = sadd.s32 4294967295, %s4060_s27   ;;  %p2869_p0 = scmp.ge.s32.totalorder %s4060_s27, 1  ;;  %s4060_s27 = sphi %s4110_s27, %s19_s27  }
   0x2   : > { %p265_p1 = scmp.lt.s32.totalorder %s4060_s27, 3 }
   0x4   : > { %p266_p2 = pnand %p2869_p0, %p265_p1 }
   0x6   : > { %269 = sbr.rel (%p266_p2) target bundleno = 1115 (0x45b), region = 48 }
   0xb   : > { %v2958_v0 = vld [vmem:[%s5778_s1 + $0x130] sm:$0xf]  ;;  %v3920_v1 = vld [vmem:[%s5778_s1 + $0x134] sm:$0xf0]  ;;  %v3919_v5 = vld [vmem:[%s5778_s1 + $0x134] sm:$0xf] }
   0xc   : > { %v2990_v2 = vld [vmem:[%s5778_s1 + $0x170] sm:$0xf]  ;;  %v2959_v3 = vor.u32 %v3920_v1, %v2958_v0  ;;  %v3928_v4 = vld [vmem:[%s5778_s1 + $0x174] sm:$0xf0]  ;;  %v2960_v6 = vld [vmem:[%s5778_s1 + $0x138] sm:$0xf0] }
   0xd   : > { %v2991_v7 = vor.u32 %v3928_v4, %v2990_v2  ;;  %v2963_v8 = vor.u32 %v3919_v5, %v2960_v6  ;;  %v3927_v9 = vld [vmem:[%s5778_s1 + $0x174] sm:$0xf]  ;;  %v2992_v10 = vld [vmem:[%s5778_s1 + $0x178] sm:$0xf0]  ;;  %v2950_v11 = vld [vmem:[%s5778_s1 + $0x120] sm:$0xf] }
   0xe   : > { %605 = vmatpush.bf16.msra.mxu0 %v2959_v3  ;;  %v2995_v12 = vor.u32 %v3927_v9, %v2992_v10  ;;  %v3918_v13 = vld [vmem:[%s5778_s1 + $0x124] sm:$0xf0]  ;;  %v2982_v14 = vld [vmem:[%s5778_s1 + $0x160] sm:$0xf]  ;;  %v3917_v18 = vld [vmem:[%s5778_s1 + $0x124] sm:$0xf] }
   0xf   : > { %v3926_v15 = vld [vmem:[%s5778_s1 + $0x164] sm:$0xf0]  ;;  %638 = vmatpush.bf16.msra.mxu1 %v2991_v7  ;;  %663 = vmatpush.bf16.msra.mxu2 %v2963_v8  ;;  %v2951_v16 = vor.u32 %v3918_v13, %v2950_v11  ;;  %v2952_v19 = vld [vmem:[%s5778_s1 + $0x128] sm:$0xf0]  ;;  %v3925_v20 = vld [vmem:[%s5778_s1 + $0x164] sm:$0xf] }
  0x10   : > { %v2983_v17 = vor.u32 %v3926_v15, %v2982_v14  ;;  %696 = vmatpush.bf16.msra.mxu3 %v2995_v12  ;;  %v2955_v21 = vor.u32 %v3917_v18, %v2952_v19  ;;  %v2984_v22 = vld [vmem:[%s5778_s1 + $0x168] sm:$0xf0]  ;;  %v2942_v23 = vld [vmem:[%s5778_s1 + $0x110] sm:$0xf]  ;;  %v3916_v24 = vld [vmem:[%s5778_s1 + $0x114] sm:$0xf0] }
  0x11   : > { %v2987_v25 = vor.u32 %v3925_v20, %v2984_v22  ;;  %v2974_v26 = vld [vmem:[%s5778_s1 + $0x150] sm:$0xf]  ;;  %v3924_v27 = vld [vmem:[%s5778_s1 + $0x154] sm:$0xf0]  ;;  %v3915_v28 = vld [vmem:[%s5778_s1 + $0x114] sm:$0xf]  ;;  %v2943_v29 = vor.u32 %v3916_v24, %v2942_v23 }
  0x12   : > { %606 = vmatpush.bf16.msra.mxu0 %v2951_v16  ;;  %v2944_v30 = vld [vmem:[%s5778_s1 + $0x118] sm:$0xf0]  ;;  %v3923_v31 = vld [vmem:[%s5778_s1 + $0x154] sm:$0xf]  ;;  %v2975_v33 = vor.u32 %v3924_v27, %v2974_v26  ;;  %v2934_v35 = vld [vmem:[%s5778_s1 + $0x100] sm:$0xf] }
  0x13   : > { %v2976_v32 = vld [vmem:[%s5778_s1 + $0x158] sm:$0xf0]  ;;  %639 = vmatpush.bf16.msra.mxu1 %v2983_v17  ;;  %664 = vmatpush.bf16.msra.mxu2 %v2955_v21  ;;  %v2947_v34 = vor.u32 %v3915_v28, %v2944_v30  ;;  %v3914_v36 = vld [vmem:[%s5778_s1 + $0x104] sm:$0xf0]  ;;  %v2966_v37 = vld [vmem:[%s5778_s1 + $0x140] sm:$0xf] }
  0x14   : > { %697 = vmatpush.bf16.msra.mxu3 %v2987_v25  ;;  %v2979_v38 = vor.u32 %v3923_v31, %v2976_v32  ;;  %v3922_v39 = vld [vmem:[%s5778_s1 + $0x144] sm:$0xf0]  ;;  %v3913_v40 = vld [vmem:[%s5778_s1 + $0x104] sm:$0xf]  ;;  %v2936_v41 = vld [vmem:[%s5778_s1 + $0x108] sm:$0xf0]  ;;  %v2935_v44 = vor.u32 %v3914_v36, %v2934_v35 }
  0x15   : > { %v3921_v42 = vld [vmem:[%s5778_s1 + $0x144] sm:$0xf]  ;;  %v2968_v43 = vld [vmem:[%s5778_s1 + $0x148] sm:$0xf0]  ;;  %p304_p3 = scmp.lt.s32.totalorder %s2865_s28, 1  ;;  %v2967_v45 = vor.u32 %v3922_v39, %v2966_v37  ;;  %v2939_v46 = vor.u32 %v3913_v40, %v2936_v41  ;;  %vm592_vm0 = vcmask 523264  }
  0x16   : > { %607 = vmatpush.bf16.msra.mxu0 %v2943_v29  ;;  %v2926_v47 = vld [vmem:[%s5778_s1 + $0xf0] sm:$0xf]  ;;  %v3912_v48 = vld [vmem:[%s5778_s1 + $0xf4] sm:$0xf0]  ;;  %v2971_v49 = vor.u32 %v3921_v42, %v2968_v43  ;;  %v3911_v50 = vld [vmem:[%s5778_s1 + $0xf4] sm:$0xf] }
  0x17   : > { %640 = vmatpush.bf16.msra.mxu1 %v2975_v33  ;;  %665 = vmatpush.bf16.msra.mxu2 %v2947_v34  ;;  %s5824_s28 = smov (!%p304_p3, %s2865_s28), 1  ;;  %v2928_v51 = vld [vmem:[%s5778_s1 + $0xf8] sm:$0xf0]  ;;  %v2927_v52 = vor.u32 %v3912_v48, %v2926_v47  ;;  %v2918_v55 = vld [vmem:[%s5778_s1 + $0xe0] sm:$0xf]  ;;  %v5786_v57 = vmov 0.0  }
  0x18   : > { %698 = vmatpush.bf16.msra.mxu3 %v2979_v38  ;;  %s3878_s19 = sshll.u32 %s5824_s28, 7  ;;  %v2931_v54 = vor.u32 %v3911_v50, %v2928_v51  ;;  %v3910_v56 = vld [vmem:[%s5778_s1 + $0xe4] sm:$0xf0]  ;;  %v3909_v59 = vld [vmem:[%s5778_s1 + $0xe4] sm:$0xf]  ;;  %vm386_vm1 = vcmask 1040384  }
  0x19   : > { %s4236_s22 = scalar_lea.vmem %s5777_s0, %s3878_s19  ;;  %v2920_v60 = vld [vmem:[%s5778_s1 + $0xe8] sm:$0xf0]  ;;  %v2919_v62 = vor.u32 %v3910_v56, %v2918_v55  ;;  %v3094_v0 = vld [vmem:[%s5778_s1 + $0xb0] sm:$0xf]  ;;  %v3904_v1 = vld [vmem:[%s5778_s1 + $0xb4] sm:$0xf0] }
  0x1a   : > { %608 = vmatpush.bf16.msra.mxu0 %v2935_v44  ;;  %v4239_v53 = vld [vmem:[%s4236_s22 + $0x8] sm:$0xff]  ;;  %v4256_v61 = vld [vmem:[%s4236_s22 + $0x18] sm:$0xff]  ;;  %v2923_v2 = vor.u32 %v3909_v59, %v2920_v60  ;;  %v2910_v3 = vld [vmem:[%s5778_s1 + $0xd0] sm:$0xf]  ;;  %v3095_v5 = vor.u32 %v3904_v1, %v3094_v0  ;;  %s3879_s29 = sshll.u32 %s5824_s28, 6 }
  0x1b   : > { %641 = vmatpush.bf16.msra.mxu1 %v2967_v45  ;;  %666 = vmatpush.bf16.msra.mxu2 %v2939_v46  ;;  %v440_v58 = vpack.c.bf16 %v4239_v53, %v5786_v57  ;;  %v4261_v63 = vpack.c.bf16 %v4256_v61, %v4239_v53  ;;  %v3908_v4 = vld [vmem:[%s5778_s1 + $0xd4] sm:$0xf0]  ;;  %v3062_v6 = vld [vmem:[%s5778_s1 + $0x70] sm:$0xf]  ;;  %v3907_v7 = vld [vmem:[%s5778_s1 + $0xd4] sm:$0xf]  ;;  %s5735_s10 = scalar_lea.vmem %s5784_s7, %s3879_s29  ;;  %s5740_s13 = scalar_lea.vmem %s5785_s8, %s3879_s29 }
  0x1c   : > { %699 = vmatpush.bf16.msra.mxu3 %v2971_v49  ;;  %v2912_v8 = vld [vmem:[%s5778_s1 + $0xd8] sm:$0xf0]  ;;  %v3896_v9 = vld [vmem:[%s5778_s1 + $0x74] sm:$0xf0]  ;;  %v2902_v10 = vld [vmem:[%s5778_s1 + $0xc0] sm:$0xf]  ;;  %v2911_v14 = vor.u32 %v3908_v4, %v2910_v3 }
  0x1d   : > { %v4292_v11 = vld [vmem:[%s4236_s22] sm:$0xff]  ;;  %v3063_v12 = vor.u32 %v3896_v9, %v3062_v6  ;;  %v4295_v13 = vld [vmem:[%s4236_s22 + $0x10] sm:$0xff]  ;;  %v3906_v15 = vld [vmem:[%s5778_s1 + $0xc4] sm:$0xf0]  ;;  %v2915_v19 = vor.u32 %v3907_v7, %v2912_v8 }
  0x1e   : > { %2996 = vmatmul.msk.bf16.vlgmr.msra.gmra.mxu1 %vm592_vm0, %v440_v58  ;;  %609 = vmatpush.bf16.msra.mxu0 %v2927_v52  ;;  %v3905_v16 = vld [vmem:[%s5778_s1 + $0xc4] sm:$0xf]  ;;  %v2904_v17 = vld [vmem:[%s5778_s1 + $0xc8] sm:$0xf0]  ;;  %v4308_v18 = vpack.c.bf16 %v4295_v13, %v4292_v11  ;;  %v3903_v20 = vld [vmem:[%s5778_s1 + $0xb4] sm:$0xf]  ;;  %v2903_v32 = vor.u32 %v3906_v15, %v2902_v10  ;;  %v439_v41 = vpack.c.bf16 %v4292_v11, %v5786_v57 }
  0x1f   : > { %3000 = vmatmul.msk.bf16.vlgmr.msra.gmra.mxu3 %vm592_vm0, %v440_v58  ;;  %667 = vmatpush.bf16.msra.mxu2 %v2931_v54  ;;  %v3054_v21 = vld [vmem:[%s5778_s1 + $0x60] sm:$0xf]  ;;  %v3894_v22 = vld [vmem:[%s5778_s1 + $0x64] sm:$0xf0]  ;;  %v3895_v24 = vld [vmem:[%s5778_s1 + $0x74] sm:$0xf]  ;;  %v2907_v33 = vor.u32 %v3905_v16, %v2904_v17 }
  0x20   : > { %886 = vmatpush.bf16.msrb.mxu3 %v3095_v5  ;;  %853 = vmatpush.bf16.msrb.mxu1 %v3063_v12  ;;  %v3086_v23 = vld [vmem:[%s5778_s1 + $0xa0] sm:$0xf]  ;;  %v3064_v25 = vld [vmem:[%s5778_s1 + $0x78] sm:$0xf0]  ;;  %v3055_v26 = vor.u32 %v3894_v22, %v3054_v21  ;;  %v3902_v27 = vld [vmem:[%s5778_s1 + $0xa4] sm:$0xf0] }
  0x21   : > { %v3096_v28 = vld [vmem:[%s5778_s1 + $0xb8] sm:$0xf0]  ;;  %v3087_v29 = vor.u32 %v3902_v27, %v3086_v23  ;;  %v3046_v30 = vld [vmem:[%s5778_s1 + $0x50] sm:$0xf]  ;;  %v3892_v31 = vld [vmem:[%s5778_s1 + $0x54] sm:$0xf0]  ;;  %v3067_v35 = vor.u32 %v3895_v24, %v3064_v25 }
  0x22   : > { %610 = vmatpush.bf16.msra.mxu0 %v2919_v62  ;;  %v4341_v34 = vld [vmem:[%s4236_s22 + $0x28] sm:$0xff]  ;;  %v3893_v36 = vld [vmem:[%s5778_s1 + $0x64] sm:$0xf]  ;;  %v3099_v37 = vor.u32 %v3903_v20, %v3096_v28  ;;  %v3047_v40 = vor.u32 %v3892_v31, %v3046_v30  ;;  %v3038_v43 = vld [vmem:[%s5778_s1 + $0x40] sm:$0xf] }
  0x23   : > { %668 = vmatpush.bf16.msra.mxu2 %v2923_v2  ;;  %v3056_v38 = vld [vmem:[%s5778_s1 + $0x68] sm:$0xf0]  ;;  %v3901_v39 = vld [vmem:[%s5778_s1 + $0xa4] sm:$0xf]  ;;  %v3890_v44 = vld [vmem:[%s5778_s1 + $0x44] sm:$0xf0]  ;;  %v442_v45 = vpack.c.bf16 %v4341_v34, %v4256_v61 }
  0x24   : > { %854 = vmatpush.bf16.msrb.mxu1 %v3055_v26  ;;  %887 = vmatpush.bf16.msrb.mxu3 %v3087_v29  ;;  %v3088_v42 = vld [vmem:[%s5778_s1 + $0xa8] sm:$0xf0]  ;;  %v3059_v46 = vor.u32 %v3893_v36, %v3056_v38  ;;  %v3891_v48 = vld [vmem:[%s5778_s1 + $0x54] sm:$0xf]  ;;  %v3048_v49 = vld [vmem:[%s5778_s1 + $0x58] sm:$0xf0]  ;;  %v3039_v50 = vor.u32 %v3890_v44, %v3038_v43 }
  0x25   : > { %v3091_v47 = vor.u32 %v3901_v39, %v3088_v42  ;;  %v3030_v51 = vld [vmem:[%s5778_s1 + $0x30] sm:$0xf]  ;;  %v3888_v52 = vld [vmem:[%s5778_s1 + $0x34] sm:$0xf0]  ;;  %v3051_v54 = vor.u32 %v3891_v48, %v3048_v49  ;;  %v3889_v55 = vld [vmem:[%s5778_s1 + $0x44] sm:$0xf] }
  0x26   : > { %611 = vmatpush.bf16.msra.mxu0 %v2911_v14  ;;  %v3899_v56 = vld [vmem:[%s5778_s1 + $0x94] sm:$0xf]  ;;  %v3080_v58 = vld [vmem:[%s5778_s1 + $0x98] sm:$0xf0]  ;;  %v3040_v59 = vld [vmem:[%s5778_s1 + $0x48] sm:$0xf0]  ;;  %v3031_v62 = vor.u32 %v3888_v52, %v3030_v51 }
  0x27   : > { %669 = vmatpush.bf16.msra.mxu2 %v2915_v19  ;;  %v3083_v60 = vor.u32 %v3899_v56, %v3080_v58  ;;  %v3078_v0 = vld [vmem:[%s5778_s1 + $0x90] sm:$0xf]  ;;  %v3900_v1 = vld [vmem:[%s5778_s1 + $0x94] sm:$0xf0]  ;;  %v3022_v2 = vld [vmem:[%s5778_s1 + $0x20] sm:$0xf]  ;;  %v3043_v5 = vor.u32 %v3889_v55, %v3040_v59 }
  0x28   : > { %855 = vmatpush.bf16.msrb.mxu1 %v3047_v40  ;;  %v3886_v3 = vld [vmem:[%s5778_s1 + $0x24] sm:$0xf0]  ;;  %v3079_v4 = vor.u32 %v3900_v1, %v3078_v0  ;;  %v3070_v6 = vld [vmem:[%s5778_s1 + $0x80] sm:$0xf]  ;;  %v3887_v9 = vld [vmem:[%s5778_s1 + $0x34] sm:$0xf] }
  0x29   : > { %v3898_v7 = vld [vmem:[%s5778_s1 + $0x84] sm:$0xf0]  ;;  %v3023_v8 = vor.u32 %v3886_v3, %v3022_v2  ;;  %v3032_v10 = vld [vmem:[%s5778_s1 + $0x38] sm:$0xf0]  ;;  %v3014_v14 = vld [vmem:[%s5778_s1 + $0x10] sm:$0xf] }
  0x2a   : > { %612 = vmatpush.bf16.msra.mxu0 %v2903_v32  ;;  %888 = vmatpush.bf16.msrb.mxu3 %v3079_v4  ;;  %v3071_v12 = vor.u32 %v3898_v7, %v3070_v6  ;;  %v3884_v15 = vld [vmem:[%s5778_s1 + $0x14] sm:$0xf0]  ;;  %v4422_v16 = vld [vmem:[%s4236_s22 + $0x20] sm:$0xff]  ;;  %v4428_v19 = vld [vmem:[%s4236_s22 + $0x48] sm:$0xff]  ;;  %v3035_v20 = vor.u32 %v3887_v9, %v3032_v10  ;;  %v355_v1 = vrot.slane %v4239_v53, 7  ;;  %v4516_v2 = vrot.slane %v5786_v57, 7 }
  0x2b   : > { %670 = vmatpush.bf16.msra.mxu2 %v2907_v33  ;;  %v4425_v17 = vld [vmem:[%s4236_s22 + $0x38] sm:$0xff]  ;;  %v3015_v21 = vor.u32 %v3884_v15, %v3014_v14  ;;  %v3885_v22 = vld [vmem:[%s5778_s1 + $0x24] sm:$0xf]  ;;  %v3024_v23 = vld [vmem:[%s5778_s1 + $0x28] sm:$0xf0]  ;;  %v441_v24 = vpack.c.bf16 %v4422_v16, %v4295_v13  ;;  %v354_v3 = vrot.slane %v4292_v11, 7 }
  0x2c   : > { %856 = vmatpush.bf16.msrb.mxu1 %v3039_v50  ;;  %v3006_v25 = vld [vmem:[%s5778_s1] sm:$0xf]  ;;  %v3882_v26 = vld [vmem:[%s5778_s1 + $0x4] sm:$0xf0]  ;;  %v444_v27 = vpack.c.bf16 %v4428_v19, %v4425_v17  ;;  %v3027_v28 = vor.u32 %v3885_v22, %v3024_v23  ;;  %v3897_v30 = vld [vmem:[%s5778_s1 + $0x84] sm:$0xf] }
  0x2d   : > { %613 = vmatmul.bf16.vlgmr.msra.gmra.mxu0 %v439_v41  ;;  %v3007_v29 = vor.u32 %v3882_v26, %v3006_v25  ;;  %v3072_v31 = vld [vmem:[%s5778_s1 + $0x88] sm:$0xf0]  ;;  %v3883_v32 = vld [vmem:[%s5778_s1 + $0x14] sm:$0xf]  ;;  %v3881_v36 = vld [vmem:[%s5778_s1 + $0x4] sm:$0xf] }
  0x2e   : > { %911 = vmatpush.bf16.msrb.mxu0 %v3067_v35  ;;  %2997 = vmatmul.msk.bf16.gmra.mxu1 %vm592_vm0, %v442_v45  ;;  %v3075_v33 = vor.u32 %v3897_v30, %v3072_v31  ;;  %v3016_v35 = vld [vmem:[%s5778_s1 + $0x18] sm:$0xf0]  ;;  %v4467_v40 = vld [vmem:[%s4236_s22 + $0x30] sm:$0xff]  ;;  %v4476_v43 = vld [vmem:[%s4236_s22 + $0x68] sm:$0xff]  ;;  %v4527_v6 = vsel %vm386_vm1, 0.0, %v355_v1  ;;  %v406_v53 = vsel %vm386_vm1, 0.0, %v4516_v2 }
  0x2f   : > { %944 = vmatpush.bf16.msrb.mxu2 %v3099_v37  ;;  %3001 = vmatmul.msk.bf16.gmra.mxu3 %vm592_vm0, %v442_v45  ;;  %v3008_v37 = vld [vmem:[%s5778_s1 + $0x8] sm:$0xf0]  ;;  %v3019_v38 = vor.u32 %v3883_v32, %v3016_v35  ;;  %v4473_v42 = vld [vmem:[%s4236_s22 + $0x58] sm:$0xff]  ;;  %v3262_v48 = vld [vmem:[%s5778_s1 + $0x230] sm:$0xf]  ;;  %v408_v10 = vpack.c.bf16 %v4527_v6, %v406_v53  ;;  %v357_v35 = vrot.slane %v4256_v61, 7 }
  0x30   : > { %671 = vmatmul.bf16.vlgmr.msra.gmra.mxu2 %v439_v41  ;;  %857 = vmatpush.bf16.msrb.mxu1 %v3031_v62  ;;  %v3011_v39 = vor.u32 %v3881_v36, %v3008_v37  ;;  %v4470_v41 = vld [vmem:[%s4236_s22 + $0x40] sm:$0xff]  ;;  %v446_v45 = vpack.c.bf16 %v4476_v43, %v4473_v42  ;;  %v3952_v50 = vld [vmem:[%s5778_s1 + $0x234] sm:$0xf0]  ;;  %v3943_v51 = vld [vmem:[%s5778_s1 + $0x1f4] sm:$0xf]  ;;  %v359_v36 = vrot.slane %v4341_v34, 7 }
  0x31   : > { %889 = vmatpush.bf16.msrb.mxu3 %v3071_v12  ;;  %v443_v44 = vpack.c.bf16 %v4470_v41, %v4467_v40  ;;  %v3232_v52 = vld [vmem:[%s5778_s1 + $0x1f8] sm:$0xf0]  ;;  %v3230_v56 = vld [vmem:[%s5778_s1 + $0x1f0] sm:$0xf]  ;;  %v3944_v58 = vld [vmem:[%s5778_s1 + $0x1f4] sm:$0xf0] }
  0x32   : > { %912 = vmatpush.bf16.msrb.mxu0 %v3059_v46  ;;  %v3951_v46 = vld [vmem:[%s5778_s1 + $0x234] sm:$0xf]  ;;  %v3235_v55 = vor.u32 %v3943_v51, %v3232_v52  ;;  %v3941_v59 = vld [vmem:[%s5778_s1 + $0x1e4] sm:$0xf]  ;;  %v3224_v62 = vld [vmem:[%s5778_s1 + $0x1e8] sm:$0xf0] }
  0x33   : > { %945 = vmatpush.bf16.msrb.mxu2 %v3091_v47  ;;  %v3264_v47 = vld [vmem:[%s5778_s1 + $0x238] sm:$0xf0]  ;;  %v3227_v0 = vor.u32 %v3941_v59, %v3224_v62  ;;  %v4520_v4 = vld [vmem:[%s4236_s22 + $0x50] sm:$0xff]  ;;  %vm3100_vm2 = vmneg %vm386_vm1  ;;  %v361_v53 = vrot.slane %v4425_v17, 7 }
  0x34   : > { %858 = vmatpush.bf16.msrb.mxu1 %v3023_v8  ;;  %v3267_v49 = vor.u32 %v3951_v46, %v3264_v47  ;;  %v3103_v8 = vpack.c.bf16 %v354_v3, %v4516_v2  ;;  %vm4536_vm3 = vmpackc.low %vm3100_vm2, %vm3100_vm2  ;;  %v3949_v12 = vld [vmem:[%s5778_s1 + $0x224] sm:$0xf]  ;;  %v3256_v14 = vld [vmem:[%s5778_s1 + $0x228] sm:$0xf0] }
  0x35   : > { %v3222_v15 = vld [vmem:[%s5778_s1 + $0x1e0] sm:$0xf]  ;;  %v3950_v23 = vld [vmem:[%s5778_s1 + $0x224] sm:$0xf0]  ;;  %v3939_v26 = vld [vmem:[%s5778_s1 + $0x1d4] sm:$0xf] }
  0x36   : > { %913 = vmatpush.bf16.msrb.mxu0 %v3051_v54  ;;  %v3263_v54 = vor.u32 %v3952_v50, %v3262_v48  ;;  %v3254_v22 = vld [vmem:[%s5778_s1 + $0x220] sm:$0xf]  ;;  %v3940_v30 = vld [vmem:[%s5778_s1 + $0x1d4] sm:$0xf0]  ;;  %v3937_v31 = vld [vmem:[%s5778_s1 + $0x1c4] sm:$0xf] }
  0x37   : > { %946 = vmatpush.bf16.msrb.mxu2 %v3083_v60  ;;  %v3231_v60 = vor.u32 %v3944_v58, %v3230_v56  ;;  %v3255_v25 = vor.u32 %v3950_v23, %v3254_v22  ;;  %v3208_v32 = vld [vmem:[%s5778_s1 + $0x1c8] sm:$0xf0]  ;;  %v3947_v47 = vld [vmem:[%s5778_s1 + $0x214] sm:$0xf]  ;;  %v3248_v48 = vld [vmem:[%s5778_s1 + $0x218] sm:$0xf0] }
  0x38   : > { %859 = vmatpush.bf16.msrb.mxu1 %v3015_v21  ;;  %1167 = vmatpush.bf16.msra.mxu3 %v3263_v54  ;;  %v3942_v21 = vld [vmem:[%s5778_s1 + $0x1e4] sm:$0xf0]  ;;  %v3211_v37 = vor.u32 %v3937_v31, %v3208_v32  ;;  %v3251_v50 = vor.u32 %v3947_v47, %v3248_v48  ;;  %v3246_v52 = vld [vmem:[%s5778_s1 + $0x210] sm:$0xf]  ;;  %v3948_v54 = vld [vmem:[%s5778_s1 + $0x214] sm:$0xf0] }
  0x39   : > { %v3938_v51 = vld [vmem:[%s5778_s1 + $0x1c4] sm:$0xf0]  ;;  %v3247_v56 = vor.u32 %v3948_v54, %v3246_v52  ;;  %v3935_v58 = vld [vmem:[%s5778_s1 + $0x1b4] sm:$0xf]  ;;  %v3200_v59 = vld [vmem:[%s5778_s1 + $0x1b8] sm:$0xf0] }
  0x3a   : > { %914 = vmatpush.bf16.msrb.mxu0 %v3043_v5  ;;  %v4523_v5 = vld [vmem:[%s4236_s22 + $0x60] sm:$0xff]  ;;  %v3203_v62 = vor.u32 %v3935_v58, %v3200_v59  ;;  %v3946_v23 = vld [vmem:[%s5778_s1 + $0x204] sm:$0xf0]  ;;  %v3932_v31 = vld [vmem:[%s5778_s1 + $0x194] sm:$0xf0]  ;;  %v364_v52 = vrot.slane %v4520_v4, 7 }
  0x3b   : > { %947 = vmatpush.bf16.msrb.mxu2 %v3075_v33  ;;  %v445_v7 = vpack.c.bf16 %v4523_v5, %v4520_v4  ;;  %v3238_v22 = vld [vmem:[%s5778_s1 + $0x200] sm:$0xf]  ;;  %v3931_v47 = vld [vmem:[%s5778_s1 + $0x194] sm:$0xf]  ;;  %v3184_v48 = vld [vmem:[%s5778_s1 + $0x198] sm:$0xf0] }
  0x3c   : > { %860 = vmatpush.bf16.msrb.mxu1 %v3007_v29  ;;  %1168 = vmatpush.bf16.msra.mxu3 %v3255_v25  ;;  %v3239_v25 = vor.u32 %v3946_v23, %v3238_v22  ;;  %v366_v54 = vrot.slane %v4523_v5, 7  ;;  %v3929_v58 = vld [vmem:[%s5778_s1 + $0x184] sm:$0xf]  ;;  %v3176_v59 = vld [vmem:[%s5778_s1 + $0x188] sm:$0xf0] }
  0x3d   : > { %618 = vmatmul.bf16.gmra.mxu0 %v441_v24  ;;  %v3400_v23 = vld [vmem:[%s5778_s1 + $0x2b8] sm:$0xf0]  ;;  %v3965_v11 = vld [vmem:[%s5778_s1 + $0x2a4] sm:$0xf]  ;;  %v3986_v57 = vld [vmem:[%s5781_s4 + $0x48] sm:$0xff] }
  0x3e   : > { %915 = vmatpush.bf16.msrb.mxu0 %v3035_v20  ;;  %2998 = vmatmul.msk.bf16.gmra.mxu1 %vm592_vm0, %v444_v27  ;;  %v3259_v20 = vor.u32 %v3949_v12, %v3256_v14  ;;  %v360_v12 = vrot.slane %v4467_v40, 7  ;;  %v362_v14 = vrot.slane %v4470_v41, 7 }
  0x3f   : > { %3002 = vmatmul.msk.bf16.gmra.mxu3 %vm592_vm0, %v444_v27  ;;  %1225 = vmatpush.bf16.msra.mxu2 %v3267_v49  ;;  %v3216_v27 = vld [vmem:[%s5778_s1 + $0x1d8] sm:$0xf0]  ;;  %v3206_v49 = vld [vmem:[%s5778_s1 + $0x1c0] sm:$0xf] }
  0x40   : > { %676 = vmatmul.bf16.gmra.mxu2 %v441_v24  ;;  %1134 = vmatpush.bf16.msra.mxu1 %v3231_v60  ;;  %v3223_v24 = vor.u32 %v3942_v21, %v3222_v15  ;;  %v3219_v29 = vor.u32 %v3939_v26, %v3216_v27  ;;  %v3198_v60 = vld [vmem:[%s5778_s1 + $0x1b0] sm:$0xf]  ;;  %v3933_v27 = vld [vmem:[%s5778_s1 + $0x1a4] sm:$0xf] }
  0x41   : > { %1169 = vmatpush.bf16.msra.mxu3 %v3247_v56 }
  0x42   : > { %916 = vmatpush.bf16.msrb.mxu0 %v3027_v28  ;;  %v3214_v28 = vld [vmem:[%s5778_s1 + $0x1d0] sm:$0xf] }
  0x43   : > { %1226 = vmatpush.bf16.msra.mxu2 %v3259_v20  ;;  %v3215_v33 = vor.u32 %v3940_v30, %v3214_v28  ;;  %v4643_v20 = vsel %vm386_vm1, 0.0, %v361_v53  ;;  %v3192_v28 = vld [vmem:[%s5778_s1 + $0x1a8] sm:$0xf0]  ;;  %v3432_v53 = vld [vmem:[%s5778_s1 + $0x2f8] sm:$0xf0] }
  0x44   : > { %1135 = vmatpush.bf16.msra.mxu1 %v3223_v24  ;;  %v3113_v24 = vpack.c.bf16 %v362_v14, %v360_v12  ;;  %v3195_v30 = vor.u32 %v3933_v27, %v3192_v28  ;;  %v3968_v27 = vld [vmem:[%s5778_s1 + $0x2b4] sm:$0xf0] }
  0x45   : > { %1170 = vmatpush.bf16.msra.mxu3 %v3239_v25 }
  0x46   : > { %917 = vmatpush.bf16.msrb.mxu0 %v3019_v38  ;;  %v356_v38 = vrot.slane %v4295_v13, 7  ;;  %v3392_v13 = vld [vmem:[%s5778_s1 + $0x2a8] sm:$0xf0] }
  0x47   : > { %1227 = vmatpush.bf16.msra.mxu2 %v3251_v50  ;;  %v367_v50 = vrot.slane %v4476_v43, 7 }
  0x48   : > { %1136 = vmatpush.bf16.msra.mxu1 %v3215_v33  ;;  %v3945_v33 = vld [vmem:[%s5778_s1 + $0x204] sm:$0xf]  ;;  %v3271_v25 = vpack.c.bf16 %v356_v38, %v354_v3  ;;  %v3395_v3 = vor.u32 %v3965_v11, %v3392_v13  ;;  %v3959_v11 = vld [vmem:[%s5778_s1 + $0x274] sm:$0xf] }
  0x49   : > { %v4704_v56 = vsel %vm386_vm1, 0.0, %v367_v50 }
  0x4a   : > { %918 = vmatpush.bf16.msrb.mxu0 %v3011_v39  ;;  %v358_v39 = vrot.slane %v4422_v16, 7 }
  0x4c   : > { %v3108_v61 = vpack.c.bf16 %v358_v39, %v356_v38  ;;  %v3424_v38 = vld [vmem:[%s5778_s1 + $0x2e8] sm:$0xf0] }
  0x4d   : > { %623 = vmatmul.bf16.gmra.mxu0 %v443_v44 }
  0x4e   : > { %2999 = vmatmul.msk.bf16.gmra.mxu1 %vm592_vm0, %v446_v45  ;;  %1192 = vmatpush.bf16.msra.mxu0 %v3235_v55  ;;  %v3207_v55 = vor.u32 %v3938_v51, %v3206_v49  ;;  %v365_v49 = vrot.slane %v4473_v42, 7  ;;  %v3187_v51 = vor.u32 %v3931_v47, %v3184_v48  ;;  %v3384_v48 = vld [vmem:[%s5778_s1 + $0x298] sm:$0xf0] }
  0x4f   : > { %3003 = vmatmul.msk.bf16.gmra.mxu3 %vm592_vm0, %v446_v45  ;;  %v4588_v45 = vsel %vm386_vm1, 0.0, %v359_v36  ;;  %v3174_v36 = vld [vmem:[%s5778_s1 + $0x180] sm:$0xf] }
  0x50   : > { %681 = vmatmul.bf16.gmra.mxu2 %v443_v44  ;;  %v4585_v44 = vsel %vm386_vm1, 0.0, %v357_v35  ;;  %1137 = vmatpush.bf16.msra.mxu1 %v3207_v55  ;;  %v3240_v35 = vld [vmem:[%s5778_s1 + $0x208] sm:$0xf0]  ;;  %v4701_v55 = vsel %vm386_vm1, 0.0, %v365_v49 }
  0x51   : > { %v410_v46 = vpack.c.bf16 %v4588_v45, %v4585_v44  ;;  %v970_v28 = vpack.c.bf16 %v4585_v44, %v4527_v6  ;;  %v3973_v6 = vld [vmem:[%s5778_s1 + $0x2e4] sm:$0xf] }
  0x52   : > { %1193 = vmatpush.bf16.msra.mxu0 %v3227_v0  ;;  %v3936_v0 = vld [vmem:[%s5778_s1 + $0x1b4] sm:$0xf0]  ;;  %v3427_v44 = vor.u32 %v3973_v6, %v3424_v38  ;;  %v3366_v6 = vld [vmem:[%s5778_s1 + $0x270] sm:$0xf] }
  0x53   : > { %v3199_v1 = vor.u32 %v3936_v0, %v3198_v60  ;;  %v3118_v60 = vpack.c.bf16 %v366_v54, %v364_v52  ;;  %v414_v0 = vpack.c.bf16 %v4704_v56, %v4701_v55  ;;  %v3960_v38 = vld [vmem:[%s5778_s1 + $0x274] sm:$0xf0] }
  0x55   : > { %1138 = vmatpush.bf16.msra.mxu1 %v3199_v1  ;;  %v3975_v1 = vld [vmem:[%s5778_s1 + $0x2f4] sm:$0xf] }
  0x56   : > { %1194 = vmatpush.bf16.msra.mxu0 %v3219_v29  ;;  %v3182_v29 = vld [vmem:[%s5778_s1 + $0x190] sm:$0xf] }
  0x57   : > { %v3183_v32 = vor.u32 %v3932_v31, %v3182_v29 }
  0x5a   : > { %1195 = vmatpush.bf16.msra.mxu0 %v3211_v37  ;;  %v3243_v37 = vor.u32 %v3945_v33, %v3240_v35  ;;  %v3966_v33 = vld [vmem:[%s5778_s1 + $0x2a4] sm:$0xf0] }
  0x5c   : > { %1228 = vmatpush.bf16.msra.mxu2 %v3243_v37  ;;  %v3422_v37 = vld [vmem:[%s5778_s1 + $0x2e0] sm:$0xf] }
  0x5d   : > { %628 = vmatmul.bf16.gmra.mxu0 %v445_v7 }
  0x5e   : > { %3104 = vmatmul.msk.bf16.vlgmr.msrb.gmra.mxu1 %vm4536_vm3, %v3103_v8  ;;  %1196 = vmatpush.bf16.msra.mxu0 %v3203_v62  ;;  %v3179_v62 = vor.u32 %v3929_v58, %v3176_v59  ;;  %v4794_v58 = vpack.c.bf16 %v360_v12, %v358_v39  ;;  %v3382_v59 = vld [vmem:[%s5778_s1 + $0x290] sm:$0xf]  ;;  %v3961_v39 = vld [vmem:[%s5778_s1 + $0x284] sm:$0xf]  ;;  %v3376_v12 = vld [vmem:[%s5778_s1 + $0x288] sm:$0xf0] }
  0x5f   : > { %3120 = vmatmul.msk.bf16.vlgmr.msrb.gmra.mxu3 %vm592_vm0, %v408_v10 }
  0x60   : > { %686 = vmatmul.bf16.gmra.mxu2 %v445_v7  ;;  %v363_v7 = vrot.slane %v4428_v19, 7 }
  0x62   : > { %v4646_v21 = vsel %vm386_vm1, 0.0, %v363_v7  ;;  %1197 = vmatpush.bf16.msra.mxu0 %v3195_v30  ;;  %v3435_v7 = vor.u32 %v3975_v1, %v3432_v53  ;;  %v972_v1 = vpack.c.bf16 %v4643_v20, %v4588_v45  ;;  %v3971_v45 = vld [vmem:[%s5778_s1 + $0x2d4] sm:$0xf] }
  0x63   : > { %v412_v26 = vpack.c.bf16 %v4646_v21, %v4643_v20  ;;  %v3416_v20 = vld [vmem:[%s5778_s1 + $0x2d8] sm:$0xf0] }
  0x66   : > { %1198 = vmatpush.bf16.msra.mxu0 %v3187_v51 }
  0x6a   : > { %1199 = vmatpush.bf16.msra.mxu0 %v3179_v62 }
  0x6d   : > { %3128 = vmatmul.msk.bf16.vlgmr.msrb.gmra.mxu0 %vm4536_vm3, %v3103_v8  ;;  %v3190_v8 = vld [vmem:[%s5778_s1 + $0x1a0] sm:$0xf] }
  0x6e   : > { %3109 = vmatmul.msk.bf16.gmra.mxu1 %vm4536_vm3, %v3108_v61 }
  0x6f   : > { %3121 = vmatmul.msk.bf16.gmra.mxu3 %vm592_vm0, %v410_v46 }
  0x70   : > { %3144 = vmatmul.msk.bf16.vlgmr.msrb.gmra.mxu2 %vm592_vm0, %v408_v10  ;;  %v3934_v10 = vld [vmem:[%s5778_s1 + $0x1a4] sm:$0xf0] }
  0x71   : > { %v3191_v15 = vor.u32 %v3934_v10, %v3190_v8  ;;  %1522 = vmatpush.bf16.msrb.mxu2 %v3435_v7  ;;  %v3430_v8 = vld [vmem:[%s5778_s1 + $0x2f0] sm:$0xf]  ;;  %v3976_v10 = vld [vmem:[%s5778_s1 + $0x2f4] sm:$0xf0]  ;;  %v3379_v7 = vor.u32 %v3961_v39, %v3376_v12  ;;  %v3408_v12 = vld [vmem:[%s5778_s1 + $0x2c8] sm:$0xf0] }
  0x72   : > { %v3431_v22 = vor.u32 %v3976_v10, %v3430_v8  ;;  %v3374_v8 = vld [vmem:[%s5778_s1 + $0x280] sm:$0xf]  ;;  %v3419_v10 = vor.u32 %v3971_v45, %v3416_v20  ;;  %v3956_v39 = vld [vmem:[%s5778_s1 + $0x254] sm:$0xf0] }
  0x73   : > { %1139 = vmatpush.bf16.msra.mxu1 %v3191_v15  ;;  %v3967_v15 = vld [vmem:[%s5778_s1 + $0x2b4] sm:$0xf]  ;;  %v4907_v20 = vld [vmem:[%s4236_s22 + $0x78] sm:$0xff] }
  0x74   : > { %1464 = vmatpush.bf16.msrb.mxu3 %v3431_v22 }
  0x75   : > { %1523 = vmatpush.bf16.msrb.mxu2 %v3427_v44 }
  0x77   : > { %1140 = vmatpush.bf16.msra.mxu1 %v3183_v32  ;;  %v3390_v32 = vld [vmem:[%s5778_s1 + $0x2a0] sm:$0xf] }
  0x79   : > { %1524 = vmatpush.bf16.msrb.mxu2 %v3419_v10 }
  0x7d   : > { %3133 = vmatmul.msk.bf16.gmra.mxu0 %vm4536_vm3, %v3108_v61  ;;  %v3930_v61 = vld [vmem:[%s5778_s1 + $0x184] sm:$0xf0] }
  0x7e   : > { %3114 = vmatmul.msk.bf16.gmra.mxu1 %vm4536_vm3, %v3113_v24 }
  0x7f   : > { %3122 = vmatmul.msk.bf16.gmra.mxu3 %vm592_vm0, %v412_v26 }
  0x80   : > { %3145 = vmatmul.msk.bf16.gmra.mxu2 %vm592_vm0, %v410_v46  ;;  %v3175_v46 = vor.u32 %v3930_v61, %v3174_v36  ;;  %v3391_v36 = vor.u32 %v3966_v33, %v3390_v32  ;;  %v3974_v61 = vld [vmem:[%s5778_s1 + $0x2e4] sm:$0xf0]  ;;  %v3358_v32 = vld [vmem:[%s5778_s1 + $0x260] sm:$0xf] }
  0x81   : > { %v3423_v47 = vor.u32 %v3974_v61, %v3422_v37  ;;  %v3958_v33 = vld [vmem:[%s5778_s1 + $0x264] sm:$0xf0]  ;;  %v3406_v37 = vld [vmem:[%s5778_s1 + $0x2c0] sm:$0xf] }
  0x82   : > { %1141 = vmatpush.bf16.msra.mxu1 %v3175_v46  ;;  %v3963_v46 = vld [vmem:[%s5778_s1 + $0x294] sm:$0xf]  ;;  %v3970_v61 = vld [vmem:[%s5778_s1 + $0x2c4] sm:$0xf0] }
  0x83   : > { %v3387_v49 = vor.u32 %v3963_v46, %v3384_v48  ;;  %1465 = vmatpush.bf16.msrb.mxu3 %v3423_v47 }
  0x8d   : > { %3138 = vmatmul.msk.bf16.gmra.mxu0 %vm4536_vm3, %v3113_v24  ;;  %v3403_v24 = vor.u32 %v3967_v15, %v3400_v23  ;;  %v3962_v15 = vld [vmem:[%s5778_s1 + $0x284] sm:$0xf0] }
  0x8e   : > { %3119 = vmatmul.msk.bf16.gmra.mxu1 %vm4536_vm3, %v3118_v60  ;;  %v3375_v23 = vor.u32 %v3962_v15, %v3374_v8 }
  0x8f   : > { %3123 = vmatmul.msk.bf16.gmra.mxu3 %vm592_vm0, %v414_v0  ;;  %1489 = vmatpush.bf16.msrb.mxu0 %v3403_v24 }
  0x90   : > { %3146 = vmatmul.msk.bf16.gmra.mxu2 %vm592_vm0, %v412_v26  ;;  %v3398_v26 = vld [vmem:[%s5778_s1 + $0x2b0] sm:$0xf] }
  0x91   : > { %v3399_v30 = vor.u32 %v3968_v27, %v3398_v26 }
  0x93   : > { %1431 = vmatpush.bf16.msrb.mxu1 %v3399_v30  ;;  %1490 = vmatpush.bf16.msrb.mxu0 %v3395_v3  ;;  %v3972_v30 = vld [vmem:[%s5778_s1 + $0x2d4] sm:$0xf0]  ;;  %v3368_v3 = vld [vmem:[%s5778_s1 + $0x278] sm:$0xf0] }
  0x94   : > { %v3371_v44 = vor.u32 %v3959_v11, %v3368_v3  ;;  %v3955_v11 = vld [vmem:[%s5778_s1 + $0x254] sm:$0xf] }
  0x97   : > { %1432 = vmatpush.bf16.msrb.mxu1 %v3391_v36  ;;  %1491 = vmatpush.bf16.msrb.mxu0 %v3387_v49  ;;  %v3281_v49 = vpack.c.bf16 %v364_v52, %v362_v14  ;;  %v3957_v14 = vld [vmem:[%s5778_s1 + $0x264] sm:$0xf]  ;;  %v3360_v52 = vld [vmem:[%s5778_s1 + $0x268] sm:$0xf0] }
  0x9b   : > { %v643_v29 = vpop.f32.mrf.mxu1  ;;  %1492 = vmatpush.bf16.msrb.mxu0 %v3379_v7  ;;  %v3954_v7 = vld [vmem:[%s5778_s1 + $0x244] sm:$0xf0] }
  0x9d   : > { %3143 = vmatmul.msk.bf16.gmra.mxu0 %vm4536_vm3, %v3118_v60  ;;  %v3964_v60 = vld [vmem:[%s5778_s1 + $0x294] sm:$0xf0] }
  0x9e   : > { %3272 = vmatmul.msk.bf16.vlgmr.msra.gmra.mxu1 %vm4536_vm3, %v3271_v25  ;;  %v3383_v53 = vor.u32 %v3964_v60, %v3382_v59 }
  0x9f   : > { %3288 = vmatmul.msk.bf16.vlgmr.msra.gmra.mxu3 %vm592_vm0, %v970_v28  ;;  %1493 = vmatpush.bf16.msrb.mxu0 %v3371_v44  ;;  %v3344_v44 = vld [vmem:[%s5778_s1 + $0x248] sm:$0xf0] }
  0xa0   : > { %3147 = vmatmul.msk.bf16.gmra.mxu2 %vm592_vm0, %v414_v0  ;;  %1433 = vmatpush.bf16.msrb.mxu1 %v3383_v53  ;;  %v974_v53 = vpack.c.bf16 %v4701_v55, %v4646_v21  ;;  %v3363_v55 = vor.u32 %v3957_v14, %v3360_v52 }
  0xa2   : > { %v701_v31 = vpop.f32.mrf.mxu3 }
  0xa3   : > { %v645_v35 = vpop.f32.mrf.mxu1  ;;  %1494 = vmatpush.bf16.msrb.mxu0 %v3363_v55 }
  0xa4   : > { %1434 = vmatpush.bf16.msrb.mxu1 %v3375_v23 }
  0xaa   : > { %v703_v50 = vpop.f32.mrf.mxu3  ;;  %v614_v51 = vpop.f32.mrf.mxu0 }
  0xab   : > { %v4802_v62 = vadd.f32 %v643_v29, %v614_v51  ;;  %v648_v0 = vpop.f32.mrf.mxu1  ;;  %v3414_v29 = vld [vmem:[%s5778_s1 + $0x2d0] sm:$0xf]  ;;  %v3407_v51 = vor.u32 %v3970_v61, %v3406_v37 }
  0xac   : > { %v3415_v13 = vor.u32 %v3972_v30, %v3414_v29  ;;  %v4914_v29 = vld [vmem:[%s4236_s22 + $0x70] sm:$0xff]  ;;  %v369_v30 = vrot.slane %v4907_v20, 7  ;;  %s4063_s22 = smov 32  }
  0xad   : > { %3296 = vmatmul.msk.bf16.vlgmr.msra.gmra.mxu0 %vm4536_vm3, %v3271_v25  ;;  %v368_v3 = vrot.slane %v4914_v29, 7 }
  0xae   : > { %3277 = vmatmul.msk.bf16.gmra.mxu1 %vm4536_vm3, %v4794_v58  ;;  %1466 = vmatpush.bf16.msrb.mxu3 %v3415_v13 }
  0xaf   : > { %3289 = vmatmul.msk.bf16.gmra.mxu3 %vm592_vm0, %v972_v1 }
  0xb0   : > { %3312 = vmatmul.msk.bf16.vlgmr.msra.gmra.mxu2 %vm592_vm0, %v970_v28 }
  0xb2   : > { %v706_v25 = vpop.f32.mrf.mxu3  ;;  %v616_v26 = vpop.f32.mrf.mxu0  ;;  %1467 = vmatpush.bf16.msrb.mxu3 %v3407_v51 }
  0xb3   : > { %v672_v22 = vpop.f32.mrf.mxu2  ;;  %v4833_v27 = vadd.f32 %v645_v35, %v616_v26  ;;  %v650_v28 = vpop.f32.mrf.mxu1  ;;  %v3359_v35 = vor.u32 %v3958_v33, %v3358_v32 }
  0xb4   : > { %v4831_v24 = vadd.f32 %v701_v31, %v672_v22  ;;  %v3367_v31 = vor.u32 %v3960_v38, %v3366_v6  ;;  %v3953_v38 = vld [vmem:[%s5778_s1 + $0x244] sm:$0xf] }
  0xb6   : > { %1435 = vmatpush.bf16.msrb.mxu1 %v3367_v31 }
  0xba   : > { %v708_v47 = vpop.f32.mrf.mxu3  ;;  %v619_v48 = vpop.f32.mrf.mxu0  ;;  %1436 = vmatpush.bf16.msrb.mxu1 %v3359_v35  ;;  %v3286_v35 = vpack.c.bf16 %v368_v3, %v366_v54 }
  0xbb   : > { %v674_v36 = vpop.f32.mrf.mxu2  ;;  %v4871_v59 = vadd.f32 %v648_v0, %v619_v48  ;;  %v653_v60 = vpop.f32.mrf.mxu1  ;;  %v3969_v0 = vld [vmem:[%s5778_s1 + $0x2c4] sm:$0xf] }
  0xbc   : > { %v4865_v46 = vadd.f32 %v703_v50, %v674_v36  ;;  %v3350_v50 = vld [vmem:[%s5778_s1 + $0x250] sm:$0xf]  ;;  %v3347_v36 = vor.u32 %v3953_v38, %v3344_v44 }
  0xbd   : > { %v3351_v21 = vor.u32 %v3956_v39, %v3350_v50  ;;  %3301 = vmatmul.msk.bf16.gmra.mxu0 %vm4536_vm3, %v4794_v58  ;;  %v3342_v58 = vld [vmem:[%s5778_s1 + $0x240] sm:$0xf] }
  0xbe   : > { %3282 = vmatmul.msk.bf16.gmra.mxu1 %vm4536_vm3, %v3281_v49  ;;  %v3343_v8 = vor.u32 %v3954_v7, %v3342_v58 }
  0xbf   : > { %3290 = vmatmul.msk.bf16.gmra.mxu3 %vm592_vm0, %v974_v53  ;;  %1437 = vmatpush.bf16.msrb.mxu1 %v3351_v21 }
  0xc0   : > { %3313 = vmatmul.msk.bf16.gmra.mxu2 %vm592_vm0, %v972_v1  ;;  %v3411_v1 = vor.u32 %v3969_v0, %v3408_v12 }
  0xc2   : > { %v711_v15 = vpop.f32.mrf.mxu3  ;;  %v621_v22 = vpop.f32.mrf.mxu0  ;;  %1525 = vmatpush.bf16.msrb.mxu2 %v3411_v1 }
  0xc3   : > { %v677_v45 = vpop.f32.mrf.mxu2  ;;  %v4911_v23 = vadd.f32 %v650_v28, %v621_v22  ;;  %v655_v26 = vpop.f32.mrf.mxu1  ;;  %1438 = vmatpush.bf16.msrb.mxu1 %v3343_v8  ;;  %v402_v28 = vsel %vm386_vm1, 0.0, %v369_v30  ;;  %v1268_v30 = vpack.c.bf16 %v4467_v40, %v4422_v16 }
  0xc4   : > { %v4909_v10 = vadd.f32 %v706_v25, %v677_v45  ;;  %v3352_v25 = vld [vmem:[%s5778_s1 + $0x258] sm:$0xf0]  ;;  %v976_v48 = vpack.c.bf16 %v402_v28, %v4704_v56 }
  0xc5   : > { %v3355_v13 = vor.u32 %v3955_v11, %v3352_v25 }
  0xc7   : > { %1495 = vmatpush.bf16.msrb.mxu0 %v3355_v13  ;;  %v1269_v13 = vpack.c.bf16 %v4425_v17, %v4341_v34 }
  0xca   : > { %v713_v32 = vpop.f32.mrf.mxu3  ;;  %v624_v33 = vpop.f32.mrf.mxu0 }
  0xcb   : > { %v679_v6 = vpop.f32.mrf.mxu2  ;;  %v654_v37 = vadd.f32 %v653_v60, %v624_v33  ;;  %v658_v61 = vpop.f32.mrf.mxu1  ;;  %1496 = vmatpush.bf16.msrb.mxu0 %v3347_v36 }
  0xcc   : > { %v4931_v31 = vadd.f32 %v708_v47, %v679_v6 }
  0xcd   : > { %3306 = vmatmul.msk.bf16.gmra.mxu0 %vm4536_vm3, %v3281_v49 }
  0xce   : > { %3287 = vmatmul.msk.bf16.gmra.mxu1 %vm4536_vm3, %v3286_v35 }
  0xcf   : > { %3291 = vmatmul.msk.bf16.gmra.mxu3 %vm592_vm0, %v976_v48 }
  0xd0   : > { %3314 = vmatmul.msk.bf16.gmra.mxu2 %vm592_vm0, %v974_v53 }
  0xd2   : > { %v716_v54 = vpop.f32.mrf.mxu3  ;;  %v626_v50 = vpop.f32.mrf.mxu0 }
  0xd3   : > { %v682_v47 = vpop.f32.mrf.mxu2  ;;  %v4944_v60 = vadd.f32 %v655_v26, %v626_v50  ;;  %v660_v39 = vpop.f32.mrf.mxu1  ;;  %v1273_v50 = vpack.c.bf16 %v4907_v20, %v4476_v43 }
  0xd4   : > { %v4942_v51 = vadd.f32 %v711_v15, %v682_v47 }
  0xda   : > { %v718_v52 = vpop.f32.mrf.mxu3  ;;  %v629_v49 = vpop.f32.mrf.mxu0 }
  0xdb   : > { %v684_v56 = vpop.f32.mrf.mxu2  ;;  %v659_v21 = vadd.f32 %v658_v61, %v629_v49  ;;  %v862_v53 = vpop.f32.mrf.mxu1 }
  0xdc   : > { %v4946_v14 = vadd.f32 %v713_v32, %v684_v56  ;;  %v863_v55 = vadd.f32 %v862_v53, %v4802_v62  ;;  %v1271_v32 = vpack.c.bf16 %v4473_v42, %v4428_v19 }
  0xdd   : > { %3311 = vmatmul.msk.bf16.gmra.mxu0 %vm4536_vm3, %v3286_v35 }
  0xde   : > { %1439 = vmatmul.bf16.vlgmr.msrb.gmra.mxu1 %v4308_v18 }
  0xdf   : > { %3436 = vmatmul.msk.bf16.vlgmr.msrb.gmra.mxu3 %vm592_vm0, %v4261_v63 }
  0xe0   : > { %3315 = vmatmul.msk.bf16.gmra.mxu2 %vm592_vm0, %v976_v48 }
  0xe2   : > { %v891_v58 = vpop.f32.mrf.mxu3  ;;  %v631_v1 = vpop.f32.mrf.mxu0 }
  0xe3   : > { %v687_v0 = vpop.f32.mrf.mxu2  ;;  %v4957_v7 = vadd.f32 %v891_v58, %v863_v55  ;;  %v4959_v45 = vadd.f32 %v660_v39, %v631_v1  ;;  %v4961_v62 = vpop.f32.mrf.mxu1  ;;  %v3992_v58 = vld [vmem:[%s5781_s4 + $0x78] sm:$0xff] }
  0xe4   : > { %v4955_v12 = vadd.f32 %v716_v54, %v687_v0  ;;  %v4008_v0 = vld [vmem:[%s5781_s4 + $0xf8] sm:$0xff]  ;;  %2047 = vmatpush.bf16.msra.mxu2 %v3992_v58  ;;  %v3981_v58 = vld [vmem:[%s5781_s4 + $0x20] sm:$0xff] }
  0xe5   : > { %5790 = vst [vmem:[#allocation2_spill] sm:$0xff] %v4959_v45  ;;  %1893 = vmatpush.bf16.msra.mxu3 %v4008_v0 }
  0xea   : > { %v4965_v22 = vpop.f32.mrf.mxu3  ;;  %v920_v26 = vpop.f32.mrf.mxu0 }
  0xeb   : > { %v689_v8 = vpop.f32.mrf.mxu2  ;;  %v867_v11 = vpop.f32.mrf.mxu1  ;;  %v921_v25 = vadd.f32 %v920_v26, %v4831_v24 }
  0xec   : > { %v4963_v15 = vadd.f32 %v718_v52, %v689_v8  ;;  %v868_v3 = vadd.f32 %v867_v11, %v4871_v59  ;;  %v4000_v11 = vld [vmem:[%s5781_s4 + $0xb8] sm:$0xff] }
  0xed   : > { %1497 = vmatmul.bf16.vlgmr.msrb.gmra.mxu0 %v4308_v18  ;;  %1864 = vmatpush.bf16.msra.mxu1 %v4000_v11  ;;  %v3996_v11 = vld [vmem:[%s5781_s4 + $0x98] sm:$0xff] }
  0xee   : > { %5791 = vst [vmem:[#allocation3_spill] sm:$0xff] %v4963_v15  ;;  %1444 = vmatmul.bf16.gmra.mxu1 %v1268_v30 }
  0xef   : > { %3437 = vmatmul.msk.bf16.gmra.mxu3 %vm592_vm0, %v1269_v13 }
  0xf0   : > { %3440 = vmatmul.msk.bf16.vlgmr.msrb.gmra.mxu2 %vm592_vm0, %v4261_v63  ;;  %v1270_v63 = vpack.c.bf16 %v4520_v4, %v4470_v41 }
  0xf2   : > { %v896_v6 = vpop.f32.mrf.mxu3  ;;  %v4979_v16 = vpop.f32.mrf.mxu0 }
  0xf3   : > { %v949_v28 = vpop.f32.mrf.mxu2  ;;  %v4981_v40 = vadd.f32 %v896_v6, %v868_v3  ;;  %v4983_v24 = vpop.f32.mrf.mxu1  ;;  %v3991_v3 = vld [vmem:[%s5781_s4 + $0x70] sm:$0xff] }
  0xf4   : > { %v4977_v38 = vadd.f32 %v949_v28, %v921_v25  ;;  %v4007_v25 = vld [vmem:[%s5781_s4 + $0xf0] sm:$0xff]  ;;  %2048 = vmatpush.bf16.msra.mxu2 %v3991_v3 }
  0xf5   : > { %1894 = vmatpush.bf16.msra.mxu3 %v4007_v25  ;;  %v3988_v25 = vld [vmem:[%s5781_s4 + $0x58] sm:$0xff] }
  0xfa   : > { %v4987_v17 = vpop.f32.mrf.mxu3  ;;  %v925_v18 = vpop.f32.mrf.mxu0 }
  0xfb   : > { %v4985_v34 = vpop.f32.mrf.mxu2  ;;  %v872_v59 = vpop.f32.mrf.mxu1  ;;  %v926_v44 = vadd.f32 %v925_v18, %v4909_v10 }
  0xfc   : > { %v873_v33 = vadd.f32 %v872_v59, %v654_v37  ;;  %v1272_v37 = vpack.c.bf16 %v4914_v29, %v4523_v5  ;;  %v3999_v59 = vld [vmem:[%s5781_s4 + $0xb0] sm:$0xff] }
  0xfd   : > { %1502 = vmatmul.bf16.gmra.mxu0 %v1268_v30  ;;  %1865 = vmatpush.bf16.msra.mxu1 %v3999_v59 }
  0xfe   : > { %1449 = vmatmul.bf16.gmra.mxu1 %v1270_v63 }
  0xff   : > { %3438 = vmatmul.msk.bf16.gmra.mxu3 %vm592_vm0, %v1271_v32 }
 0x100   : > { %3441 = vmatmul.msk.bf16.gmra.mxu2 %vm592_vm0, %v1269_v13  ;;  %v3984_v13 = vld [vmem:[%s5781_s4 + $0x38] sm:$0xff] }
 0x101   : > { %2018 = vmatpush.bf16.msra.mxu0 %v3984_v13  ;;  %v3980_v13 = vld [vmem:[%s5781_s4 + $0x18] sm:$0xff] }
 0x102   : > { %v901_v36 = vpop.f32.mrf.mxu3  ;;  %v4998_v48 = vpop.f32.mrf.mxu0 }
 0x103   : > { %v954_v35 = vpop.f32.mrf.mxu2  ;;  %v5000_v41 = vadd.f32 %v901_v36, %v873_v33  ;;  %v5002_v4 = vpop.f32.mrf.mxu1  ;;  %v3990_v33 = vld [vmem:[%s5781_s4 + $0x68] sm:$0xff] }
 0x104   : > { %v4996_v61 = vadd.f32 %v954_v35, %v926_v44  ;;  %v4006_v44 = vld [vmem:[%s5781_s4 + $0xe8] sm:$0xff]  ;;  %2049 = vmatpush.bf16.msra.mxu2 %v3990_v33 }
 0x105   : > { %1895 = vmatpush.bf16.msra.mxu3 %v4006_v44 }
 0x10a   : > { %v5006_v19 = vpop.f32.mrf.mxu3  ;;  %v930_v42 = vpop.f32.mrf.mxu0 }
 0x10b   : > { %v5004_v10 = vpop.f32.mrf.mxu2  ;;  %v877_v47 = vpop.f32.mrf.mxu1  ;;  %v931_v54 = vadd.f32 %v930_v42, %v4942_v51 }
 0x10c   : > { %v878_v39 = vadd.f32 %v877_v47, %v659_v21  ;;  %v3998_v47 = vld [vmem:[%s5781_s4 + $0xa8] sm:$0xff] }
 0x10d   : > { %1507 = vmatmul.bf16.gmra.mxu0 %v1270_v63  ;;  %1866 = vmatpush.bf16.msra.mxu1 %v3998_v47  ;;  %v3979_v47 = vld [vmem:[%s5781_s4 + $0x10] sm:$0xff] }
 0x10e   : > { %1454 = vmatmul.bf16.gmra.mxu1 %v1272_v37 }
 0x10f   : > { %3439 = vmatmul.msk.bf16.gmra.mxu3 %vm592_vm0, %v1273_v50 }
 0x110   : > { %3442 = vmatmul.msk.bf16.gmra.mxu2 %vm592_vm0, %v1271_v32  ;;  %v3983_v32 = vld [vmem:[%s5781_s4 + $0x30] sm:$0xff] }
 0x111   : > { %2019 = vmatpush.bf16.msra.mxu0 %v3983_v32  ;;  %v3995_v32 = vld [vmem:[%s5781_s4 + $0x90] sm:$0xff] }
 0x112   : > { %v906_v52 = vpop.f32.mrf.mxu3  ;;  %v5017_v53 = vpop.f32.mrf.mxu0 }
 0x113   : > { %v959_v56 = vpop.f32.mrf.mxu2  ;;  %5792 = vst [vmem:[#allocation4_spill] sm:$0xff] %v5017_v53  ;;  %v5019_v5 = vadd.f32 %v906_v52, %v878_v39  ;;  %v5021_v29 = vpop.f32.mrf.mxu1  ;;  %v3989_v39 = vld [vmem:[%s5781_s4 + $0x60] sm:$0xff] }
 0x114   : > { %v5015_v49 = vadd.f32 %v959_v56, %v931_v54  ;;  %5793 = vst [vmem:[#allocation5_spill] sm:$0xff] %v5021_v29  ;;  %v4005_v54 = vld [vmem:[%s5781_s4 + $0xe0] sm:$0xff]  ;;  %2050 = vmatpush.bf16.msra.mxu2 %v3989_v39 }
 0x115   : > { %1896 = vmatpush.bf16.msra.mxu3 %v4005_v54  ;;  %v3994_v54 = vld [vmem:[%s5781_s4 + $0x88] sm:$0xff] }
 0x118   : > { %2051 = vmatpush.bf16.msra.mxu2 %v3988_v25  ;;  %v3977_v25 = vld [vmem:[%s5781_s4] sm:$0xff] }
 0x11a   : > { %v5025_v43 = vpop.f32.mrf.mxu3  ;;  %v935_v20 = vpop.f32.mrf.mxu0 }
 0x11b   : > { %v5023_v51 = vpop.f32.mrf.mxu2  ;;  %5795 = vst [vmem:[#allocation7_spill] sm:$0xff] %v5025_v43  ;;  %v936_v21 = vadd.f32 %v935_v20, %v4955_v12  ;;  %v5028_v55 = vpop.f32.mrf.mxu1 }
 0x11c   : > { %5794 = vst [vmem:[#allocation6_spill] sm:$0xff] %v5023_v51 }
 0x11d   : > { %1512 = vmatmul.bf16.gmra.mxu0 %v1272_v37 }
 0x120   : > { %3443 = vmatmul.msk.bf16.gmra.mxu2 %vm592_vm0, %v1273_v50  ;;  %v3982_v50 = vld [vmem:[%s5781_s4 + $0x28] sm:$0xff] }
 0x121   : > { %2020 = vmatpush.bf16.msra.mxu0 %v3982_v50  ;;  %v3978_v50 = vld [vmem:[%s5781_s4 + $0x8] sm:$0xff] }
 0x122   : > { %v5039_v26 = vpop.f32.mrf.mxu3  ;;  %v5041_v12 = vpop.f32.mrf.mxu0 }
 0x123   : > { %v964_v1 = vpop.f32.mrf.mxu2  ;;  %5797 = vst [vmem:[#allocation9_spill] sm:$0xff] %v5041_v12  ;;  %v5043_v30 = vpop.f32.mrf.mxu1  ;;  %v4001_v12 = vld [vmem:[%s5781_s4 + $0xc0] sm:$0xff] }
 0x124   : > { %v5037_v8 = vadd.f32 %v964_v1, %v936_v21  ;;  %v3997_v21 = vld [vmem:[%s5781_s4 + $0xa0] sm:$0xff]  ;;  %v4004_v1 = vld [vmem:[%s5781_s4 + $0xd8] sm:$0xff] }
 0x125   : > { %1867 = vmatpush.bf16.msra.mxu1 %v3997_v21  ;;  %2021 = vmatpush.bf16.msra.mxu0 %v3981_v58 }
 0x126   : > { %5796 = vst [vmem:[#allocation8_spill] sm:$0xff] %v5037_v8  ;;  %1897 = vmatpush.bf16.msra.mxu3 %v4004_v1  ;;  %v3993_v1 = vld [vmem:[%s5781_s4 + $0x80] sm:$0xff] }
 0x127   : > { %v3985_v8 = vld [vmem:[%s5781_s4 + $0x40] sm:$0xff] }
 0x129   : > { %1868 = vmatpush.bf16.msra.mxu1 %v3996_v11  ;;  %2022 = vmatpush.bf16.msra.mxu0 %v3980_v13  ;;  %v4003_v13 = vld [vmem:[%s5781_s4 + $0xd0] sm:$0xff] }
 0x12a   : > { %v5059_v6 = vpop.f32.mrf.mxu3  ;;  %v5061_v18 = vpop.f32.mrf.mxu0  ;;  %1898 = vmatpush.bf16.msra.mxu3 %v4003_v13 }
 0x12b   : > { %v5057_v28 = vpop.f32.mrf.mxu2  ;;  %v5063_v63 = vpop.f32.mrf.mxu1 }
 0x12c   : > { %5798 = vst [vmem:[#allocation10_spill] sm:$0xff] %v5057_v28 }
 0x12d   : > { %1869 = vmatpush.bf16.msra.mxu1 %v3995_v32  ;;  %2023 = vmatpush.bf16.msra.mxu0 %v3979_v47  ;;  %v3987_v32 = vld [vmem:[%s5781_s4 + $0x50] sm:$0xff] }
 0x12e   : > { %2052 = vmatpush.bf16.msra.mxu2 %v3987_v32 }
 0x131   : > { %1870 = vmatpush.bf16.msra.mxu1 %v3994_v54  ;;  %2024 = vmatpush.bf16.msra.mxu0 %v3978_v50 }
 0x132   : > { %v5079_v36 = vpop.f32.mrf.mxu3  ;;  %v5081_v42 = vpop.f32.mrf.mxu0  ;;  %2053 = vmatpush.bf16.msra.mxu2 %v3986_v57  ;;  %v1173_v57 = vadd.f32 %v5039_v26, %v5028_v55  ;;  %v4024_v55 = vld [vmem:[%s5781_s4 + $0x178] sm:$0xff] }
 0x133   : > { %v5077_v35 = vpop.f32.mrf.mxu2  ;;  %v5083_v37 = vpop.f32.mrf.mxu1  ;;  %v4040_v26 = vld [vmem:[%s5781_s4 + $0x1f8] sm:$0xff] }
 0x135   : > { %1871 = vmatpush.bf16.msra.mxu1 %v3993_v1  ;;  %2025 = vmatpush.bf16.msra.mxu0 %v3977_v25  ;;  %v4002_v25 = vld [vmem:[%s5781_s4 + $0xc8] sm:$0xff] }
 0x136   : > { %1899 = vmatpush.bf16.msra.mxu3 %v4002_v25  ;;  %2054 = vmatpush.bf16.msra.mxu2 %v3985_v8  ;;  %v336_v25 = vld [vmem:[%s5779_s2] sm:$0x3] }
 0x137   : > { %v5202_v8 = vperm.slane %v336_v25, 0 }
 0x13a   : > { %v5099_v52 = vpop.f32.mrf.mxu3  ;;  %v5101_v20 = vpop.f32.mrf.mxu0  ;;  %1900 = vmatpush.bf16.msra.mxu3 %v4001_v12  ;;  %2445 = vmatpush.bf16.msrb.mxu2 %v4040_v26 }
 0x13b   : > { %v5097_v56 = vpop.f32.mrf.mxu2  ;;  %v5106_v0 = vpop.f32.mrf.mxu1 }
 0x13e   : > { %2242 = vmatpush.bf16.msrb.mxu3 %v4024_v55 }
 0x142   : > { %v5125_v59 = vpop.f32.mrf.mxu3  ;;  %v5127_v44 = vpop.f32.mrf.mxu0 }
 0x143   : > { %v5123_v3 = vpop.f32.mrf.mxu2  ;;  %v5132_v33 = vpop.f32.mrf.mxu1 }
 0x14a   : > { %v5145_v21 = vpop.f32.mrf.mxu3  ;;  %v5147_v58 = vpop.f32.mrf.mxu0 }
 0x14b   : > { %v5143_v39 = vpop.f32.mrf.mxu2  ;;  %v5152_v11 = vpop.f32.mrf.mxu1 }
 0x152   : > { %v5165_v54 = vpop.f32.mrf.mxu3  ;;  %v5167_v50 = vpop.f32.mrf.mxu0 }
 0x153   : > { %v5163_v47 = vpop.f32.mrf.mxu2  ;;  %5799 = vst [vmem:[#allocation11_spill] sm:$0xff] %v5167_v50  ;;  %v5169_v1 = vpop.f32.mrf.mxu1 }
 0x154   : > { %5800 = vst [vmem:[#allocation12_spill] sm:$0xff] %v5169_v1 }
 0x15a   : > { %v5179_v13 = vpop.f32.mrf.mxu3  ;;  %v5181_v32 = vpop.f32.mrf.mxu0 }
 0x15b   : > { %v5177_v28 = vpop.f32.mrf.mxu2  ;;  %5802 = vst [vmem:[#allocation14_spill] sm:$0xff] %v5179_v13  ;;  %v1440_v15 = vpop.f32.mrf.mxu1  ;;  %v1250_v13 = vadd.f32 %v1173_v57, %v4957_v7  ;;  %v865_v7 = vadd.f32 %v4961_v62, %v4833_v27  ;;  %v4016_v27 = vld [vmem:[%s5781_s4 + $0x138] sm:$0xff]  ;;  %v4023_v62 = vld [vmem:[%s5781_s4 + $0x170] sm:$0xff] }
 0x15c   : > { %5801 = vst [vmem:[#allocation13_spill] sm:$0xff] %v5177_v28  ;;  %2213 = vmatpush.bf16.msrb.mxu1 %v4016_v27  ;;  %2243 = vmatpush.bf16.msrb.mxu3 %v4023_v62 }
 0x15d   : > { %5803 = vst [vmem:[#allocation15_spill] sm:$0xff] %v5181_v32  ;;  %v337_v32 = vld [vmem:[%s5780_s3] sm:$0x3]  ;;  %v894_v57 = vadd.f32 %v4965_v22, %v865_v7  ;;  %v4032_v22 = vld [vmem:[%s5781_s4 + $0x1b8] sm:$0xff]  ;;  %v1178_v7 = vadd.f32 %v5079_v36, %v5063_v63  ;;  %v4015_v63 = vld [vmem:[%s5781_s4 + $0x130] sm:$0xff] }
 0x15e   : > { %v5210_v45 = vperm.slane %v337_v32, 0  ;;  %2416 = vmatpush.bf16.msrb.mxu0 %v4032_v22 }
 0x15f   : > { %v1254_v36 = vadd.f32 %v1178_v7, %v4981_v40 }
 0x160   : > { %2214 = vmatpush.bf16.msrb.mxu1 %v4015_v63 }
 0x162   : > { %v1469_v51 = vpop.f32.mrf.mxu3  ;;  %v5199_v12 = vpop.f32.mrf.mxu0 }
 0x163   : > { %v5194_v43 = vpop.f32.mrf.mxu2  ;;  %5805 = vst [vmem:[#allocation17_spill] sm:$0xff] %v5199_v12  ;;  %v1470_v1 = vadd.f32 %v1469_v51, %v1440_v15  ;;  %v1442_v29 = vpop.f32.mrf.mxu1  ;;  %v1175_v15 = vadd.f32 %v5059_v6, %v5043_v30 }
 0x164   : > { %5804 = vst [vmem:[#allocation16_spill] sm:$0xff] %v5194_v43 }
 0x165   : > { %v1547_v43 = vadd.f32 %v1470_v1, %v1250_v13  ;;  %v1252_v13 = vadd.f32 %v1175_v15, %v894_v57 }
 0x167   : > { %v1568_v51 = vmul.f32 %v5202_v8, %v1547_v43  ;;  %v4039_v43 = vld [vmem:[%s5781_s4 + $0x1f0] sm:$0xff] }
 0x168   : > { %2446 = vmatpush.bf16.msrb.mxu2 %v4039_v43 }
 0x169   : > { %v1589_v12 = vadd.f32 %v5210_v45, %v1568_v51 }
 0x16a   : > { %v1471_v50 = vpop.f32.mrf.mxu3  ;;  %v1498_v1 = vpop.f32.mrf.mxu0 }
 0x16b   : > { %v5219_v28 = vpop.f32.mrf.mxu2  ;;  %v5221_v53 = vmax.f32 %v1589_v12, 0.0  ;;  %v1472_v55 = vadd.f32 %v1471_v50, %v1442_v29  ;;  %v1445_v26 = vpop.f32.mrf.mxu1  ;;  %v5806_v29 = vmov 0.0   ;;  %v1231_v12 = vadd.f32 %v5077_v35, %v5061_v18 }
 0x16c   : > { %v5248_v35 = vperm.slane %v336_v25, 1  ;;  %v4038_v25 = vld [vmem:[%s5781_s4 + $0x1e8] sm:$0xff] }
 0x16d   : > { %v1639_v30 = vrot.slane %v5221_v53, 7  ;;  %v1727_v6 = vpack.c.bf16 %v5221_v53, %v5806_v29  ;;  %v1549_v50 = vadd.f32 %v1472_v55, %v1252_v13  ;;  %v1251_v55 = vadd.f32 %v1231_v12, %v4977_v38  ;;  %v4031_v38 = vld [vmem:[%s5781_s4 + $0x1b0] sm:$0xff]  ;;  %2447 = vmatpush.bf16.msrb.mxu2 %v4038_v25 }
 0x16e   : > { %v5265_v12 = vperm.slane %v337_v32, 1  ;;  %2417 = vmatpush.bf16.msrb.mxu0 %v4031_v38  ;;  %v4014_v32 = vld [vmem:[%s5781_s4 + $0x128] sm:$0xff] }
 0x16f   : > { %v3607_v15 = vpack.c.bf16 %v1639_v30, %v4516_v2  ;;  %v1570_v51 = vmul.f32 %v5202_v8, %v1549_v50  ;;  %1872 = vmatmul.bf16.vlgmr.msra.gmra.mxu1 %v1727_v6  ;;  %v4022_v50 = vld [vmem:[%s5781_s4 + $0x168] sm:$0xff] }
 0x170   : > { %2244 = vmatpush.bf16.msrb.mxu3 %v4022_v50  ;;  %2215 = vmatpush.bf16.msrb.mxu1 %v4014_v32 }
 0x171   : > { %v1591_v57 = vadd.f32 %v5210_v45, %v1570_v51  ;;  %3608 = vmatmul.msk.bf16.vlgmr.msra.gmra.mxu0 %vm4536_vm3, %v3607_v15  ;;  %v923_v15 = vadd.f32 %v4979_v16, %v4865_v46  ;;  %v1233_v51 = vadd.f32 %v5097_v56, %v5081_v42  ;;  %v4030_v42 = vld [vmem:[%s5781_s4 + $0x1a8] sm:$0xff] }
 0x172   : > { %v1474_v27 = vpop.f32.mrf.mxu3  ;;  %v1500_v62 = vpop.f32.mrf.mxu0  ;;  %2418 = vmatpush.bf16.msrb.mxu0 %v4030_v42 }
 0x173   : > { %v1527_v13 = vpop.f32.mrf.mxu2  ;;  %v5254_v22 = vmax.f32 %v1591_v57, 0.0  ;;  %v1475_v43 = vadd.f32 %v1474_v27, %v1445_v26  ;;  %v1447_v6 = vpop.f32.mrf.mxu1  ;;  %v952_v46 = vadd.f32 %v4985_v34, %v923_v15  ;;  %v4013_v34 = vld [vmem:[%s5781_s4 + $0x120] sm:$0xff] }
 0x174   : > { %v1528_v18 = vadd.f32 %v1527_v13, %v1498_v1  ;;  %v870_v13 = vadd.f32 %v4983_v24, %v4911_v23  ;;  %2216 = vmatpush.bf16.msrb.mxu1 %v4013_v34 }
 0x175   : > { %v2279_v40 = vpack.c.bf16 %v5254_v22, %v5221_v53  ;;  %v1551_v26 = vadd.f32 %v1475_v43, %v1254_v36  ;;  %v1641_v7 = vrot.slane %v5254_v22, 7  ;;  %v1253_v63 = vadd.f32 %v1233_v51, %v952_v46 }
 0x176   : > { %v1548_v1 = vadd.f32 %v1528_v18, %v1251_v55  ;;  %v1180_v55 = vadd.f32 %v5099_v52, %v5083_v37  ;;  %v899_v56 = vadd.f32 %v4987_v17, %v870_v13  ;;  %v4021_v17 = vld [vmem:[%s5781_s4 + $0x160] sm:$0xff]  ;;  %v1236_v13 = vadd.f32 %v5123_v3, %v5101_v20 }
 0x177   : > { %v1572_v27 = vmul.f32 %v5202_v8, %v1551_v26  ;;  %v5283_v18 = vpack.c.bf16 %v1641_v7, %v1639_v30  ;;  %2245 = vmatpush.bf16.msrb.mxu3 %v4021_v17  ;;  %v1183_v46 = vadd.f32 %v5125_v59, %v5106_v0 }
 0x178   : > { %v1569_v57 = vmul.f32 %v5248_v35, %v1548_v1  ;;  %v1256_v43 = vadd.f32 %v1180_v55, %v899_v56  ;;  %v4037_v1 = vld [vmem:[%s5781_s4 + $0x1e0] sm:$0xff]  ;;  %v1255_v3 = vadd.f32 %v1236_v13, %v4996_v61  ;;  %v4010_v13 = vld [vmem:[%s5781_s4 + $0x108] sm:$0xff] }
 0x179   : > { %v1593_v23 = vadd.f32 %v5210_v45, %v1572_v27  ;;  %2448 = vmatpush.bf16.msrb.mxu2 %v4037_v1  ;;  %v4012_v27 = vld [vmem:[%s5781_s4 + $0x118] sm:$0xff]  ;;  %v928_v1 = vadd.f32 %v4998_v48, %v4931_v31  ;;  %v1238_v31 = vadd.f32 %v5143_v39, %v5127_v44  ;;  %v4026_v39 = vld [vmem:[%s5781_s4 + $0x188] sm:$0xff] }
 0x17a   : > { %v1590_v16 = vadd.f32 %v5265_v12, %v1569_v57  ;;  %v1476_v52 = vpop.f32.mrf.mxu3  ;;  %v1503_v36 = vpop.f32.mrf.mxu0  ;;  %2217 = vmatpush.bf16.msrb.mxu1 %v4012_v27 }
 0x17b   : > { %v1529_v24 = vpop.f32.mrf.mxu2  ;;  %v5297_v50 = vmax.f32 %v1593_v23, 0.0  ;;  %v1477_v38 = vadd.f32 %v1476_v52, %v1447_v6  ;;  %v1450_v25 = vpop.f32.mrf.mxu1  ;;  %v4029_v6 = vld [vmem:[%s5781_s4 + $0x1a0] sm:$0xff]  ;;  %v1258_v52 = vadd.f32 %v1183_v46, %v5000_v41 }
 0x17c   : > { %v5292_v37 = vmax.f32 %v1590_v16, 0.0  ;;  %v1530_v30 = vadd.f32 %v1529_v24, %v1500_v62  ;;  %2419 = vmatpush.bf16.msrb.mxu0 %v4029_v6 }
 0x17d   : > { %v1553_v51 = vadd.f32 %v1477_v38, %v1256_v43  ;;  %v1729_v57 = vpack.c.bf16 %v5297_v50, %v5254_v22  ;;  %v1643_v32 = vrot.slane %v5297_v50, 7 }
 0x17e   : > { %v1640_v62 = vrot.slane %v5292_v37, 7  ;;  %v1728_v26 = vpack.c.bf16 %v5292_v37, %v5806_v29  ;;  %v1550_v15 = vadd.f32 %v1530_v30, %v1253_v63  ;;  %v4011_v63 = vld [vmem:[%s5781_s4 + $0x110] sm:$0xff] }
 0x17f   : > { %v1574_v16 = vmul.f32 %v5202_v8, %v1553_v51  ;;  %1877 = vmatmul.bf16.gmra.mxu1 %v1729_v57  ;;  %v3612_v42 = vpack.c.bf16 %v1643_v32, %v1641_v7  ;;  %v875_v51 = vadd.f32 %v5002_v4, %v4944_v60  ;;  %v957_v4 = vadd.f32 %v5004_v10, %v928_v1  ;;  %v4019_v10 = vld [vmem:[%s5781_s4 + $0x150] sm:$0xff] }
 0x180   : > { %v3627_v55 = vpack.c.bf16 %v1640_v62, %v4516_v2  ;;  %v1571_v29 = vmul.f32 %v5248_v35, %v1550_v15  ;;  %1901 = vmatmul.bf16.vlgmr.msra.gmra.mxu3 %v1728_v26  ;;  %v4028_v2 = vld [vmem:[%s5781_s4 + $0x198] sm:$0xff]  ;;  %2218 = vmatpush.bf16.msrb.mxu1 %v4011_v63 }
 0x181   : > { %v1595_v20 = vadd.f32 %v5210_v45, %v1574_v16  ;;  %3613 = vmatmul.msk.bf16.gmra.mxu0 %vm4536_vm3, %v3612_v42  ;;  %v4036_v15 = vld [vmem:[%s5781_s4 + $0x1d8] sm:$0xff]  ;;  %v4035_v42 = vld [vmem:[%s5781_s4 + $0x1d0] sm:$0xff] }
 0x182   : > { %v1592_v56 = vadd.f32 %v5265_v12, %v1571_v29  ;;  %3628 = vmatmul.msk.bf16.vlgmr.msra.gmra.mxu2 %vm4536_vm3, %v3627_v55  ;;  %v1479_v7 = vpop.f32.mrf.mxu3  ;;  %v1505_v24 = vpop.f32.mrf.mxu0  ;;  %2420 = vmatpush.bf16.msrb.mxu0 %v4028_v2  ;;  %v1185_v55 = vadd.f32 %v5145_v21, %v5132_v33  ;;  %v1257_v21 = vadd.f32 %v1238_v31, %v957_v4  ;;  %v4018_v4 = vld [vmem:[%s5781_s4 + $0x148] sm:$0xff] }
 0x183   : > { %v1532_v0 = vpop.f32.mrf.mxu2  ;;  %v5340_v30 = vmax.f32 %v1595_v20, 0.0  ;;  %v1480_v34 = vadd.f32 %v1479_v7, %v1450_v25  ;;  %v1452_v61 = vpop.f32.mrf.mxu1  ;;  %v4020_v25 = vld [vmem:[%s5781_s4 + $0x158] sm:$0xff]  ;;  %2449 = vmatpush.bf16.msrb.mxu2 %v4036_v15 }
 0x184   : > { %v5334_v59 = vmax.f32 %v1592_v56, 0.0  ;;  %v1533_v23 = vadd.f32 %v1532_v0, %v1503_v36  ;;  %v4027_v36 = vld [vmem:[%s5781_s4 + $0x190] sm:$0xff]  ;;  %2246 = vmatpush.bf16.msrb.mxu3 %v4020_v25  ;;  %2219 = vmatpush.bf16.msrb.mxu1 %v4010_v13 }
 0x185   : > { %v1555_v26 = vadd.f32 %v1480_v34, %v1258_v52  ;;  %v1645_v41 = vrot.slane %v5340_v30, 7  ;;  %v2281_v6 = vpack.c.bf16 %v5340_v30, %v5297_v50 }
 0x186   : > { %v2280_v43 = vpack.c.bf16 %v5334_v59, %v5292_v37  ;;  %v1552_v38 = vadd.f32 %v1533_v23, %v1255_v3  ;;  %v1642_v17 = vrot.slane %v5334_v59, 7  ;;  %2421 = vmatpush.bf16.msrb.mxu0 %v4027_v36 }
 0x187   : > { %v1576_v29 = vmul.f32 %v5202_v8, %v1555_v26  ;;  %v5372_v60 = vpack.c.bf16 %v1645_v41, %v1643_v32  ;;  %2450 = vmatpush.bf16.msrb.mxu2 %v4035_v42  ;;  %v1188_v26 = vadd.f32 %v5165_v54, %v5152_v11 }
 0x188   : > { %v1573_v48 = vmul.f32 %v5248_v35, %v1552_v38  ;;  %v5364_v57 = vpack.c.bf16 %v1642_v17, %v1640_v62  ;;  %v904_v62 = vadd.f32 %v5006_v19, %v875_v51  ;;  %v4009_v19 = vld [vmem:[%s5781_s4 + $0x100] sm:$0xff]  ;;  %2247 = vmatpush.bf16.msrb.mxu3 %v4019_v10  ;;  %v1241_v38 = vadd.f32 %v5163_v47, %v5147_v58 }
 0x189   : > { %v1597_v27 = vadd.f32 %v5210_v45, %v1576_v29  ;;  %2220 = vmatpush.bf16.msrb.mxu1 %v4009_v19  ;;  %v4017_v19 = vld [vmem:[%s5781_s4 + $0x140] sm:$0xff] }
 0x18a   : > { %v1594_v44 = vadd.f32 %v5265_v12, %v1573_v48  ;;  %v1481_v16 = vpop.f32.mrf.mxu3  ;;  %2422 = vmatpush.bf16.msrb.mxu0 %v4026_v39  ;;  %v1260_v56 = vadd.f32 %v1185_v55, %v904_v62  ;;  %v1508_v0 = vpop.f32.mrf.mxu0  ;;  %v1262_v48 = vadd.f32 %v1188_v26, %v5019_v5  ;;  %v5807_v39 = vld [vmem:[#allocation4_spill] sm:$0xff] }
 0x18b   : > { %v1534_v33 = vpop.f32.mrf.mxu2  ;;  %v5392_v2 = vmax.f32 %v1597_v27, 0.0  ;;  %v1482_v20 = vadd.f32 %v1481_v16, %v1452_v61  ;;  %v1455_v1 = vpop.f32.mrf.mxu1  ;;  %v933_v5 = vadd.f32 %v5807_v39, %v4946_v14  ;;  %v5808_v16 = vld [vmem:[#allocation11_spill] sm:$0xff]  ;;  %v4033_v14 = vld [vmem:[%s5781_s4 + $0x1c0] sm:$0xff] }
 0x18c   : > { %v5381_v46 = vmax.f32 %v1594_v44, 0.0  ;;  %v1535_v32 = vadd.f32 %v1534_v33, %v1505_v24  ;;  %v4025_v24 = vld [vmem:[%s5781_s4 + $0x180] sm:$0xff]  ;;  %2248 = vmatpush.bf16.msrb.mxu3 %v4018_v4 }
 0x18d   : > { %v1557_v63 = vadd.f32 %v1482_v20, %v1260_v56  ;;  %v1731_v52 = vpack.c.bf16 %v5392_v2, %v5340_v30  ;;  %v1647_v34 = vrot.slane %v5392_v2, 7  ;;  %v5810_v20 = vld [vmem:[#allocation2_spill] sm:$0xff] }
 0x18e   : > { %v1554_v3 = vadd.f32 %v1535_v32, %v1257_v21  ;;  %v1730_v7 = vpack.c.bf16 %v5381_v46, %v5334_v59  ;;  %v1644_v23 = vrot.slane %v5381_v46, 7  ;;  %2423 = vmatpush.bf16.msrb.mxu0 %v4025_v24  ;;  %v5809_v32 = vld [vmem:[#allocation13_spill] sm:$0xff]  ;;  %v5813_v24 = vld [vmem:[#allocation14_spill] sm:$0xff] }
 0x18f   : > { %v1578_v25 = vmul.f32 %v5202_v8, %v1557_v63  ;;  %1882 = vmatmul.bf16.gmra.mxu1 %v1731_v52  ;;  %v3617_v15 = vpack.c.bf16 %v1647_v34, %v1645_v41  ;;  %v1243_v10 = vadd.f32 %v5809_v32, %v5808_v16  ;;  %v5817_v16 = vld [vmem:[#allocation16_spill] sm:$0xff] }
 0x190   : > { %v1575_v61 = vmul.f32 %v5248_v35, %v1554_v3  ;;  %1906 = vmatmul.bf16.gmra.mxu3 %v1730_v7  ;;  %v3632_v36 = vpack.c.bf16 %v1644_v23, %v1642_v17  ;;  %v1259_v17 = vadd.f32 %v1241_v38, %v5015_v49  ;;  %v4034_v49 = vld [vmem:[%s5781_s4 + $0x1c8] sm:$0xff]  ;;  %v5812_v7 = vld [vmem:[#allocation12_spill] sm:$0xff] }
 0x191   : > { %v1599_v58 = vadd.f32 %v5210_v45, %v1578_v25  ;;  %3618 = vmatmul.msk.bf16.gmra.mxu0 %vm4536_vm3, %v3617_v15  ;;  %2451 = vmatpush.bf16.msrb.mxu2 %v4034_v49  ;;  %v1190_v63 = vadd.f32 %v5813_v24, %v5812_v7  ;;  %v5815_v25 = vld [vmem:[#allocation7_spill] sm:$0xff]  ;;  %v5818_v7 = vld [vmem:[#allocation8_spill] sm:$0xff] }
 0x192   : > { %v1596_v51 = vadd.f32 %v5265_v12, %v1575_v61  ;;  %3633 = vmatmul.msk.bf16.gmra.mxu2 %vm4536_vm3, %v3632_v36  ;;  %v1484_v11 = vpop.f32.mrf.mxu3  ;;  %v1510_v27 = vpop.f32.mrf.mxu0  ;;  %v5814_v61 = vld [vmem:[#allocation6_spill] sm:$0xff]  ;;  %2249 = vmatpush.bf16.msrb.mxu3 %v4017_v19 }
 0x193   : > { %v1537_v47 = vpop.f32.mrf.mxu2  ;;  %v5419_v41 = vmax.f32 %v1599_v58, 0.0  ;;  %v1485_v13 = vadd.f32 %v1484_v11, %v1455_v1  ;;  %v962_v36 = vadd.f32 %v5814_v61, %v933_v5  ;;  %v1457_v26 = vpop.f32.mrf.mxu1 }
 0x194   : > { %v5416_v31 = vmax.f32 %v1596_v51, 0.0  ;;  %v1538_v54 = vadd.f32 %v1537_v47, %v1508_v0  ;;  %v5811_v0 = vld [vmem:[#allocation5_spill] sm:$0xff] }
 0x195   : > { %v1559_v62 = vadd.f32 %v1485_v13, %v1262_v48  ;;  %v1649_v33 = vrot.slane %v5419_v41, 7  ;;  %v2283_v21 = vpack.c.bf16 %v5419_v41, %v5392_v2  ;;  %v880_v3 = vadd.f32 %v5811_v0, %v5810_v20  ;;  %2452 = vmatpush.bf16.msrb.mxu2 %v4033_v14 }
 0x196   : > { %v1556_v55 = vadd.f32 %v1538_v54, %v1259_v17  ;;  %v1646_v29 = vrot.slane %v5416_v31, 7  ;;  %v2282_v44 = vpack.c.bf16 %v5416_v31, %v5381_v46  ;;  %v1261_v58 = vadd.f32 %v1243_v10, %v962_v36 }
 0x197   : > { %v1580_v52 = vmul.f32 %v5202_v8, %v1559_v62  ;;  %v5451_v38 = vpack.c.bf16 %v1649_v33, %v1647_v34  ;;  %v909_v15 = vadd.f32 %v5815_v25, %v880_v3  ;;  %v5816_v62 = vld [vmem:[#allocation15_spill] sm:$0xff]  ;;  %v5820_v25 = vld [vmem:[#allocation9_spill] sm:$0xff] }
 0x198   : > { %v1577_v42 = vmul.f32 %v5248_v35, %v1556_v55  ;;  %v5444_v56 = vpack.c.bf16 %v1646_v29, %v1644_v23  ;;  %v1246_v32 = vadd.f32 %v5817_v16, %v5816_v62 }
 0x199   : > { %v1601_v23 = vadd.f32 %v5210_v45, %v1580_v52  ;;  %v1264_v54 = vadd.f32 %v1190_v63, %v909_v15 }
 0x19a   : > { %v1598_v1 = vadd.f32 %v5265_v12, %v1577_v42  ;;  %v1486_v17 = vpop.f32.mrf.mxu3  ;;  %v1513_v19 = vpop.f32.mrf.mxu0  ;;  %v1263_v24 = vadd.f32 %v1246_v32, %v5818_v7 }
 0x19b   : > { %v1539_v51 = vpop.f32.mrf.mxu2  ;;  %v1617_v34 = vmax.f32 %v1601_v23, 0.0  ;;  %v1487_v48 = vadd.f32 %v1486_v17, %v1457_v26  ;;  %v5819_v26 = vld [vmem:[#allocation3_spill] sm:$0xff]  ;;  %v5821_v23 = vld [vmem:[#allocation17_spill] sm:$0xff] }
 0x19c   : > { %v5457_v47 = vmax.f32 %v1598_v1, 0.0  ;;  %v1540_v11 = vadd.f32 %v1539_v51, %v1510_v27  ;;  %v938_v15 = vadd.f32 %v5820_v25, %v5819_v26 }
 0x19d   : > { %v1561_v49 = vadd.f32 %v1487_v48, %v1264_v54  ;;  %v1733_v39 = vpack.c.bf16 %v1617_v34, %v5419_v41  ;;  %v1651_v5 = vrot.slane %v1617_v34, 7 }
 0x19e   : > { %v1558_v13 = vadd.f32 %v1540_v11, %v1261_v58  ;;  %v1732_v55 = vpack.c.bf16 %v5457_v47, %v5416_v31  ;;  %v1648_v4 = vrot.slane %v5457_v47, 7  ;;  %v5822_v11 = vld [vmem:[#allocation10_spill] sm:$0xff] }
 0x19f   : > { %v1582_v42 = vmul.f32 %v5202_v8, %v1561_v49  ;;  %1887 = vmatmul.bf16.gmra.mxu1 %v1733_v39  ;;  %v3622_v14 = vpack.c.bf16 %v1651_v5, %v1649_v33  ;;  %v967_v54 = vadd.f32 %v5822_v11, %v938_v15 }
 0x1a0   : > { %v1579_v27 = vmul.f32 %v5248_v35, %v1558_v13  ;;  %1911 = vmatmul.bf16.gmra.mxu3 %v1732_v55  ;;  %v3637_v10 = vpack.c.bf16 %v1648_v4, %v1646_v29 }
 0x1a1   : > { %v1603_v0 = vadd.f32 %v5210_v45, %v1582_v42  ;;  %3623 = vmatmul.msk.bf16.gmra.mxu0 %vm4536_vm3, %v3622_v14  ;;  %v1248_v45 = vadd.f32 %v5219_v28, %v5821_v23 }
 0x1a2   : > { %v1600_v20 = vadd.f32 %v5265_v12, %v1579_v27  ;;  %3638 = vmatmul.msk.bf16.gmra.mxu2 %vm4536_vm3, %v3637_v10  ;;  %v1515_v13 = vpop.f32.mrf.mxu0 }
 0x1a3   : > { %v1542_v3 = vpop.f32.mrf.mxu2  ;;  %v1619_v52 = vmax.f32 %v1603_v0, 0.0  ;;  %v1265_v49 = vadd.f32 %v1248_v45, %v967_v54 }
 0x1a4   : > { %v1616_v63 = vmax.f32 %v1600_v20, 0.0  ;;  %v1543_v29 = vadd.f32 %v1542_v3, %v1513_v19 }
 0x1a5   : > { %v1653_v36 = vrot.slane %v1619_v52, 7  ;;  %v2285_v1 = vpack.c.bf16 %v1619_v52, %v1617_v34 }
 0x1a6   : > { %v1560_v8 = vadd.f32 %v1543_v29, %v1263_v24  ;;  %v1650_v61 = vrot.slane %v1616_v63, 7  ;;  %v2284_v33 = vpack.c.bf16 %v1616_v63, %v5457_v47 }
 0x1a7   : > { %v3758_v17 = vpack.c.bf16 %v1653_v36, %v1651_v5 }
 0x1a8   : > { %v1581_v51 = vmul.f32 %v5248_v35, %v1560_v8  ;;  %v3773_v58 = vpack.c.bf16 %v1650_v61, %v1648_v4 }
 0x1aa   : > { %v1602_v48 = vadd.f32 %v5265_v12, %v1581_v51 }
 0x1ab   : > { %v1544_v55 = vpop.f32.mrf.mxu2 }
 0x1ac   : > { %v1618_v47 = vmax.f32 %v1602_v48, 0.0  ;;  %v1545_v39 = vadd.f32 %v1544_v55, %v1515_v13  ;;  %v5564_v48 = vld [vmem:[%s5783_s6] ss:$0 sm:$0xff] }
 0x1ae   : > { %v1562_v34 = vadd.f32 %v1545_v39, %v1265_v49  ;;  %v1734_v62 = vpack.c.bf16 %v1618_v47, %v1616_v63  ;;  %v1652_v16 = vrot.slane %v1618_v47, 7 }
 0x1af   : > { %3744 = vmatmul.msk.bf16.vlgmr.msrb.gmra.mxu1 %vm4536_vm3, %v5283_v18 }
 0x1b0   : > { %v1583_v32 = vmul.f32 %v5248_v35, %v1562_v34  ;;  %1916 = vmatmul.bf16.gmra.mxu3 %v1734_v62  ;;  %v3642_v28 = vpack.c.bf16 %v1652_v16, %v1650_v61 }
 0x1b1   : > { %2424 = vmatmul.bf16.vlgmr.msrb.gmra.mxu0 %v2279_v40 }
 0x1b2   : > { %v1604_v4 = vadd.f32 %v5265_v12, %v1583_v32  ;;  %3643 = vmatmul.msk.bf16.gmra.mxu2 %vm4536_vm3, %v3642_v28 }
 0x1b4   : > { %v1620_v5 = vmax.f32 %v1604_v4, 0.0 }
 0x1b6   : > { %v1654_v27 = vrot.slane %v1620_v5, 7  ;;  %v2286_v10 = vpack.c.bf16 %v1620_v5, %v1618_v47 }
 0x1b8   : > { %v3778_v42 = vpack.c.bf16 %v1654_v27, %v1652_v16 }
 0x1bf   : > { %3749 = vmatmul.msk.bf16.gmra.mxu1 %vm4536_vm3, %v5372_v60 }
 0x1c0   : > { %3764 = vmatmul.msk.bf16.vlgmr.msrb.gmra.mxu3 %vm4536_vm3, %v5364_v57 }
 0x1c1   : > { %2429 = vmatmul.bf16.gmra.mxu0 %v2281_v6 }
 0x1c2   : > { %2453 = vmatmul.bf16.vlgmr.msrb.gmra.mxu2 %v2280_v43 }
 0x1cf   : > { %3754 = vmatmul.msk.bf16.gmra.mxu1 %vm4536_vm3, %v5451_v38 }
 0x1d0   : > { %3769 = vmatmul.msk.bf16.gmra.mxu3 %vm4536_vm3, %v5444_v56 }
 0x1d1   : > { %2434 = vmatmul.bf16.gmra.mxu0 %v2283_v21 }
 0x1d2   : > { %2458 = vmatmul.bf16.gmra.mxu2 %v2282_v44 }
 0x1df   : > { %3759 = vmatmul.msk.bf16.gmra.mxu1 %vm4536_vm3, %v3758_v17  ;;  %v5559_v17 = vld [vmem:[%s5782_s5] ss:$0 sm:$0xff] }
 0x1e0   : > { %3774 = vmatmul.msk.bf16.gmra.mxu3 %vm4536_vm3, %v3773_v58 }
 0x1e1   : > { %2439 = vmatmul.bf16.gmra.mxu0 %v2285_v1 }
 0x1e2   : > { %2463 = vmatmul.bf16.gmra.mxu2 %v2284_v33 }
 0x1ec   : > { %v1873_v53 = vpop.f32.mrf.mxu1 }
 0x1ee   : > { %v2027_v35 = vpop.f32.mrf.mxu0 }
 0x1f0   : > { %3779 = vmatmul.msk.bf16.gmra.mxu3 %vm4536_vm3, %v3778_v42 }
 0x1f2   : > { %2468 = vmatmul.bf16.gmra.mxu2 %v2286_v10 }
 0x1f4   : > { %v1875_v22 = vpop.f32.mrf.mxu1 }
 0x1f6   : > { %v2029_v12 = vpop.f32.mrf.mxu0 }
 0x1fc   : > { %v1878_v40 = vpop.f32.mrf.mxu1 }
 0x1fe   : > { %v2032_v18 = vpop.f32.mrf.mxu0 }
 0x203   : > { %v1902_v37 = vpop.f32.mrf.mxu3 }
 0x204   : > { %v1880_v59 = vpop.f32.mrf.mxu1  ;;  %v1903_v8 = vadd.f32 %v1902_v37, %v1873_v53 }
 0x205   : > { %v2056_v50 = vpop.f32.mrf.mxu2 }
 0x206   : > { %v5522_v30 = vpop.f32.mrf.mxu0  ;;  %v2028_v36 = vadd.f32 %v2027_v35, %v1903_v8 }
 0x208   : > { %v2057_v25 = vadd.f32 %v2056_v50, %v2028_v36 }
 0x20b   : > { %v1904_v43 = vpop.f32.mrf.mxu3 }
 0x20c   : > { %v5524_v57 = vpop.f32.mrf.mxu1  ;;  %v1905_v15 = vadd.f32 %v1904_v43, %v1875_v22 }
 0x20d   : > { %v2058_v6 = vpop.f32.mrf.mxu2 }
 0x20e   : > { %v5526_v60 = vpop.f32.mrf.mxu0  ;;  %v2030_v11 = vadd.f32 %v2029_v12, %v1905_v15 }
 0x210   : > { %v2059_v39 = vadd.f32 %v2058_v6, %v2030_v11 }
 0x213   : > { %v1907_v46 = vpop.f32.mrf.mxu3 }
 0x214   : > { %v5528_v9 = vpop.f32.mrf.mxu1  ;;  %v1908_v34 = vadd.f32 %v1907_v46, %v1878_v40 }
 0x215   : > { %v2061_v2 = vpop.f32.mrf.mxu2 }
 0x216   : > { %v5530_v31 = vpop.f32.mrf.mxu0  ;;  %v2033_v27 = vadd.f32 %v2032_v18, %v1908_v34 }
 0x218   : > { %v2062_v22 = vadd.f32 %v2061_v2, %v2033_v27 }
 0x21b   : > { %v1909_v41 = vpop.f32.mrf.mxu3 }
 0x21c   : > { %v5534_v21 = vpop.f32.mrf.mxu1  ;;  %v1910_v12 = vadd.f32 %v1909_v41, %v1880_v59 }
 0x21d   : > { %v5532_v44 = vpop.f32.mrf.mxu2 }
 0x21e   : > { %v5536_v56 = vpop.f32.mrf.mxu0 }
 0x223   : > { %v1912_v38 = vpop.f32.mrf.mxu3 }
 0x224   : > { %v5540_v14 = vpop.f32.mrf.mxu1  ;;  %v1913_v2 = vadd.f32 %v1912_v38, %v5524_v57 }
 0x225   : > { %v5538_v19 = vpop.f32.mrf.mxu2 }
 0x226   : > { %v5544_v0 = vpop.f32.mrf.mxu0 }
 0x22b   : > { %v5542_v20 = vpop.f32.mrf.mxu3 }
 0x22c   : > { %v2222_v24 = vpop.f32.mrf.mxu1  ;;  %v1915_v38 = vadd.f32 %v5542_v20, %v5528_v9 }
 0x22d   : > { %v5546_v3 = vpop.f32.mrf.mxu2 }
 0x22e   : > { %v2425_v29 = vpop.f32.mrf.mxu0 }
 0x233   : > { %v5548_v7 = vpop.f32.mrf.mxu3 }
 0x234   : > { %v2224_v33 = vpop.f32.mrf.mxu1  ;;  %v1918_v20 = vadd.f32 %v5548_v7, %v5534_v21 }
 0x235   : > { %v5550_v63 = vpop.f32.mrf.mxu2 }
 0x236   : > { %v2427_v1 = vpop.f32.mrf.mxu0 }
 0x23b   : > { %v5552_v52 = vpop.f32.mrf.mxu3 }
 0x23c   : > { %v2227_v13 = vpop.f32.mrf.mxu1  ;;  %v1920_v7 = vadd.f32 %v5552_v52, %v5540_v14 }
 0x23d   : > { %v5554_v61 = vpop.f32.mrf.mxu2 }
 0x23e   : > { %v2430_v49 = vpop.f32.mrf.mxu0 }
 0x243   : > { %v2251_v26 = vpop.f32.mrf.mxu3 }
 0x244   : > { %v2252_v23 = vadd.f32 %v2251_v26, %v2222_v24  ;;  %v2229_v53 = vpop.f32.mrf.mxu1  ;;  %v2035_v24 = vadd.f32 %v5522_v30, %v1910_v12 }
 0x245   : > { %v2454_v45 = vpop.f32.mrf.mxu2 }
 0x246   : > { %v2271_v51 = vadd.f32 %v2252_v23, %v2057_v25  ;;  %v2455_v58 = vadd.f32 %v2454_v45, %v2425_v29  ;;  %v2432_v50 = vpop.f32.mrf.mxu0  ;;  %v2064_v59 = vadd.f32 %v5532_v44, %v2035_v24  ;;  %v2038_v45 = vadd.f32 %v5526_v60, %v1913_v2 }
 0x248   : > { %v2474_v54 = vadd.f32 %v2455_v58, %v2271_v51  ;;  %v2067_v57 = vadd.f32 %v5538_v19, %v2038_v45 }
 0x24a   : > { %v2485_v55 = vmul.f32 %v5559_v17, %v2474_v54 }
 0x24b   : > { %v2253_v47 = vpop.f32.mrf.mxu3 }
 0x24c   : > { %v2496_v62 = vadd.f32 %v5564_v48, %v2485_v55  ;;  %v2254_v16 = vadd.f32 %v2253_v47, %v2224_v33 }
 0x24d   : > { %v2456_v32 = vpop.f32.mrf.mxu2 }
 0x24e   : > { %v5568_v28 = vmax.f32 %v2496_v62, 0.0  ;;  %v2272_v4 = vadd.f32 %v2254_v16, %v2059_v39  ;;  %v2457_v5 = vadd.f32 %v2456_v32, %v2427_v1  ;;  %v2232_v1 = vpop.f32.mrf.mxu1  ;;  %v2435_v23 = vpop.f32.mrf.mxu0  ;;  %v2040_v39 = vadd.f32 %v5530_v31, %v1915_v38 }
 0x250   : > { %v2475_v10 = vadd.f32 %v2457_v5, %v2272_v4  ;;  %2520 = vrot.lane.b32.xlu0 %v5568_v28, %s4063_s22  ;;  %v2069_v9 = vadd.f32 %v5546_v3, %v2040_v39 }
 0x252   : > { %v2486_v42 = vmul.f32 %v5559_v17, %v2475_v10 }
 0x253   : > { %v2256_v35 = vpop.f32.mrf.mxu3 }
 0x254   : > { %v2497_v40 = vadd.f32 %v5564_v48, %v2486_v42  ;;  %v2257_v37 = vadd.f32 %v2256_v35, %v2227_v13  ;;  %v2043_v42 = vadd.f32 %v5536_v56, %v1918_v20 }
 0x255   : > { %v2459_v43 = vpop.f32.mrf.mxu2 }
 0x256   : > { %v5574_v6 = vmax.f32 %v2497_v40, 0.0  ;;  %v2273_v46 = vadd.f32 %v2257_v37, %v2062_v22  ;;  %v2460_v18 = vadd.f32 %v2459_v43, %v2430_v49  ;;  %v2234_v47 = vpop.f32.mrf.mxu1  ;;  %v2437_v62 = vpop.f32.mrf.mxu0  ;;  %v2072_v21 = vadd.f32 %v5550_v63, %v2043_v42 }
 0x258   : > { %v2476_v29 = vadd.f32 %v2460_v18, %v2273_v46  ;;  %2522 = vrot.lane.b32.xlu0 %v5574_v6, %s4063_s22  ;;  %v2045_v18 = vadd.f32 %v5544_v0, %v1920_v7 }
 0x25a   : > { %v2487_v8 = vmul.f32 %v5559_v17, %v2476_v29  ;;  %v2074_v14 = vadd.f32 %v5554_v61, %v2045_v18 }
 0x25b   : > { %v2258_v33 = vpop.f32.mrf.mxu3 }
 0x25c   : > { %v2498_v41 = vadd.f32 %v5564_v48, %v2487_v8  ;;  %v2259_v36 = vadd.f32 %v2258_v33, %v2229_v53 }
 0x25d   : > { %v2461_v26 = vpop.f32.mrf.mxu2 }
 0x25e   : > { %v5583_v25 = vmax.f32 %v2498_v41, 0.0  ;;  %v2274_v15 = vadd.f32 %v2259_v36, %v2064_v59  ;;  %v2462_v30 = vadd.f32 %v2461_v26, %v2432_v50  ;;  %v2237_v35 = vpop.f32.mrf.mxu1  ;;  %v2440_v22 = vpop.f32.mrf.mxu0 }
 0x260   : > { %v2477_v51 = vadd.f32 %v2462_v30, %v2274_v15  ;;  %2524 = vrot.lane.b32.xlu1 %v5583_v25, %s4063_s22 }
 0x262   : > { %v2488_v44 = vmul.f32 %v5559_v17, %v2477_v51 }
 0x263   : > { %v2261_v58 = vpop.f32.mrf.mxu3 }
 0x264   : > { %v2499_v11 = vadd.f32 %v5564_v48, %v2488_v44  ;;  %v2262_v54 = vadd.f32 %v2261_v58, %v2232_v1 }
 0x265   : > { %v2464_v13 = vpop.f32.mrf.mxu2 }
 0x266   : > { %v5593_v55 = vmax.f32 %v2499_v11, 0.0  ;;  %v2275_v49 = vadd.f32 %v2262_v54, %v2067_v57  ;;  %v2465_v60 = vadd.f32 %v2464_v13, %v2435_v23  ;;  %v2239_v63 = vpop.f32.mrf.mxu1  ;;  %v2442_v59 = vpop.f32.mrf.mxu0  ;;  %v4064_v23 = vmov 0  }
 0x268   : > { %v2478_v34 = vadd.f32 %v2465_v60, %v2275_v49  ;;  %2526 = vrot.lane.b32.xlu1 %v5593_v55, %s4063_s22 }
 0x26a   : > { %v2489_v19 = vmul.f32 %v5559_v17, %v2478_v34 }
 0x26b   : > { %v2263_v16 = vpop.f32.mrf.mxu3 }
 0x26c   : > { %v2500_v32 = vadd.f32 %v5564_v48, %v2489_v19  ;;  %v2264_v4 = vadd.f32 %v2263_v16, %v2234_v47 }
 0x26d   : > { %v2466_v5 = vpop.f32.mrf.mxu2 }
 0x26e   : > { %v5603_v27 = vmax.f32 %v2500_v32, 0.0  ;;  %v2276_v31 = vadd.f32 %v2264_v4, %v2069_v9  ;;  %v2467_v10 = vadd.f32 %v2466_v5, %v2437_v62 }
 0x270   : > { %v2479_v53 = vadd.f32 %v2467_v10, %v2276_v31  ;;  %2528 = vrot.lane.b32.xlu2 %v5603_v27, %s4063_s22 }
 0x272   : > { %v2490_v3 = vmul.f32 %v5559_v17, %v2479_v53 }
 0x273   : > { %v2266_v12 = vpop.f32.mrf.mxu3 }
 0x274   : > { %v2501_v40 = vadd.f32 %v5564_v48, %v2490_v3  ;;  %v2267_v37 = vadd.f32 %v2266_v12, %v2237_v35 }
 0x275   : > { %v2469_v50 = vpop.f32.mrf.mxu2 }
 0x276   : > { %v5613_v43 = vmax.f32 %v2501_v40, 0.0  ;;  %v2277_v56 = vadd.f32 %v2267_v37, %v2072_v21  ;;  %v2470_v46 = vadd.f32 %v2469_v50, %v2440_v22 }
 0x278   : > { %v2480_v24 = vadd.f32 %v2470_v46, %v2277_v56  ;;  %2530 = vrot.lane.b32.xlu2 %v5613_v43, %s4063_s22 }
 0x27a   : > { %v2491_v29 = vmul.f32 %v5559_v17, %v2480_v24 }
 0x27b   : > { %v2268_v8 = vpop.f32.mrf.mxu3 }
 0x27c   : > { %v2502_v52 = vadd.f32 %v5564_v48, %v2491_v29  ;;  %v2269_v33 = vadd.f32 %v2268_v8, %v2239_v63 }
 0x27d   : > { %v2471_v2 = vpop.f32.mrf.mxu2 }
 0x27e   : > { %v5621_v41 = vmax.f32 %v2502_v52, 0.0  ;;  %v2278_v36 = vadd.f32 %v2269_v33, %v2074_v14  ;;  %v2472_v1 = vadd.f32 %v2471_v2, %v2442_v59 }
 0x280   : > { %v2481_v0 = vadd.f32 %v2472_v1, %v2278_v36  ;;  %2532 = vrot.lane.b32.xlu0 %v5621_v41, %s4063_s22 }
 0x282   : > { %v2492_v26 = vmul.f32 %v5559_v17, %v2481_v0 }
 0x284   : > { %v2503_v15 = vadd.f32 %v5564_v48, %v2492_v26 }
 0x286   : > { %v5627_v30 = vmax.f32 %v2503_v15, 0.0 }
 0x288   : > { %2534 = vrot.lane.b32.xlu1 %v5627_v30, %s4063_s22 }
 0x2c2   : > { %v2521_v61 = vpop.permute.xlu0 %2520 }
 0x2c3   : > { %vm2544_vm4 = vcmp.gt.f32.partialorder %v5568_v28, %v2521_v61 }
 0x2c4   : > { %v2560_v45 = vsel %vm2544_vm4, 1, %v4064_v23  ;;  %v2552_v51 = vsel %vm2544_vm4, %v5568_v28, %v2521_v61 }
 0x2c5   : > { %2616 = vrot.lane.b32.xlu1 %v2560_v45, %s4063_s22  ;;  %2576 = vrot.lane.b32.xlu2 %v2552_v51, %s4063_s22 }
 0x2ca   : > { %v2523_v44 = vpop.permute.xlu0 %2522  ;;  %v2529_v57 = vpop.permute.xlu2 %2528 }
 0x2cb   : > { %vm2545_vm5 = vcmp.gt.f32.partialorder %v5574_v6, %v2523_v44  ;;  %vm2548_vm7 = vcmp.gt.f32.partialorder %v5603_v27, %v2529_v57 }
 0x2cc   : > { %v2561_v17 = vsel %vm2545_vm5, 1, %v4064_v23  ;;  %v2553_v48 = vsel %vm2545_vm5, %v5574_v6, %v2523_v44  ;;  %v2556_v60 = vsel %vm2548_vm7, %v5603_v27, %v2529_v57  ;;  %v2564_v34 = vsel %vm2548_vm7, 1, %v4064_v23 }
 0x2cd   : > { %2618 = vrot.lane.b32.xlu2 %v2561_v17, %s4063_s22  ;;  %2578 = vrot.lane.b32.xlu0 %v2553_v48, %s4063_s22 }
 0x2d2   : > { %v2525_v58 = vpop.permute.xlu1 %2524  ;;  %v2531_v47 = vpop.permute.xlu2 %2530 }
 0x2d3   : > { %vm2546_vm6 = vcmp.gt.f32.partialorder %v5583_v25, %v2525_v58  ;;  %vm2549_vm9 = vcmp.gt.f32.partialorder %v5613_v43, %v2531_v47 }
 0x2d4   : > { %v2554_v38 = vsel %vm2546_vm6, %v5583_v25, %v2525_v58  ;;  %v2562_v11 = vsel %vm2546_vm6, 1, %v4064_v23  ;;  %v2557_v39 = vsel %vm2549_vm9, %v5613_v43, %v2531_v47  ;;  %v2565_v62 = vsel %vm2549_vm9, 1, %v4064_v23 }
 0x2d5   : > { %2580 = vrot.lane.b32.xlu1 %v2554_v38, %s4063_s22  ;;  %2620 = vrot.lane.b32.xlu0 %v2562_v11, %s4063_s22 }
 0x2da   : > { %v2527_v54 = vpop.permute.xlu1 %2526 }
 0x2db   : > { %vm2547_vm8 = vcmp.gt.f32.partialorder %v5593_v55, %v2527_v54 }
 0x2dc   : > { %v2563_v13 = vsel %vm2547_vm8, 1, %v4064_v23  ;;  %v2555_v49 = vsel %vm2547_vm8, %v5593_v55, %v2527_v54 }
 0x2dd   : > { %2622 = vrot.lane.b32.xlu1 %v2563_v13, %s4063_s22  ;;  %2582 = vrot.lane.b32.xlu2 %v2555_v49, %s4063_s22 }
 0x2de   : > { %2584 = vrot.lane.b32.xlu0 %v2556_v60, %s4063_s22 }
 0x2e5   : > { %2586 = vrot.lane.b32.xlu1 %v2557_v39, %s4063_s22  ;;  %2624 = vrot.lane.b32.xlu2 %v2564_v34, %s4063_s22 }
 0x2e6   : > { %2626 = vrot.lane.b32.xlu0 %v2565_v62, %s4063_s22 }
 0x2f2   : > { %v2533_v19 = vpop.permute.xlu0 %2532 }
 0x2f3   : > { %vm2550_vm10 = vcmp.gt.f32.partialorder %v5621_v41, %v2533_v19 }
 0x2f4   : > { %v2566_v16 = vsel %vm2550_vm10, 1, %v4064_v23  ;;  %v2558_v9 = vsel %vm2550_vm10, %v5621_v41, %v2533_v19 }
 0x2f5   : > { %2628 = vrot.lane.b32.xlu1 %v2566_v16, %s4063_s22  ;;  %2588 = vrot.lane.b32.xlu2 %v2558_v9, %s4063_s22 }
 0x2fa   : > { %v2535_v20 = vpop.permute.xlu1 %2534 }
 0x2fb   : > { %vm2551_vm11 = vcmp.gt.f32.partialorder %v5627_v30, %v2535_v20 }
 0x2fc   : > { %v2559_v32 = vsel %vm2551_vm11, %v5627_v30, %v2535_v20  ;;  %v2567_v4 = vsel %vm2551_vm11, 1, %v4064_v23 }
 0x2fd   : > { %2590 = vrot.lane.b32.xlu0 %v2559_v32, %s4063_s22  ;;  %2630 = vrot.lane.b32.xlu2 %v2567_v4, %s4063_s22 }
 0x31f   : > { %v2577_v5 = vpop.permute.xlu2 %2576 }
 0x320   : > { %vm2600_vm12 = vcmp.gt.f32.partialorder %v5568_v28, %v2577_v5 }
 0x321   : > { %v2608_v31 = vsel %vm2600_vm12, %v5568_v28, %v2577_v5 }
 0x322   : > { %2648 = vrot.lane.b32.xlu0 %v2608_v31, %s4063_s22 }
 0x327   : > { %v2619_v53 = vpop.permute.xlu2 %2618 }
 0x337   : > { %v2617_v10 = vpop.permute.xlu1 %2616  ;;  %v2583_v12 = vpop.permute.xlu2 %2582 }
 0x338   : > { %v2632_v42 = vsel %vm2600_vm12, 2, %v2617_v10  ;;  %vm2603_vm14 = vcmp.gt.f32.partialorder %v5593_v55, %v2583_v12  ;;  %vm2744_vm12 = vcmask 261120  }
 0x339   : > { %2688 = vrot.lane.b32.xlu2 %v2632_v42, %s4063_s22  ;;  %v2611_v50 = vsel %vm2603_vm14, %v5593_v55, %v2583_v12 }
 0x33f   : > { %v2579_v35 = vpop.permute.xlu0 %2578  ;;  %v2625_v56 = vpop.permute.xlu2 %2624 }
 0x340   : > { %vm2601_vm13 = vcmp.gt.f32.partialorder %v5574_v6, %v2579_v35 }
 0x341   : > { %v2633_v3 = vsel %vm2601_vm13, 2, %v2619_v53  ;;  %v2609_v22 = vsel %vm2601_vm13, %v5574_v6, %v2579_v35 }
 0x342   : > { %2690 = vrot.lane.b32.xlu0 %v2633_v3, %s4063_s22  ;;  %2650 = vrot.lane.b32.xlu1 %v2609_v22, %s4063_s22 }
 0x347   : > { %v2581_v21 = vpop.permute.xlu1 %2580  ;;  %v2621_v7 = vpop.permute.xlu0 %2620 }
 0x348   : > { %vm2602_vm15 = vcmp.gt.f32.partialorder %v5583_v25, %v2581_v21 }
 0x349   : > { %v2634_v40 = vsel %vm2602_vm15, 2, %v2621_v7  ;;  %v2610_v37 = vsel %vm2602_vm15, %v5583_v25, %v2581_v21 }
 0x34a   : > { %2652 = vrot.lane.b32.xlu2 %v2610_v37, %s4063_s22  ;;  %2654 = vrot.lane.b32.xlu0 %v2611_v50, %s4063_s22 }
 0x34b   : > { %2692 = vrot.lane.b32.xlu1 %v2634_v40, %s4063_s22 }
 0x34f   : > { %v2623_v46 = vpop.permute.xlu1 %2622  ;;  %v2589_v8 = vpop.permute.xlu2 %2588 }
 0x350   : > { %v2635_v18 = vsel %vm2603_vm14, 2, %v2623_v46  ;;  %v2585_v24 = vpop.permute.xlu0 %2584  ;;  %vm2606_vm1 = vcmp.gt.f32.partialorder %v5621_v41, %v2589_v8 }
 0x351   : > { %vm2604_vm0 = vcmp.gt.f32.partialorder %v5603_v27, %v2585_v24  ;;  %v2614_v2 = vsel %vm2606_vm1, %v5621_v41, %v2589_v8 }
 0x352   : > { %2694 = vrot.lane.b32.xlu2 %v2635_v18, %s4063_s22  ;;  %v2636_v29 = vsel %vm2604_vm0, 2, %v2625_v56  ;;  %v2612_v63 = vsel %vm2604_vm0, %v5603_v27, %v2585_v24 }
 0x353   : > { %2696 = vrot.lane.b32.xlu0 %v2636_v29, %s4063_s22  ;;  %2656 = vrot.lane.b32.xlu1 %v2612_v63, %s4063_s22 }
 0x357   : > { %v2587_v14 = vpop.permute.xlu1 %2586  ;;  %v2631_v26 = vpop.permute.xlu2 %2630 }
 0x358   : > { %vm2605_vm2 = vcmp.gt.f32.partialorder %v5613_v43, %v2587_v14  ;;  %v2627_v52 = vpop.permute.xlu0 %2626 }
 0x359   : > { %v2637_v33 = vsel %vm2605_vm2, 2, %v2627_v52  ;;  %v2613_v59 = vsel %vm2605_vm2, %v5613_v43, %v2587_v14 }
 0x35a   : > { %2658 = vrot.lane.b32.xlu2 %v2613_v59, %s4063_s22 }
 0x35b   : > { %2660 = vrot.lane.b32.xlu0 %v2614_v2, %s4063_s22  ;;  %2698 = vrot.lane.b32.xlu1 %v2637_v33, %s4063_s22 }
 0x367   : > { %v2629_v36 = vpop.permute.xlu1 %2628 }
 0x368   : > { %v2638_v1 = vsel %vm2606_vm1, 2, %v2629_v36 }
 0x369   : > { %2700 = vrot.lane.b32.xlu2 %v2638_v1, %s4063_s22 }
 0x36f   : > { %v2591_v0 = vpop.permute.xlu0 %2590 }
 0x370   : > { %vm2607_vm3 = vcmp.gt.f32.partialorder %v5627_v30, %v2591_v0 }
 0x371   : > { %v2639_v15 = vsel %vm2607_vm3, 2, %v2631_v26  ;;  %v2615_v61 = vsel %vm2607_vm3, %v5627_v30, %v2591_v0 }
 0x372   : > { %2702 = vrot.lane.b32.xlu0 %v2639_v15, %s4063_s22  ;;  %2662 = vrot.lane.b32.xlu1 %v2615_v61, %s4063_s22 }
 0x393   : > { %v2689_v45 = vpop.permute.xlu2 %2688 }
 0x394   : > { %v2649_v23 = vpop.permute.xlu0 %2648 }
 0x395   : > { %vm2672_vm4 = vcmp.gt.f32.partialorder %v5568_v28, %v2649_v23 }
 0x396   : > { %v2704_v51 = vsel %vm2672_vm4, 3, %v2689_v45  ;;  %v2680_v44 = vsel %vm2672_vm4, %v5568_v28, %v2649_v23 }
 0x397   : > { %2753 = vrot.lane.b32.xlu0 %v2704_v51, %s4063_s22  ;;  %2720 = vrot.lane.b32.xlu1 %v2680_v44, %s4063_s22 }
 0x3a4   : > { %v2653_v17 = vpop.permute.xlu2 %2652 }
 0x3a5   : > { %vm2674_vm5 = vcmp.gt.f32.partialorder %v5583_v25, %v2653_v17 }
 0x3a6   : > { %v2682_v48 = vsel %vm2674_vm5, %v5583_v25, %v2653_v17 }
 0x3a7   : > { %2724 = vrot.lane.b32.xlu0 %v2682_v48, %s4063_s22 }
 0x3ac   : > { %v2695_v54 = vpop.permute.xlu2 %2694 }
 0x3b4   : > { %v2651_v58 = vpop.permute.xlu1 %2650  ;;  %v2691_v57 = vpop.permute.xlu0 %2690 }
 0x3b5   : > { %vm2673_vm6 = vcmp.gt.f32.partialorder %v5574_v6, %v2651_v58 }
 0x3b6   : > { %v2705_v38 = vsel %vm2673_vm6, 3, %v2691_v57  ;;  %v2681_v11 = vsel %vm2673_vm6, %v5574_v6, %v2651_v58  ;;  %v2659_v6 = vpop.permute.xlu2 %2658 }
 0x3b7   : > { %2722 = vrot.lane.b32.xlu2 %v2681_v11, %s4063_s22  ;;  %2755 = vrot.lane.b32.xlu1 %v2705_v38, %s4063_s22  ;;  %vm2677_vm8 = vcmp.gt.f32.partialorder %v5613_v43, %v2659_v6 }
 0x3b8   : > { %v2685_v19 = vsel %vm2677_vm8, %v5613_v43, %v2659_v6 }
 0x3bc   : > { %v2655_v13 = vpop.permute.xlu0 %2654 }
 0x3bd   : > { %v2693_v28 = vpop.permute.xlu1 %2692  ;;  %vm2675_vm7 = vcmp.gt.f32.partialorder %v5593_v55, %v2655_v13 }
 0x3be   : > { %v2706_v49 = vsel %vm2674_vm5, 3, %v2693_v28  ;;  %v2707_v25 = vsel %vm2675_vm7, 3, %v2695_v54  ;;  %v2683_v60 = vsel %vm2675_vm7, %v5593_v55, %v2655_v13 }
 0x3bf   : > { %2757 = vrot.lane.b32.xlu2 %v2706_v49, %s4063_s22  ;;  %2759 = vrot.lane.b32.xlu0 %v2707_v25, %s4063_s22 }
 0x3c0   : > { %2726 = vrot.lane.b32.xlu1 %v2683_v60, %s4063_s22 }
 0x3c3   : > { %v2701_v16 = vpop.permute.xlu2 %2700 }
 0x3c5   : > { %v2657_v47 = vpop.permute.xlu1 %2656  ;;  %v2697_v39 = vpop.permute.xlu0 %2696 }
 0x3c6   : > { %vm2676_vm9 = vcmp.gt.f32.partialorder %v5603_v27, %v2657_v47 }
 0x3c7   : > { %v2708_v34 = vsel %vm2676_vm9, 3, %v2697_v39  ;;  %v2684_v62 = vsel %vm2676_vm9, %v5603_v27, %v2657_v47  ;;  %2730 = vrot.lane.b32.xlu0 %v2685_v19, %s4063_s22 }
 0x3c8   : > { %2728 = vrot.lane.b32.xlu2 %v2684_v62, %s4063_s22  ;;  %2761 = vrot.lane.b32.xlu1 %v2708_v34, %s4063_s22 }
 0x3cd   : > { %v2661_v55 = vpop.permute.xlu0 %2660  ;;  %v2699_v27 = vpop.permute.xlu1 %2698 }
 0x3ce   : > { %vm2678_vm10 = vcmp.gt.f32.partialorder %v5621_v41, %v2661_v55  ;;  %v2709_v10 = vsel %vm2677_vm8, 3, %v2699_v27 }
 0x3cf   : > { %v2710_v9 = vsel %vm2678_vm10, 3, %v2701_v16  ;;  %v2686_v20 = vsel %vm2678_vm10, %v5621_v41, %v2661_v55 }
 0x3d0   : > { %2765 = vrot.lane.b32.xlu0 %v2710_v9, %s4063_s22  ;;  %2732 = vrot.lane.b32.xlu1 %v2686_v20, %s4063_s22 }
 0x3e4   : > { %v2663_v32 = vpop.permute.xlu1 %2662  ;;  %v2703_v4 = vpop.permute.xlu0 %2702 }
 0x3e5   : > { %vm2679_vm11 = vcmp.gt.f32.partialorder %v5627_v30, %v2663_v32 }
 0x3e6   : > { %v2711_v5 = vsel %vm2679_vm11, 3, %v2703_v4  ;;  %v2687_v31 = vsel %vm2679_vm11, %v5627_v30, %v2663_v32 }
 0x3e7   : > { %2734 = vrot.lane.b32.xlu2 %v2687_v31, %s4063_s22  ;;  %2767 = vrot.lane.b32.xlu1 %v2711_v5, %s4063_s22 }
 0x3ef   : > { %2763 = vrot.lane.b32.xlu2 %v2709_v10, %s4063_s22 }
 0x409   : > { %v2721_v43 = vpop.permute.xlu1 %2720  ;;  %v2754_v41 = vpop.permute.xlu0 %2753 }
 0x40a   : > { %2745 = vst.msk [vmem:[%s5735_s10] sm:$0xff] %vm2744_vm12, %v2721_v43 }
 0x40b   : > { %2769 = vst.msk [vmem:[%s5740_s13] sm:$0xff] %vm2744_vm12, %v2754_v41 }
 0x411   : > { %v2723_v30 = vpop.permute.xlu2 %2722 }
 0x412   : > { %2746 = vst.msk [vmem:[%s5735_s10 + $0x8] sm:$0xff] %vm2744_vm12, %v2723_v30 }
 0x419   : > { %v2758_v42 = vpop.permute.xlu2 %2757  ;;  %v2725_v53 = vpop.permute.xlu0 %2724 }
 0x41a   : > { %2771 = vst.msk [vmem:[%s5740_s13 + $0x10] sm:$0xff] %vm2744_vm12, %v2758_v42 }
 0x41b   : > { %2747 = vst.msk [vmem:[%s5735_s10 + $0x10] sm:$0xff] %vm2744_vm12, %v2725_v53 }
 0x422   : > { %v2729_v35 = vpop.permute.xlu2 %2728 }
 0x423   : > { %2749 = vst.msk [vmem:[%s5735_s10 + $0x20] sm:$0xff] %vm2744_vm12, %v2729_v35 }
 0x429   : > { %v2756_v3 = vpop.permute.xlu1 %2755 }
 0x42a   : > { %2770 = vst.msk [vmem:[%s5740_s13 + $0x8] sm:$0xff] %vm2744_vm12, %v2756_v3 }
 0x431   : > { %v2760_v12 = vpop.permute.xlu0 %2759 }
 0x432   : > { %v2727_v22 = vpop.permute.xlu1 %2726  ;;  %2772 = vst.msk [vmem:[%s5740_s13 + $0x18] sm:$0xff] %vm2744_vm12, %v2760_v12 }
 0x433   : > { %2748 = vst.msk [vmem:[%s5735_s10 + $0x18] sm:$0xff] %vm2744_vm12, %v2727_v22 }
 0x439   : > { %v2731_v21 = vpop.permute.xlu0 %2730 }
 0x43a   : > { %v2762_v7 = vpop.permute.xlu1 %2761  ;;  %2750 = vst.msk [vmem:[%s5735_s10 + $0x28] sm:$0xff] %vm2744_vm12, %v2731_v21 }
 0x43b   : > { %2773 = vst.msk [vmem:[%s5740_s13 + $0x20] sm:$0xff] %vm2744_vm12, %v2762_v7 }
 0x441   : > { %v2735_v40 = vpop.permute.xlu2 %2734 }
 0x442   : > { %2752 = vst.msk [vmem:[%s5735_s10 + $0x38] sm:$0xff] %vm2744_vm12, %v2735_v40  ;;  %v2766_v37 = vpop.permute.xlu0 %2765  ;;  %v2733_v50 = vpop.permute.xlu1 %2732 }
 0x443   : > { %2775 = vst.msk [vmem:[%s5740_s13 + $0x30] sm:$0xff] %vm2744_vm12, %v2766_v37 }
 0x444   : > { %2751 = vst.msk [vmem:[%s5735_s10 + $0x30] sm:$0xff] %vm2744_vm12, %v2733_v50 }
 0x449   : > { %v2764_v56 = vpop.permute.xlu2 %2763 }
 0x44a   : > { %2774 = vst.msk [vmem:[%s5740_s13 + $0x28] sm:$0xff] %vm2744_vm12, %v2764_v56 }
 0x459   : > { %v2768_v46 = vpop.permute.xlu1 %2767 }
 0x45a   : > { %2776 = vst.msk [vmem:[%s5740_s13 + $0x38] sm:$0xff] %vm2744_vm12, %v2768_v46 }
 0x45b PF: > { %s19_s27 = sadd.s32 1, %s4060_s27  }
 0x45c   : > { %p16_p4 = scmp.ge.s32.totalorder %s19_s27, 4  }
 0x45e   :  { %18 = sbr.rel (!%p16_p4) target bundleno = 1 (0x1), region = 96 }

// kernel: _lambda_.5
= control target key start
LH: loop header
LB: loop body
LE: loop exit
PB: predicated region body
PF: predicated region fallthrough
CT: control target
= control target key end

     0   :  { %s2395_s1 = inlined_call_operand.vmem [shape: bf16[2048,128], index: 1, kind: input, shape index: {}]   ;;  %s2396_s0 = inlined_call_operand.vmem [shape: f32[2,2048], index: 0, kind: input, shape index: {}]   ;;  %s2397_s2 = inlined_call_operand.vmem [shape: f32[1,128], index: 2, kind: input, shape index: {}]   ;;  %s2398_s3 = inlined_call_operand.vmem [shape: f32[2,128], index: 3, kind: output, shape index: {}]  }
   0x1   :  { %v1835_v0 = vld [vmem:[%s2395_s1 + $0x38] sm:$0xff]  ;;  %v1834_v4 = vld [vmem:[%s2395_s1 + $0x30] sm:$0xff]  ;;  %v1833_v8 = vld [vmem:[%s2395_s1 + $0x28] sm:$0xff] }
   0x2   :  { %v1843_v1 = vld [vmem:[%s2395_s1 + $0x78] sm:$0xff]  ;;  %1103 = vmatpush.bf16.msra.mxu0 %v1835_v0  ;;  %v1842_v5 = vld [vmem:[%s2395_s1 + $0x70] sm:$0xff]  ;;  %v1841_v9 = vld [vmem:[%s2395_s1 + $0x68] sm:$0xff] }
   0x3   :  { %v1851_v2 = vld [vmem:[%s2395_s1 + $0xb8] sm:$0xff]  ;;  %1116 = vmatpush.bf16.msra.mxu1 %v1843_v1  ;;  %v1850_v6 = vld [vmem:[%s2395_s1 + $0xb0] sm:$0xff]  ;;  %v1849_v10 = vld [vmem:[%s2395_s1 + $0xa8] sm:$0xff] }
   0x4   :  { %v1859_v3 = vld [vmem:[%s2395_s1 + $0xf8] sm:$0xff]  ;;  %1129 = vmatpush.bf16.msra.mxu2 %v1851_v2  ;;  %v1858_v7 = vld [vmem:[%s2395_s1 + $0xf0] sm:$0xff]  ;;  %v1857_v11 = vld [vmem:[%s2395_s1 + $0xe8] sm:$0xff] }
   0x5   :  { %1142 = vmatpush.bf16.msra.mxu3 %v1859_v3  ;;  %v1832_v12 = vld [vmem:[%s2395_s1 + $0x20] sm:$0xff]  ;;  %v1831_v16 = vld [vmem:[%s2395_s1 + $0x18] sm:$0xff]  ;;  %v1830_v21 = vld [vmem:[%s2395_s1 + $0x10] sm:$0xff] }
   0x6   :  { %1104 = vmatpush.bf16.msra.mxu0 %v1834_v4  ;;  %v1840_v13 = vld [vmem:[%s2395_s1 + $0x60] sm:$0xff]  ;;  %v1839_v17 = vld [vmem:[%s2395_s1 + $0x58] sm:$0xff]  ;;  %v1838_v22 = vld [vmem:[%s2395_s1 + $0x50] sm:$0xff] }
   0x7   :  { %1117 = vmatpush.bf16.msra.mxu1 %v1842_v5  ;;  %v1848_v14 = vld [vmem:[%s2395_s1 + $0xa0] sm:$0xff]  ;;  %v1847_v18 = vld [vmem:[%s2395_s1 + $0x98] sm:$0xff]  ;;  %v1846_v23 = vld [vmem:[%s2395_s1 + $0x90] sm:$0xff] }
   0x8   :  { %1130 = vmatpush.bf16.msra.mxu2 %v1850_v6  ;;  %v1856_v15 = vld [vmem:[%s2395_s1 + $0xe0] sm:$0xff]  ;;  %v1855_v19 = vld [vmem:[%s2395_s1 + $0xd8] sm:$0xff]  ;;  %v1854_v24 = vld [vmem:[%s2395_s1 + $0xd0] sm:$0xff] }
   0x9   :  { %1143 = vmatpush.bf16.msra.mxu3 %v1858_v7  ;;  %v14_v20 = vld [vmem:[%s2396_s0] sm:$0xff]  ;;  %v1829_v25 = vld [vmem:[%s2395_s1 + $0x8] sm:$0xff]  ;;  %v16_v31 = vld [vmem:[%s2396_s0 + $0x10] sm:$0xff] }
   0xa   :  { %1105 = vmatpush.bf16.msra.mxu0 %v1833_v8  ;;  %22 = vst [vmem:[#allocation1] ss:$4 sm:$0xff] %v14_v20  ;;  %v1837_v26 = vld [vmem:[%s2395_s1 + $0x48] sm:$0xff]  ;;  %v1828_v29 = vld [vmem:[%s2395_s1] sm:$0xff]  ;;  %v1867_v38 = vld [vmem:[%s2395_s1 + $0x138] sm:$0xff] }
   0xb   :  { %1118 = vmatpush.bf16.msra.mxu1 %v1841_v9  ;;  %v1845_v27 = vld [vmem:[%s2395_s1 + $0x88] sm:$0xff]  ;;  %v1836_v30 = vld [vmem:[%s2395_s1 + $0x40] sm:$0xff]  ;;  %v1875_v39 = vld [vmem:[%s2395_s1 + $0x178] sm:$0xff] }
   0xc   :  { %1131 = vmatpush.bf16.msra.mxu2 %v1849_v10  ;;  %v1853_v28 = vld [vmem:[%s2395_s1 + $0xc8] sm:$0xff]  ;;  %v1844_v36 = vld [vmem:[%s2395_s1 + $0x80] sm:$0xff]  ;;  %v1883_v40 = vld [vmem:[%s2395_s1 + $0x1b8] sm:$0xff] }
   0xd   :  { %1144 = vmatpush.bf16.msra.mxu3 %v1857_v11  ;;  %v1852_v37 = vld [vmem:[%s2395_s1 + $0xc0] sm:$0xff]  ;;  %v1891_v41 = vld [vmem:[%s2395_s1 + $0x1f8] sm:$0xff]  ;;  %v15_v42 = vld [vmem:[%s2396_s0 + $0x8] sm:$0xff] }
   0xe   :  { %1106 = vmatpush.bf16.msra.mxu0 %v1832_v12  ;;  %24 = vst [vmem:[#allocation1 + $0x20] ss:$4 sm:$0xff] %v15_v42  ;;  %v1866_v47 = vld [vmem:[%s2395_s1 + $0x130] sm:$0xff]  ;;  %v1865_v51 = vld [vmem:[%s2395_s1 + $0x128] sm:$0xff]  ;;  %v17_v58 = vld [vmem:[%s2396_s0 + $0x18] sm:$0xff] }
   0xf   :  { %1119 = vmatpush.bf16.msra.mxu1 %v1840_v13  ;;  %v1874_v48 = vld [vmem:[%s2395_s1 + $0x170] sm:$0xff]  ;;  %v1873_v52 = vld [vmem:[%s2395_s1 + $0x168] sm:$0xff]  ;;  %v1864_v60 = vld [vmem:[%s2395_s1 + $0x120] sm:$0xff] }
  0x10   :  { %1132 = vmatpush.bf16.msra.mxu2 %v1848_v14  ;;  %v1882_v49 = vld [vmem:[%s2395_s1 + $0x1b0] sm:$0xff]  ;;  %v1881_v53 = vld [vmem:[%s2395_s1 + $0x1a8] sm:$0xff]  ;;  %v1872_v61 = vld [vmem:[%s2395_s1 + $0x160] sm:$0xff] }
  0x11   :  { %1145 = vmatpush.bf16.msra.mxu3 %v1856_v15  ;;  %v27_v32 = vld.sshfl [vmem:[#allocation1 + $0x10] sm:$0xff pattern:$0x73625140]  ;;  %v25_v33 = vld.sshfl [vmem:[#allocation1] sm:$0xff pattern:$0x73625140] }
  0x12   :  { %1107 = vmatpush.bf16.msra.mxu0 %v1831_v16  ;;  %v28_v34 = vld.sshfl [vmem:[#allocation1 + $0x18] sm:$0xff pattern:$0x73625140]  ;;  %v26_v35 = vld.sshfl [vmem:[#allocation1 + $0x8] sm:$0xff pattern:$0x73625140]  ;;  %v61_v43 = vpack.c.bf16 %v27_v32, %v27_v32  ;;  %v59_v44 = vpack.c.bf16 %v25_v33, %v25_v33 }
  0x13   :  { %1120 = vmatpush.bf16.msra.mxu1 %v1839_v17  ;;  %33 = vst [vmem:[#allocation1] ss:$4 sm:$0xff] %v16_v31  ;;  %v62_v45 = vpack.c.bf16 %v28_v34, %v28_v34  ;;  %v60_v46 = vpack.c.bf16 %v26_v35, %v26_v35  ;;  %v1890_v50 = vld [vmem:[%s2395_s1 + $0x1f0] sm:$0xff]  ;;  %v1889_v54 = vld [vmem:[%s2395_s1 + $0x1e8] sm:$0xff]  ;;  %v1880_v62 = vld [vmem:[%s2395_s1 + $0x1a0] sm:$0xff] }
  0x14   :  { %1133 = vmatpush.bf16.msra.mxu2 %v1847_v18  ;;  %v1888_v63 = vld [vmem:[%s2395_s1 + $0x1e0] sm:$0xff]  ;;  %v1863_v0 = vld [vmem:[%s2395_s1 + $0x118] sm:$0xff]  ;;  %v1862_v4 = vld [vmem:[%s2395_s1 + $0x110] sm:$0xff] }
  0x15   :  { %1146 = vmatpush.bf16.msra.mxu3 %v1855_v19  ;;  %v2118_v55 = vld.sshfl [vmem:[#allocation1 + $0x30] sm:$0xff pattern:$0x73625140]  ;;  %v2120_v56 = vld.sshfl [vmem:[#allocation1 + $0x20] sm:$0xff pattern:$0x73625140] }
  0x16   :  { %1108 = vmatpush.bf16.msra.mxu0 %v1830_v21  ;;  %v2122_v57 = vld.sshfl [vmem:[#allocation1 + $0x38] sm:$0xff pattern:$0x73625140]  ;;  %v2127_v59 = vld.sshfl [vmem:[#allocation1 + $0x28] sm:$0xff pattern:$0x73625140]  ;;  %v65_v20 = vpack.c.bf16 %v2118_v55, %v2118_v55  ;;  %v63_v21 = vpack.c.bf16 %v2120_v56, %v2120_v56 }
  0x17   :  { %1121 = vmatpush.bf16.msra.mxu1 %v1838_v22  ;;  %34 = vst [vmem:[#allocation1 + $0x20] ss:$4 sm:$0xff] %v17_v58  ;;  %v1871_v1 = vld [vmem:[%s2395_s1 + $0x158] sm:$0xff]  ;;  %v1870_v5 = vld [vmem:[%s2395_s1 + $0x150] sm:$0xff]  ;;  %v1861_v8 = vld [vmem:[%s2395_s1 + $0x108] sm:$0xff]  ;;  %v66_v22 = vpack.c.bf16 %v2122_v57, %v2122_v57 }
  0x18   :  { %1134 = vmatpush.bf16.msra.mxu2 %v1846_v23  ;;  %v1879_v2 = vld [vmem:[%s2395_s1 + $0x198] sm:$0xff]  ;;  %v1878_v6 = vld [vmem:[%s2395_s1 + $0x190] sm:$0xff]  ;;  %v1869_v9 = vld [vmem:[%s2395_s1 + $0x148] sm:$0xff]  ;;  %v64_v23 = vpack.c.bf16 %v2127_v59, %v2127_v59 }
  0x19   :  { %1147 = vmatpush.bf16.msra.mxu3 %v1854_v24  ;;  %v1887_v3 = vld [vmem:[%s2395_s1 + $0x1d8] sm:$0xff]  ;;  %v1886_v7 = vld [vmem:[%s2395_s1 + $0x1d0] sm:$0xff]  ;;  %v1877_v10 = vld [vmem:[%s2395_s1 + $0x188] sm:$0xff] }
  0x1a   :  { %1109 = vmatpush.bf16.msra.mxu0 %v1829_v25  ;;  %v1885_v11 = vld [vmem:[%s2395_s1 + $0x1c8] sm:$0xff]  ;;  %v1860_v12 = vld [vmem:[%s2395_s1 + $0x100] sm:$0xff]  ;;  %v1899_v16 = vld [vmem:[%s2395_s1 + $0x238] sm:$0xff] }
  0x1b   :  { %1122 = vmatpush.bf16.msra.mxu1 %v1837_v26  ;;  %v1868_v13 = vld [vmem:[%s2395_s1 + $0x140] sm:$0xff]  ;;  %v1907_v17 = vld [vmem:[%s2395_s1 + $0x278] sm:$0xff]  ;;  %v1898_v24 = vld [vmem:[%s2395_s1 + $0x230] sm:$0xff] }
  0x1c   :  { %1135 = vmatpush.bf16.msra.mxu2 %v1845_v27  ;;  %v1876_v14 = vld [vmem:[%s2395_s1 + $0x180] sm:$0xff]  ;;  %v1915_v18 = vld [vmem:[%s2395_s1 + $0x2b8] sm:$0xff]  ;;  %v1906_v25 = vld [vmem:[%s2395_s1 + $0x270] sm:$0xff] }
  0x1d   :  { %1148 = vmatpush.bf16.msra.mxu3 %v1853_v28  ;;  %v1884_v15 = vld [vmem:[%s2395_s1 + $0x1c0] sm:$0xff]  ;;  %v1923_v19 = vld [vmem:[%s2395_s1 + $0x2f8] sm:$0xff]  ;;  %v1914_v26 = vld [vmem:[%s2395_s1 + $0x2b0] sm:$0xff] }
  0x1e   :  { %1110 = vmatpush.bf16.msra.mxu0 %v1828_v29  ;;  %v1922_v27 = vld [vmem:[%s2395_s1 + $0x2f0] sm:$0xff]  ;;  %v1897_v28 = vld [vmem:[%s2395_s1 + $0x228] sm:$0xff]  ;;  %v1896_v32 = vld [vmem:[%s2395_s1 + $0x220] sm:$0xff] }
  0x1f   :  { %1123 = vmatpush.bf16.msra.mxu1 %v1836_v30  ;;  %v1905_v29 = vld [vmem:[%s2395_s1 + $0x268] sm:$0xff]  ;;  %v1904_v33 = vld [vmem:[%s2395_s1 + $0x260] sm:$0xff]  ;;  %v1910_v42 = vld [vmem:[%s2395_s1 + $0x290] sm:$0xff] }
  0x20   :  { %1136 = vmatpush.bf16.msra.mxu2 %v1844_v36  ;;  %v1913_v30 = vld [vmem:[%s2395_s1 + $0x2a8] sm:$0xff]  ;;  %v1912_v34 = vld [vmem:[%s2395_s1 + $0x2a0] sm:$0xff]  ;;  %v1895_v36 = vld [vmem:[%s2395_s1 + $0x218] sm:$0xff] }
  0x21   :  { %1149 = vmatpush.bf16.msra.mxu3 %v1852_v37  ;;  %1111 = vmatmul.bf16.vlgmr.msra.gmra.mxu0 %v59_v44  ;;  %v1921_v31 = vld [vmem:[%s2395_s1 + $0x2e8] sm:$0xff]  ;;  %v1920_v35 = vld [vmem:[%s2395_s1 + $0x2e0] sm:$0xff]  ;;  %v1903_v37 = vld [vmem:[%s2395_s1 + $0x258] sm:$0xff] }
  0x22   :  { %1155 = vmatpush.bf16.msrb.mxu0 %v1867_v38  ;;  %1124 = vmatmul.bf16.vlgmr.msra.gmra.mxu1 %v60_v46  ;;  %v1911_v38 = vld [vmem:[%s2395_s1 + $0x298] sm:$0xff]  ;;  %v1893_v44 = vld [vmem:[%s2395_s1 + $0x208] sm:$0xff]  ;;  %v37_v55 = vld.sshfl [vmem:[#allocation1 + $0x10] sm:$0xff pattern:$0x73625140] }
  0x23   :  { %1168 = vmatpush.bf16.msrb.mxu1 %v1875_v39  ;;  %1137 = vmatmul.bf16.vlgmr.msra.gmra.mxu2 %v61_v43  ;;  %v1919_v39 = vld [vmem:[%s2395_s1 + $0x2d8] sm:$0xff]  ;;  %v1918_v43 = vld [vmem:[%s2395_s1 + $0x2d0] sm:$0xff]  ;;  %v1909_v46 = vld [vmem:[%s2395_s1 + $0x288] sm:$0xff] }
  0x24   :  { %1181 = vmatpush.bf16.msrb.mxu2 %v1883_v40  ;;  %1150 = vmatmul.bf16.vlgmr.msra.gmra.mxu3 %v62_v45  ;;  %v1894_v40 = vld [vmem:[%s2395_s1 + $0x210] sm:$0xff]  ;;  %v1901_v45 = vld [vmem:[%s2395_s1 + $0x248] sm:$0xff]  ;;  %v38_v57 = vld.sshfl [vmem:[#allocation1 + $0x18] sm:$0xff pattern:$0x73625140] }
  0x25   :  { %1194 = vmatpush.bf16.msrb.mxu3 %v1891_v41  ;;  %v1902_v41 = vld [vmem:[%s2395_s1 + $0x250] sm:$0xff]  ;;  %v36_v56 = vld.sshfl [vmem:[#allocation1 + $0x8] sm:$0xff pattern:$0x73625140]  ;;  %v1947_v58 = vld [vmem:[%s2395_s1 + $0x3b8] sm:$0xff] }
  0x26   :  { %1156 = vmatpush.bf16.msrb.mxu0 %v1866_v47  ;;  %v1917_v47 = vld [vmem:[%s2395_s1 + $0x2c8] sm:$0xff]  ;;  %v1955_v59 = vld [vmem:[%s2395_s1 + $0x3f8] sm:$0xff] }
  0x27   :  { %1169 = vmatpush.bf16.msrb.mxu1 %v1874_v48  ;;  %v1892_v48 = vld [vmem:[%s2395_s1 + $0x200] sm:$0xff] }
  0x28   :  { %1182 = vmatpush.bf16.msrb.mxu2 %v1882_v49  ;;  %v1900_v49 = vld [vmem:[%s2395_s1 + $0x240] sm:$0xff] }
  0x29   :  { %1195 = vmatpush.bf16.msrb.mxu3 %v1890_v50  ;;  %v1908_v50 = vld [vmem:[%s2395_s1 + $0x280] sm:$0xff] }
  0x2a   :  { %1157 = vmatpush.bf16.msrb.mxu0 %v1865_v51  ;;  %v1916_v51 = vld [vmem:[%s2395_s1 + $0x2c0] sm:$0xff] }
  0x2b   :  { %1170 = vmatpush.bf16.msrb.mxu1 %v1873_v52  ;;  %v1931_v52 = vld [vmem:[%s2395_s1 + $0x338] sm:$0xff] }
  0x2c   :  { %1183 = vmatpush.bf16.msrb.mxu2 %v1881_v53  ;;  %v1939_v53 = vld [vmem:[%s2395_s1 + $0x378] sm:$0xff] }
  0x2d   :  { %1196 = vmatpush.bf16.msrb.mxu3 %v1889_v54  ;;  %v35_v54 = vld.sshfl [vmem:[#allocation1] sm:$0xff pattern:$0x73625140] }
  0x2e   :  { %1158 = vmatpush.bf16.msrb.mxu0 %v1864_v60  ;;  %v67_v60 = vpack.c.bf16 %v35_v54, %v35_v54 }
  0x2f   :  { %1171 = vmatpush.bf16.msrb.mxu1 %v1872_v61  ;;  %v69_v61 = vpack.c.bf16 %v37_v55, %v37_v55 }
  0x30   :  { %1184 = vmatpush.bf16.msrb.mxu2 %v1880_v62  ;;  %v68_v62 = vpack.c.bf16 %v36_v56, %v36_v56 }
  0x31   :  { %1197 = vmatpush.bf16.msrb.mxu3 %v1888_v63  ;;  %v70_v63 = vpack.c.bf16 %v38_v57, %v38_v57 }
  0x32   :  { %1159 = vmatpush.bf16.msrb.mxu0 %v1863_v0  ;;  %v1930_v0 = vld [vmem:[%s2395_s1 + $0x330] sm:$0xff] }
  0x33   :  { %1172 = vmatpush.bf16.msrb.mxu1 %v1871_v1  ;;  %v1938_v1 = vld [vmem:[%s2395_s1 + $0x370] sm:$0xff] }
  0x34   :  { %1185 = vmatpush.bf16.msrb.mxu2 %v1879_v2  ;;  %v1946_v2 = vld [vmem:[%s2395_s1 + $0x3b0] sm:$0xff] }
  0x35   :  { %1198 = vmatpush.bf16.msrb.mxu3 %v1887_v3  ;;  %v1954_v3 = vld [vmem:[%s2395_s1 + $0x3f0] sm:$0xff] }
  0x36   :  { %1160 = vmatpush.bf16.msrb.mxu0 %v1862_v4  ;;  %v1929_v4 = vld [vmem:[%s2395_s1 + $0x328] sm:$0xff] }
  0x37   :  { %1173 = vmatpush.bf16.msrb.mxu1 %v1870_v5  ;;  %v1937_v5 = vld [vmem:[%s2395_s1 + $0x368] sm:$0xff] }
  0x38   :  { %1186 = vmatpush.bf16.msrb.mxu2 %v1878_v6  ;;  %v1945_v6 = vld [vmem:[%s2395_s1 + $0x3a8] sm:$0xff] }
  0x39   :  { %1199 = vmatpush.bf16.msrb.mxu3 %v1886_v7  ;;  %v1953_v7 = vld [vmem:[%s2395_s1 + $0x3e8] sm:$0xff] }
  0x3a   :  { %1161 = vmatpush.bf16.msrb.mxu0 %v1861_v8  ;;  %v1928_v8 = vld [vmem:[%s2395_s1 + $0x320] sm:$0xff] }
  0x3b   :  { %1174 = vmatpush.bf16.msrb.mxu1 %v1869_v9  ;;  %v1936_v9 = vld [vmem:[%s2395_s1 + $0x360] sm:$0xff] }
  0x3c   :  { %1187 = vmatpush.bf16.msrb.mxu2 %v1877_v10  ;;  %v1944_v10 = vld [vmem:[%s2395_s1 + $0x3a0] sm:$0xff] }
  0x3d   :  { %1200 = vmatpush.bf16.msrb.mxu3 %v1885_v11  ;;  %v1952_v11 = vld [vmem:[%s2395_s1 + $0x3e0] sm:$0xff] }
  0x3e   :  { %1162 = vmatpush.bf16.msrb.mxu0 %v1860_v12  ;;  %v1927_v12 = vld [vmem:[%s2395_s1 + $0x318] sm:$0xff] }
  0x3f   :  { %1175 = vmatpush.bf16.msrb.mxu1 %v1868_v13  ;;  %v1935_v13 = vld [vmem:[%s2395_s1 + $0x358] sm:$0xff] }
  0x40   :  { %1188 = vmatpush.bf16.msrb.mxu2 %v1876_v14  ;;  %v1943_v14 = vld [vmem:[%s2395_s1 + $0x398] sm:$0xff] }
  0x41   :  { %1201 = vmatpush.bf16.msrb.mxu3 %v1884_v15  ;;  %1163 = vmatmul.bf16.vlgmr.msrb.gmra.mxu0 %v63_v21  ;;  %v1951_v15 = vld [vmem:[%s2395_s1 + $0x3d8] sm:$0xff]  ;;  %v1933_v21 = vld [vmem:[%s2395_s1 + $0x348] sm:$0xff] }
  0x42   :  { %1207 = vmatpush.bf16.msra.mxu0 %v1899_v16  ;;  %1176 = vmatmul.bf16.vlgmr.msrb.gmra.mxu1 %v64_v23  ;;  %v1926_v16 = vld [vmem:[%s2395_s1 + $0x310] sm:$0xff]  ;;  %v1949_v23 = vld [vmem:[%s2395_s1 + $0x3c8] sm:$0xff] }
  0x43   :  { %1220 = vmatpush.bf16.msra.mxu1 %v1907_v17  ;;  %1189 = vmatmul.bf16.vlgmr.msrb.gmra.mxu2 %v65_v20  ;;  %v1934_v17 = vld [vmem:[%s2395_s1 + $0x350] sm:$0xff]  ;;  %v1925_v20 = vld [vmem:[%s2395_s1 + $0x308] sm:$0xff] }
  0x44   :  { %1233 = vmatpush.bf16.msra.mxu2 %v1915_v18  ;;  %1202 = vmatmul.bf16.vlgmr.msrb.gmra.mxu3 %v66_v22  ;;  %v1942_v18 = vld [vmem:[%s2395_s1 + $0x390] sm:$0xff]  ;;  %v1941_v22 = vld [vmem:[%s2395_s1 + $0x388] sm:$0xff] }
  0x45   :  { %1246 = vmatpush.bf16.msra.mxu3 %v1923_v19  ;;  %v1950_v19 = vld [vmem:[%s2395_s1 + $0x3d0] sm:$0xff] }
  0x46   :  { %1208 = vmatpush.bf16.msra.mxu0 %v1898_v24  ;;  %v1924_v24 = vld [vmem:[%s2395_s1 + $0x300] sm:$0xff] }
  0x47   :  { %1221 = vmatpush.bf16.msra.mxu1 %v1906_v25  ;;  %v1932_v25 = vld [vmem:[%s2395_s1 + $0x340] sm:$0xff] }
  0x48   :  { %1234 = vmatpush.bf16.msra.mxu2 %v1914_v26  ;;  %v1940_v26 = vld [vmem:[%s2395_s1 + $0x380] sm:$0xff] }
  0x49   :  { %1247 = vmatpush.bf16.msra.mxu3 %v1922_v27  ;;  %v1948_v27 = vld [vmem:[%s2395_s1 + $0x3c0] sm:$0xff] }
  0x4a   :  { %1209 = vmatpush.bf16.msra.mxu0 %v1897_v28  ;;  %v39_v28 = vld.sshfl [vmem:[#allocation1 + $0x20] sm:$0xff pattern:$0x73625140] }
  0x4b   :  { %1222 = vmatpush.bf16.msra.mxu1 %v1905_v29  ;;  %v40_v29 = vld.sshfl [vmem:[#allocation1 + $0x28] sm:$0xff pattern:$0x73625140] }
  0x4c   :  { %1235 = vmatpush.bf16.msra.mxu2 %v1913_v30  ;;  %v41_v30 = vld.sshfl [vmem:[#allocation1 + $0x30] sm:$0xff pattern:$0x73625140] }
  0x4d   :  { %1248 = vmatpush.bf16.msra.mxu3 %v1921_v31  ;;  %v42_v31 = vld.sshfl [vmem:[#allocation1 + $0x38] sm:$0xff pattern:$0x73625140] }
  0x4e   :  { %1210 = vmatpush.bf16.msra.mxu0 %v1896_v32  ;;  %v71_v32 = vpack.c.bf16 %v39_v28, %v39_v28 }
  0x4f   :  { %1223 = vmatpush.bf16.msra.mxu1 %v1904_v33  ;;  %v72_v33 = vpack.c.bf16 %v40_v29, %v40_v29 }
  0x50   :  { %1236 = vmatpush.bf16.msra.mxu2 %v1912_v34  ;;  %v73_v34 = vpack.c.bf16 %v41_v30, %v41_v30 }
  0x51   :  { %1249 = vmatpush.bf16.msra.mxu3 %v1920_v35  ;;  %v74_v35 = vpack.c.bf16 %v42_v31, %v42_v31 }
  0x52   :  { %1211 = vmatpush.bf16.msra.mxu0 %v1895_v36  ;;  %v1956_v36 = vld [vmem:[%s2397_s2] ss:$0 sm:$0xff] }
  0x53   :  { %1224 = vmatpush.bf16.msra.mxu1 %v1903_v37 }
  0x54   :  { %1237 = vmatpush.bf16.msra.mxu2 %v1911_v38 }
  0x55   :  { %1250 = vmatpush.bf16.msra.mxu3 %v1919_v39 }
  0x56   :  { %1212 = vmatpush.bf16.msra.mxu0 %v1894_v40 }
  0x57   :  { %1225 = vmatpush.bf16.msra.mxu1 %v1902_v41 }
  0x58   :  { %1238 = vmatpush.bf16.msra.mxu2 %v1910_v42 }
  0x59   :  { %1251 = vmatpush.bf16.msra.mxu3 %v1918_v43 }
  0x5a   :  { %1213 = vmatpush.bf16.msra.mxu0 %v1893_v44 }
  0x5b   :  { %1226 = vmatpush.bf16.msra.mxu1 %v1901_v45 }
  0x5c   :  { %1239 = vmatpush.bf16.msra.mxu2 %v1909_v46 }
  0x5d   :  { %1252 = vmatpush.bf16.msra.mxu3 %v1917_v47 }
  0x5e   :  { %1214 = vmatpush.bf16.msra.mxu0 %v1892_v48 }
  0x5f   :  { %1227 = vmatpush.bf16.msra.mxu1 %v1900_v49 }
  0x60   :  { %1240 = vmatpush.bf16.msra.mxu2 %v1908_v50 }
  0x61   :  { %1253 = vmatpush.bf16.msra.mxu3 %v1916_v51  ;;  %1215 = vmatmul.bf16.vlgmr.msra.gmra.mxu0 %v67_v60 }
  0x62   :  { %1259 = vmatpush.bf16.msrb.mxu0 %v1931_v52  ;;  %1228 = vmatmul.bf16.vlgmr.msra.gmra.mxu1 %v68_v62 }
  0x63   :  { %1272 = vmatpush.bf16.msrb.mxu1 %v1939_v53  ;;  %1241 = vmatmul.bf16.vlgmr.msra.gmra.mxu2 %v69_v61 }
  0x64   :  { %1285 = vmatpush.bf16.msrb.mxu2 %v1947_v58  ;;  %1254 = vmatmul.bf16.vlgmr.msra.gmra.mxu3 %v70_v63 }
  0x65   :  { %1298 = vmatpush.bf16.msrb.mxu3 %v1955_v59 }
  0x66   :  { %1260 = vmatpush.bf16.msrb.mxu0 %v1930_v0 }
  0x67   :  { %1273 = vmatpush.bf16.msrb.mxu1 %v1938_v1 }
  0x68   :  { %1286 = vmatpush.bf16.msrb.mxu2 %v1946_v2 }
  0x69   :  { %1299 = vmatpush.bf16.msrb.mxu3 %v1954_v3 }
  0x6a   :  { %1261 = vmatpush.bf16.msrb.mxu0 %v1929_v4 }
  0x6b   :  { %1274 = vmatpush.bf16.msrb.mxu1 %v1937_v5 }
  0x6c   :  { %1287 = vmatpush.bf16.msrb.mxu2 %v1945_v6 }
  0x6d   :  { %1300 = vmatpush.bf16.msrb.mxu3 %v1953_v7 }
  0x6e   :  { %1262 = vmatpush.bf16.msrb.mxu0 %v1928_v8 }
  0x6f   :  { %1275 = vmatpush.bf16.msrb.mxu1 %v1936_v9 }
  0x70   :  { %1288 = vmatpush.bf16.msrb.mxu2 %v1944_v10 }
  0x71   :  { %1301 = vmatpush.bf16.msrb.mxu3 %v1952_v11 }
  0x72   :  { %1263 = vmatpush.bf16.msrb.mxu0 %v1927_v12 }
  0x73   :  { %1276 = vmatpush.bf16.msrb.mxu1 %v1935_v13 }
  0x74   :  { %1289 = vmatpush.bf16.msrb.mxu2 %v1943_v14 }
  0x75   :  { %1302 = vmatpush.bf16.msrb.mxu3 %v1951_v15 }
  0x76   :  { %1264 = vmatpush.bf16.msrb.mxu0 %v1926_v16 }
  0x77   :  { %1277 = vmatpush.bf16.msrb.mxu1 %v1934_v17 }
  0x78   :  { %1290 = vmatpush.bf16.msrb.mxu2 %v1942_v18 }
  0x79   :  { %1303 = vmatpush.bf16.msrb.mxu3 %v1950_v19 }
  0x7a   :  { %1265 = vmatpush.bf16.msrb.mxu0 %v1925_v20 }
  0x7b   :  { %1278 = vmatpush.bf16.msrb.mxu1 %v1933_v21 }
  0x7c   :  { %1291 = vmatpush.bf16.msrb.mxu2 %v1941_v22 }
  0x7d   :  { %1304 = vmatpush.bf16.msrb.mxu3 %v1949_v23 }
  0x7e   :  { %1266 = vmatpush.bf16.msrb.mxu0 %v1924_v24 }
  0x7f   :  { %1279 = vmatpush.bf16.msrb.mxu1 %v1932_v25 }
  0x80   :  { %1292 = vmatpush.bf16.msrb.mxu2 %v1940_v26 }
  0x81   :  { %1305 = vmatpush.bf16.msrb.mxu3 %v1948_v27  ;;  %1267 = vmatmul.bf16.vlgmr.msrb.gmra.mxu0 %v71_v32 }
  0x82   :  { %1280 = vmatmul.bf16.vlgmr.msrb.gmra.mxu1 %v72_v33 }
  0x83   :  { %1293 = vmatmul.bf16.vlgmr.msrb.gmra.mxu2 %v73_v34 }
  0x84   :  { %1306 = vmatmul.bf16.vlgmr.msrb.gmra.mxu3 %v74_v35 }
  0x9e   :  { %v1112_v37 = vpop.f32.mrf.mxu0 }
  0x9f   :  { %v1113_v38 = vadd.f32 %v1956_v36, %v1112_v37  ;;  %v1125_v39 = vpop.f32.mrf.mxu1 }
  0xa1   :  { %v1126_v40 = vadd.f32 %v1125_v39, %v1113_v38 }
  0xa6   :  { %v1138_v41 = vpop.f32.mrf.mxu2  ;;  %v1114_v44 = vpop.f32.mrf.mxu0 }
  0xa7   :  { %v1139_v42 = vadd.f32 %v1138_v41, %v1126_v40  ;;  %v1151_v43 = vpop.f32.mrf.mxu3  ;;  %v1127_v46 = vpop.f32.mrf.mxu1 }
  0xa9   :  { %v1152_v45 = vadd.f32 %v1151_v43, %v1139_v42 }
  0xae   :  { %v1140_v47 = vpop.f32.mrf.mxu2 }
  0xaf   :  { %v1153_v48 = vpop.f32.mrf.mxu3 }
  0xbe   :  { %v1164_v49 = vpop.f32.mrf.mxu0 }
  0xbf   :  { %v1177_v50 = vpop.f32.mrf.mxu1  ;;  %v1165_v59 = vadd.f32 %v1164_v49, %v1152_v45 }
  0xc1   :  { %v1178_v63 = vadd.f32 %v1177_v50, %v1165_v59 }
  0xc6   :  { %v1190_v51 = vpop.f32.mrf.mxu2  ;;  %v1166_v53 = vpop.f32.mrf.mxu0 }
  0xc7   :  { %v1203_v52 = vpop.f32.mrf.mxu3  ;;  %v1179_v54 = vpop.f32.mrf.mxu1  ;;  %v1191_v1 = vadd.f32 %v1190_v51, %v1178_v63 }
  0xc9   :  { %v1204_v4 = vadd.f32 %v1203_v52, %v1191_v1 }
  0xce   :  { %v1192_v55 = vpop.f32.mrf.mxu2 }
  0xcf   :  { %v1205_v56 = vpop.f32.mrf.mxu3 }
  0xde   :  { %v1216_v57 = vpop.f32.mrf.mxu0 }
  0xdf   :  { %v1229_v58 = vpop.f32.mrf.mxu1  ;;  %v1217_v5 = vadd.f32 %v1216_v57, %v1204_v4 }
  0xe1   :  { %v1230_v6 = vadd.f32 %v1229_v58, %v1217_v5 }
  0xe6   :  { %v1242_v60 = vpop.f32.mrf.mxu2  ;;  %v1218_v62 = vpop.f32.mrf.mxu0 }
  0xe7   :  { %v1255_v61 = vpop.f32.mrf.mxu3  ;;  %v1231_v0 = vpop.f32.mrf.mxu1  ;;  %v1243_v7 = vadd.f32 %v1242_v60, %v1230_v6 }
  0xe9   :  { %v1256_v8 = vadd.f32 %v1255_v61, %v1243_v7 }
  0xee   :  { %v1244_v2 = vpop.f32.mrf.mxu2 }
  0xef   :  { %v1257_v3 = vpop.f32.mrf.mxu3 }
  0xfe   :  { %v1268_v9 = vpop.f32.mrf.mxu0 }
  0xff   :  { %v1281_v10 = vpop.f32.mrf.mxu1  ;;  %v1269_v11 = vadd.f32 %v1268_v9, %v1256_v8 }
 0x101   :  { %v1282_v12 = vadd.f32 %v1281_v10, %v1269_v11 }
 0x106   :  { %v1294_v13 = vpop.f32.mrf.mxu2  ;;  %v1270_v16 = vpop.f32.mrf.mxu0 }
 0x107   :  { %v1307_v14 = vpop.f32.mrf.mxu3  ;;  %v1295_v15 = vadd.f32 %v1294_v13, %v1282_v12  ;;  %v1283_v17 = vpop.f32.mrf.mxu1 }
 0x109   :  { %v1308_v18 = vadd.f32 %v1307_v14, %v1295_v15 }
 0x10b   :  { %1311 = vst [vmem:[%s2398_s3] sm:$0x3] %v1308_v18 }
 0x10e   :  { %v1296_v19 = vpop.f32.mrf.mxu2 }
 0x10f   :  { %v1309_v20 = vpop.f32.mrf.mxu3 }

// kernel: _lambda_.6
= control target key start
LH: loop header
LB: loop body
LE: loop exit
PB: predicated region body
PF: predicated region fallthrough
CT: control target
= control target key end

     0   :  { %vm1056_vm0 = vcmask 1041408   ;;  %vm1058_vm1 = vcmask 1045508   ;;  %vm1060_vm2 = vcmask 1043456   ;;  %s2562_s1 = inlined_call_operand.vmem [shape: bf16[128,2048], index: 1, kind: input, shape index: {}]   ;;  %s2563_s0 = inlined_call_operand.vmem [shape: f32[2,128], index: 0, kind: input, shape index: {}]   ;;  %s2564_s2 = inlined_call_operand.vmem [shape: f32[1,2048], index: 2, kind: input, shape index: {}]   ;;  %s2565_s3 = inlined_call_operand.vmem [shape: f32[2,2048], index: 3, kind: output, shape index: {}]  }
   0x1   :  { %v1533_v0 = vld [vmem:[%s2562_s1 + $0x380] sm:$0xf]  ;;  %v1707_v2 = vld [vmem:[%s2562_s1 + $0x384] sm:$0xf]  ;;  %v1541_v5 = vld [vmem:[%s2562_s1 + $0x388] sm:$0xf] }
   0x2   :  { %v1715_v1 = vld [vmem:[%s2562_s1 + $0x3bc] sm:$0xf0]  ;;  %v1535_v4 = vld [vmem:[%s2562_s1 + $0x3c0] sm:$0xf0]  ;;  %v1716_v6 = vld [vmem:[%s2562_s1 + $0x3c4] sm:$0xf0] }
   0x3   :  { %v1534_v3 = vor.u32 %v1715_v1, %v1533_v0  ;;  %v1538_v7 = vor.u32 %v1707_v2, %v1535_v4  ;;  %v1542_v8 = vor.u32 %v1716_v6, %v1541_v5  ;;  %v1708_v9 = vld [vmem:[%s2562_s1 + $0x38c] sm:$0xf]  ;;  %v1469_v11 = vld [vmem:[%s2562_s1 + $0x300] sm:$0xf]  ;;  %v1691_v14 = vld [vmem:[%s2562_s1 + $0x304] sm:$0xf] }
   0x4   :  { %v1543_v10 = vld [vmem:[%s2562_s1 + $0x3c8] sm:$0xf0]  ;;  %v1699_v13 = vld [vmem:[%s2562_s1 + $0x33c] sm:$0xf0]  ;;  %v1471_v15 = vld [vmem:[%s2562_s1 + $0x340] sm:$0xf0] }
   0x5   :  { %820 = vmatpush.bf16.msra.mxu0 %v1534_v3  ;;  %v1546_v12 = vor.u32 %v1708_v9, %v1543_v10  ;;  %833 = vmatpush.bf16.msra.mxu1 %v1538_v7  ;;  %v1470_v16 = vor.u32 %v1699_v13, %v1469_v11  ;;  %v1474_v17 = vor.u32 %v1691_v14, %v1471_v15  ;;  %v1477_v18 = vld [vmem:[%s2562_s1 + $0x308] sm:$0xf]  ;;  %v1692_v20 = vld [vmem:[%s2562_s1 + $0x30c] sm:$0xf]  ;;  %v1405_v23 = vld [vmem:[%s2562_s1 + $0x280] sm:$0xf] }
   0x6   :  { %846 = vmatpush.bf16.msra.mxu2 %v1542_v8  ;;  %v1700_v19 = vld [vmem:[%s2562_s1 + $0x344] sm:$0xf0]  ;;  %v1479_v22 = vld [vmem:[%s2562_s1 + $0x348] sm:$0xf0]  ;;  %v1683_v24 = vld [vmem:[%s2562_s1 + $0x2bc] sm:$0xf0] }
   0x7   :  { %859 = vmatpush.bf16.msra.mxu3 %v1546_v12  ;;  %v1478_v21 = vor.u32 %v1700_v19, %v1477_v18  ;;  %v1482_v25 = vor.u32 %v1692_v20, %v1479_v22  ;;  %v1675_v26 = vld [vmem:[%s2562_s1 + $0x284] sm:$0xf]  ;;  %v1413_v28 = vld [vmem:[%s2562_s1 + $0x288] sm:$0xf]  ;;  %v1406_v29 = vor.u32 %v1683_v24, %v1405_v23  ;;  %v1676_v31 = vld [vmem:[%s2562_s1 + $0x28c] sm:$0xf] }
   0x8   :  { %v1407_v27 = vld [vmem:[%s2562_s1 + $0x2c0] sm:$0xf0]  ;;  %v1684_v30 = vld [vmem:[%s2562_s1 + $0x2c4] sm:$0xf0]  ;;  %v1415_v32 = vld [vmem:[%s2562_s1 + $0x2c8] sm:$0xf0] }
   0x9   :  { %821 = vmatpush.bf16.msra.mxu0 %v1470_v16  ;;  %834 = vmatpush.bf16.msra.mxu1 %v1474_v17  ;;  %v1410_v33 = vor.u32 %v1675_v26, %v1407_v27  ;;  %v1414_v34 = vor.u32 %v1684_v30, %v1413_v28  ;;  %v1341_v35 = vld [vmem:[%s2562_s1 + $0x200] sm:$0xf]  ;;  %v1659_v37 = vld [vmem:[%s2562_s1 + $0x204] sm:$0xf]  ;;  %v1418_v38 = vor.u32 %v1676_v31, %v1415_v32  ;;  %v1349_v40 = vld [vmem:[%s2562_s1 + $0x208] sm:$0xf] }
   0xa   :  { %847 = vmatpush.bf16.msra.mxu2 %v1478_v21  ;;  %v1667_v36 = vld [vmem:[%s2562_s1 + $0x23c] sm:$0xf0]  ;;  %v1343_v39 = vld [vmem:[%s2562_s1 + $0x240] sm:$0xf0]  ;;  %v1668_v41 = vld [vmem:[%s2562_s1 + $0x244] sm:$0xf0] }
   0xb   :  { %860 = vmatpush.bf16.msra.mxu3 %v1482_v25  ;;  %v1660_v42 = vld [vmem:[%s2562_s1 + $0x20c] sm:$0xf]  ;;  %v1342_v44 = vor.u32 %v1667_v36, %v1341_v35  ;;  %v1346_v45 = vor.u32 %v1659_v37, %v1343_v39  ;;  %v1350_v46 = vor.u32 %v1668_v41, %v1349_v40  ;;  %v1277_v47 = vld [vmem:[%s2562_s1 + $0x180] sm:$0xf]  ;;  %v1643_v49 = vld [vmem:[%s2562_s1 + $0x184] sm:$0xf] }
   0xc   :  { %v1351_v43 = vld [vmem:[%s2562_s1 + $0x248] sm:$0xf0]  ;;  %v1651_v48 = vld [vmem:[%s2562_s1 + $0x1bc] sm:$0xf0]  ;;  %v1279_v51 = vld [vmem:[%s2562_s1 + $0x1c0] sm:$0xf0] }
   0xd   :  { %822 = vmatpush.bf16.msra.mxu0 %v1406_v29  ;;  %835 = vmatpush.bf16.msra.mxu1 %v1410_v33  ;;  %v1354_v50 = vor.u32 %v1660_v42, %v1351_v43  ;;  %v1285_v52 = vld [vmem:[%s2562_s1 + $0x188] sm:$0xf]  ;;  %v1644_v54 = vld [vmem:[%s2562_s1 + $0x18c] sm:$0xf]  ;;  %v1278_v56 = vor.u32 %v1651_v48, %v1277_v47  ;;  %v1282_v57 = vor.u32 %v1643_v49, %v1279_v51  ;;  %v1213_v59 = vld [vmem:[%s2562_s1 + $0x100] sm:$0xf] }
   0xe   :  { %848 = vmatpush.bf16.msra.mxu2 %v1414_v34  ;;  %v1652_v53 = vld [vmem:[%s2562_s1 + $0x1c4] sm:$0xf0]  ;;  %v1287_v55 = vld [vmem:[%s2562_s1 + $0x1c8] sm:$0xf0]  ;;  %v1635_v60 = vld [vmem:[%s2562_s1 + $0x13c] sm:$0xf0] }
   0xf   :  { %861 = vmatpush.bf16.msra.mxu3 %v1418_v38  ;;  %v1286_v58 = vor.u32 %v1652_v53, %v1285_v52  ;;  %v1627_v61 = vld [vmem:[%s2562_s1 + $0x104] sm:$0xf]  ;;  %v1290_v62 = vor.u32 %v1644_v54, %v1287_v55  ;;  %v1221_v0 = vld [vmem:[%s2562_s1 + $0x108] sm:$0xf]  ;;  %v1628_v2 = vld [vmem:[%s2562_s1 + $0x10c] sm:$0xf]  ;;  %v1214_v4 = vor.u32 %v1635_v60, %v1213_v59 }
  0x10   :  { %v1215_v63 = vld [vmem:[%s2562_s1 + $0x140] sm:$0xf0]  ;;  %v1636_v1 = vld [vmem:[%s2562_s1 + $0x144] sm:$0xf0]  ;;  %v1223_v3 = vld [vmem:[%s2562_s1 + $0x148] sm:$0xf0] }
  0x11   :  { %823 = vmatpush.bf16.msra.mxu0 %v1342_v44  ;;  %836 = vmatpush.bf16.msra.mxu1 %v1346_v45  ;;  %v1218_v5 = vor.u32 %v1627_v61, %v1215_v63  ;;  %v1222_v6 = vor.u32 %v1636_v1, %v1221_v0  ;;  %v1149_v7 = vld [vmem:[%s2562_s1 + $0x80] sm:$0xf]  ;;  %v1611_v9 = vld [vmem:[%s2562_s1 + $0x84] sm:$0xf]  ;;  %v1226_v10 = vor.u32 %v1628_v2, %v1223_v3  ;;  %v1157_v12 = vld [vmem:[%s2562_s1 + $0x88] sm:$0xf] }
  0x12   :  { %849 = vmatpush.bf16.msra.mxu2 %v1350_v46  ;;  %v1619_v8 = vld [vmem:[%s2562_s1 + $0xbc] sm:$0xf0]  ;;  %v1151_v11 = vld [vmem:[%s2562_s1 + $0xc0] sm:$0xf0]  ;;  %v1620_v13 = vld [vmem:[%s2562_s1 + $0xc4] sm:$0xf0] }
  0x13   :  { %862 = vmatpush.bf16.msra.mxu3 %v1354_v50  ;;  %v1612_v14 = vld [vmem:[%s2562_s1 + $0x8c] sm:$0xf]  ;;  %v1150_v16 = vor.u32 %v1619_v8, %v1149_v7  ;;  %v1085_v17 = vld [vmem:[%s2562_s1] sm:$0xf]  ;;  %v1154_v19 = vor.u32 %v1611_v9, %v1151_v11  ;;  %v1158_v20 = vor.u32 %v1620_v13, %v1157_v12  ;;  %v1595_v21 = vld [vmem:[%s2562_s1 + $0x4] sm:$0xf] }
  0x14   :  { %v1159_v15 = vld [vmem:[%s2562_s1 + $0xc8] sm:$0xf0]  ;;  %v1603_v18 = vld [vmem:[%s2562_s1 + $0x3c] sm:$0xf0]  ;;  %v1087_v22 = vld [vmem:[%s2562_s1 + $0x40] sm:$0xf0] }
  0x15   :  { %824 = vmatpush.bf16.msra.mxu0 %v1278_v56  ;;  %837 = vmatpush.bf16.msra.mxu1 %v1282_v57  ;;  %v1093_v23 = vld [vmem:[%s2562_s1 + $0x8] sm:$0xf]  ;;  %v1162_v24 = vor.u32 %v1612_v14, %v1159_v15  ;;  %v1596_v26 = vld [vmem:[%s2562_s1 + $0xc] sm:$0xf]  ;;  %v1549_v28 = vld [vmem:[%s2562_s1 + $0x390] sm:$0xf]  ;;  %v1086_v31 = vor.u32 %v1603_v18, %v1085_v17  ;;  %v1090_v35 = vor.u32 %v1595_v21, %v1087_v22 }
  0x16   :  { %850 = vmatpush.bf16.msra.mxu2 %v1286_v58  ;;  %v1604_v25 = vld [vmem:[%s2562_s1 + $0x44] sm:$0xf0]  ;;  %v1095_v27 = vld [vmem:[%s2562_s1 + $0x48] sm:$0xf0]  ;;  %v1717_v29 = vld [vmem:[%s2562_s1 + $0x3cc] sm:$0xf0] }
  0x17   :  { %863 = vmatpush.bf16.msra.mxu3 %v1290_v62  ;;  %v1709_v30 = vld [vmem:[%s2562_s1 + $0x394] sm:$0xf]  ;;  %v1557_v33 = vld [vmem:[%s2562_s1 + $0x398] sm:$0xf]  ;;  %v1094_v36 = vor.u32 %v1604_v25, %v1093_v23  ;;  %v1710_v37 = vld [vmem:[%s2562_s1 + $0x39c] sm:$0xf]  ;;  %v1098_v39 = vor.u32 %v1596_v26, %v1095_v27  ;;  %v1550_v40 = vor.u32 %v1717_v29, %v1549_v28 }
  0x18   :  { %v1551_v32 = vld [vmem:[%s2562_s1 + $0x3d0] sm:$0xf0]  ;;  %v1718_v34 = vld [vmem:[%s2562_s1 + $0x3d4] sm:$0xf0]  ;;  %v1559_v38 = vld [vmem:[%s2562_s1 + $0x3d8] sm:$0xf0] }
  0x19   :  { %825 = vmatpush.bf16.msra.mxu0 %v1214_v4  ;;  %838 = vmatpush.bf16.msra.mxu1 %v1218_v5  ;;  %v1554_v41 = vor.u32 %v1709_v30, %v1551_v32  ;;  %v1558_v42 = vor.u32 %v1718_v34, %v1557_v33  ;;  %v1485_v43 = vld [vmem:[%s2562_s1 + $0x310] sm:$0xf]  ;;  %v1693_v45 = vld [vmem:[%s2562_s1 + $0x314] sm:$0xf]  ;;  %v1562_v46 = vor.u32 %v1710_v37, %v1559_v38  ;;  %v1493_v48 = vld [vmem:[%s2562_s1 + $0x318] sm:$0xf] }
  0x1a   :  { %851 = vmatpush.bf16.msra.mxu2 %v1222_v6  ;;  %v1701_v44 = vld [vmem:[%s2562_s1 + $0x34c] sm:$0xf0]  ;;  %v1487_v47 = vld [vmem:[%s2562_s1 + $0x350] sm:$0xf0]  ;;  %v1702_v49 = vld [vmem:[%s2562_s1 + $0x354] sm:$0xf0] }
  0x1b   :  { %864 = vmatpush.bf16.msra.mxu3 %v1226_v10  ;;  %v1694_v50 = vld [vmem:[%s2562_s1 + $0x31c] sm:$0xf]  ;;  %v1486_v52 = vor.u32 %v1701_v44, %v1485_v43  ;;  %v1490_v53 = vor.u32 %v1693_v45, %v1487_v47  ;;  %v1494_v54 = vor.u32 %v1702_v49, %v1493_v48  ;;  %v1421_v55 = vld [vmem:[%s2562_s1 + $0x290] sm:$0xf]  ;;  %v1677_v57 = vld [vmem:[%s2562_s1 + $0x294] sm:$0xf] }
  0x1c   :  { %v1495_v51 = vld [vmem:[%s2562_s1 + $0x358] sm:$0xf0]  ;;  %v1685_v56 = vld [vmem:[%s2562_s1 + $0x2cc] sm:$0xf0]  ;;  %v1423_v59 = vld [vmem:[%s2562_s1 + $0x2d0] sm:$0xf0] }
  0x1d   :  { %826 = vmatpush.bf16.msra.mxu0 %v1150_v16  ;;  %839 = vmatpush.bf16.msra.mxu1 %v1154_v19  ;;  %v1498_v58 = vor.u32 %v1694_v50, %v1495_v51  ;;  %v1429_v60 = vld [vmem:[%s2562_s1 + $0x298] sm:$0xf]  ;;  %v1678_v62 = vld [vmem:[%s2562_s1 + $0x29c] sm:$0xf]  ;;  %v1422_v0 = vor.u32 %v1685_v56, %v1421_v55  ;;  %v14_v1 = vld [vmem:[%s2563_s0] sm:$0x3]  ;;  %v1426_v2 = vor.u32 %v1677_v57, %v1423_v59 }
  0x1e   :  { %852 = vmatpush.bf16.msra.mxu2 %v1158_v20  ;;  %v1686_v61 = vld [vmem:[%s2562_s1 + $0x2d4] sm:$0xf0]  ;;  %v1431_v63 = vld [vmem:[%s2562_s1 + $0x2d8] sm:$0xf0]  ;;  %v1357_v4 = vld [vmem:[%s2562_s1 + $0x210] sm:$0xf]  ;;  %v2019_v7 = vpack.c.bf16 %v14_v1, %v14_v1 }
  0x1f   :  { %865 = vmatpush.bf16.msra.mxu3 %v1162_v24  ;;  %v1430_v3 = vor.u32 %v1686_v61, %v1429_v60  ;;  %v1669_v5 = vld [vmem:[%s2562_s1 + $0x24c] sm:$0xf0]  ;;  %v1661_v6 = vld [vmem:[%s2562_s1 + $0x214] sm:$0xf]  ;;  %v1434_v8 = vor.u32 %v1678_v62, %v1431_v63  ;;  %v1365_v10 = vld [vmem:[%s2562_s1 + $0x218] sm:$0xf] }
  0x20   :  { %v1359_v9 = vld [vmem:[%s2562_s1 + $0x250] sm:$0xf0]  ;;  %v1670_v11 = vld [vmem:[%s2562_s1 + $0x254] sm:$0xf0]  ;;  %v1662_v12 = vld [vmem:[%s2562_s1 + $0x21c] sm:$0xf]  ;;  %v1358_v14 = vor.u32 %v1669_v5, %v1357_v4 }
  0x21   :  { %827 = vmatpush.bf16.msra.mxu0 %v1086_v31  ;;  %840 = vmatpush.bf16.msra.mxu1 %v1090_v35  ;;  %v1367_v13 = vld [vmem:[%s2562_s1 + $0x258] sm:$0xf0]  ;;  %v1362_v15 = vor.u32 %v1661_v6, %v1359_v9  ;;  %v1366_v16 = vor.u32 %v1670_v11, %v1365_v10  ;;  %v1293_v17 = vld [vmem:[%s2562_s1 + $0x190] sm:$0xf]  ;;  %v1645_v19 = vld [vmem:[%s2562_s1 + $0x194] sm:$0xf] }
  0x22   :  { %853 = vmatpush.bf16.msra.mxu2 %v1094_v36  ;;  %v1653_v18 = vld [vmem:[%s2562_s1 + $0x1cc] sm:$0xf0]  ;;  %v1370_v20 = vor.u32 %v1662_v12, %v1367_v13  ;;  %v1295_v21 = vld [vmem:[%s2562_s1 + $0x1d0] sm:$0xf0]  ;;  %v1301_v22 = vld [vmem:[%s2562_s1 + $0x198] sm:$0xf] }
  0x23   :  { %866 = vmatpush.bf16.msra.mxu3 %v1098_v39  ;;  %v1654_v23 = vld [vmem:[%s2562_s1 + $0x1d4] sm:$0xf0]  ;;  %v1646_v24 = vld [vmem:[%s2562_s1 + $0x19c] sm:$0xf]  ;;  %v1294_v26 = vor.u32 %v1653_v18, %v1293_v17  ;;  %v1298_v27 = vor.u32 %v1645_v19, %v1295_v21  ;;  %v1229_v29 = vld [vmem:[%s2562_s1 + $0x110] sm:$0xf] }
  0x24   :  { %841 = vmatmul.bf16.vlgmr.msra.gmra.mxu1 %v2019_v7  ;;  %828 = vmatmul.bf16.vlgmr.msra.gmra.mxu0 %v2019_v7  ;;  %v1303_v25 = vld [vmem:[%s2562_s1 + $0x1d8] sm:$0xf0]  ;;  %v1302_v28 = vor.u32 %v1654_v23, %v1301_v22  ;;  %v1637_v30 = vld [vmem:[%s2562_s1 + $0x14c] sm:$0xf0]  ;;  %v1629_v31 = vld [vmem:[%s2562_s1 + $0x114] sm:$0xf] }
  0x25   :  { %872 = vmatpush.bf16.msrb.mxu0 %v1550_v40  ;;  %885 = vmatpush.bf16.msrb.mxu1 %v1554_v41  ;;  %v1306_v32 = vor.u32 %v1646_v24, %v1303_v25  ;;  %v1231_v33 = vld [vmem:[%s2562_s1 + $0x150] sm:$0xf0]  ;;  %v1237_v34 = vld [vmem:[%s2562_s1 + $0x118] sm:$0xf]  ;;  %v1630_v36 = vld [vmem:[%s2562_s1 + $0x11c] sm:$0xf]  ;;  %v1230_v38 = vor.u32 %v1637_v30, %v1229_v29 }
  0x26   :  { %898 = vmatpush.bf16.msrb.mxu2 %v1558_v42  ;;  %867 = vmatmul.bf16.vlgmr.msra.gmra.mxu3 %v2019_v7  ;;  %v1638_v35 = vld [vmem:[%s2562_s1 + $0x154] sm:$0xf0]  ;;  %v1239_v37 = vld [vmem:[%s2562_s1 + $0x158] sm:$0xf0]  ;;  %v1234_v39 = vor.u32 %v1629_v31, %v1231_v33  ;;  %v1165_v41 = vld [vmem:[%s2562_s1 + $0x90] sm:$0xf] }
  0x27   :  { %911 = vmatpush.bf16.msrb.mxu3 %v1562_v46  ;;  %854 = vmatmul.bf16.vlgmr.msra.gmra.mxu2 %v2019_v7  ;;  %v1238_v40 = vor.u32 %v1638_v35, %v1237_v34  ;;  %v1621_v42 = vld [vmem:[%s2562_s1 + $0xcc] sm:$0xf0]  ;;  %v1613_v43 = vld [vmem:[%s2562_s1 + $0x94] sm:$0xf]  ;;  %v1242_v44 = vor.u32 %v1630_v36, %v1239_v37  ;;  %v1173_v46 = vld [vmem:[%s2562_s1 + $0x98] sm:$0xf] }
  0x28   :  { %v1167_v45 = vld [vmem:[%s2562_s1 + $0xd0] sm:$0xf0]  ;;  %v1622_v47 = vld [vmem:[%s2562_s1 + $0xd4] sm:$0xf0]  ;;  %v1614_v48 = vld [vmem:[%s2562_s1 + $0x9c] sm:$0xf]  ;;  %v1166_v50 = vor.u32 %v1621_v42, %v1165_v41 }
  0x29   :  { %873 = vmatpush.bf16.msrb.mxu0 %v1486_v52  ;;  %886 = vmatpush.bf16.msrb.mxu1 %v1490_v53  ;;  %v1175_v49 = vld [vmem:[%s2562_s1 + $0xd8] sm:$0xf0]  ;;  %v1101_v51 = vld [vmem:[%s2562_s1 + $0x10] sm:$0xf]  ;;  %v1170_v53 = vor.u32 %v1613_v43, %v1167_v45  ;;  %v1597_v55 = vld [vmem:[%s2562_s1 + $0x14] sm:$0xf] }
  0x2a   :  { %899 = vmatpush.bf16.msrb.mxu2 %v1494_v54  ;;  %v1605_v52 = vld [vmem:[%s2562_s1 + $0x4c] sm:$0xf0]  ;;  %v1174_v54 = vor.u32 %v1622_v47, %v1173_v46  ;;  %v1103_v56 = vld [vmem:[%s2562_s1 + $0x50] sm:$0xf0]  ;;  %v1109_v57 = vld [vmem:[%s2562_s1 + $0x18] sm:$0xf] }
  0x2b   :  { %912 = vmatpush.bf16.msrb.mxu3 %v1498_v58  ;;  %v1178_v58 = vor.u32 %v1614_v48, %v1175_v49  ;;  %v1606_v59 = vld [vmem:[%s2562_s1 + $0x54] sm:$0xf0]  ;;  %v1598_v60 = vld [vmem:[%s2562_s1 + $0x1c] sm:$0xf]  ;;  %v1565_v62 = vld [vmem:[%s2562_s1 + $0x3a0] sm:$0xf]  ;;  %v1102_v1 = vor.u32 %v1605_v52, %v1101_v51  ;;  %v1106_v5 = vor.u32 %v1597_v55, %v1103_v56 }
  0x2c   :  { %v1111_v61 = vld [vmem:[%s2562_s1 + $0x58] sm:$0xf0]  ;;  %v1719_v63 = vld [vmem:[%s2562_s1 + $0x3dc] sm:$0xf0]  ;;  %v1720_v4 = vld [vmem:[%s2562_s1 + $0x3e4] sm:$0xf0]  ;;  %v1110_v6 = vor.u32 %v1606_v59, %v1109_v57 }
  0x2d   :  { %874 = vmatpush.bf16.msrb.mxu0 %v1422_v0  ;;  %887 = vmatpush.bf16.msrb.mxu1 %v1426_v2  ;;  %v1711_v0 = vld [vmem:[%s2562_s1 + $0x3a4] sm:$0xf]  ;;  %v1575_v9 = vld [vmem:[%s2562_s1 + $0x3e8] sm:$0xf0]  ;;  %v1114_v10 = vor.u32 %v1598_v60, %v1111_v61  ;;  %v1566_v11 = vor.u32 %v1719_v63, %v1565_v62  ;;  %v1509_v19 = vld [vmem:[%s2562_s1 + $0x328] sm:$0xf] }
  0x2e   :  { %900 = vmatpush.bf16.msrb.mxu2 %v1430_v3  ;;  %v1567_v2 = vld [vmem:[%s2562_s1 + $0x3e0] sm:$0xf0]  ;;  %v1573_v3 = vld [vmem:[%s2562_s1 + $0x3a8] sm:$0xf]  ;;  %v1696_v21 = vld [vmem:[%s2562_s1 + $0x32c] sm:$0xf] }
  0x2f   :  { %913 = vmatpush.bf16.msrb.mxu3 %v1434_v8  ;;  %v1712_v8 = vld [vmem:[%s2562_s1 + $0x3ac] sm:$0xf]  ;;  %v1570_v12 = vor.u32 %v1711_v0, %v1567_v2  ;;  %v1574_v13 = vor.u32 %v1720_v4, %v1573_v3  ;;  %v1503_v18 = vld [vmem:[%s2562_s1 + $0x360] sm:$0xf0]  ;;  %v1445_v31 = vld [vmem:[%s2562_s1 + $0x2a8] sm:$0xf] }
  0x30   :  { %v1578_v17 = vor.u32 %v1712_v8, %v1575_v9  ;;  %v1511_v22 = vld [vmem:[%s2562_s1 + $0x368] sm:$0xf0]  ;;  %v1439_v30 = vld [vmem:[%s2562_s1 + $0x2e0] sm:$0xf0]  ;;  %v1381_v43 = vld [vmem:[%s2562_s1 + $0x228] sm:$0xf] }
  0x31   :  { %875 = vmatpush.bf16.msrb.mxu0 %v1358_v14  ;;  %888 = vmatpush.bf16.msrb.mxu1 %v1362_v15  ;;  %v1501_v14 = vld [vmem:[%s2562_s1 + $0x320] sm:$0xf]  ;;  %v1514_v29 = vor.u32 %v1696_v21, %v1511_v22  ;;  %v1680_v33 = vld [vmem:[%s2562_s1 + $0x2ac] sm:$0xf]  ;;  %v1375_v42 = vld [vmem:[%s2562_s1 + $0x260] sm:$0xf0] }
  0x32   :  { %901 = vmatpush.bf16.msrb.mxu2 %v1366_v16  ;;  %v1703_v15 = vld [vmem:[%s2562_s1 + $0x35c] sm:$0xf0]  ;;  %v1695_v16 = vld [vmem:[%s2562_s1 + $0x324] sm:$0xf]  ;;  %v1447_v34 = vld [vmem:[%s2562_s1 + $0x2e8] sm:$0xf0] }
  0x33   :  { %914 = vmatpush.bf16.msrb.mxu3 %v1370_v20  ;;  %v1704_v20 = vld [vmem:[%s2562_s1 + $0x364] sm:$0xf0]  ;;  %v1502_v23 = vor.u32 %v1703_v15, %v1501_v14  ;;  %v1506_v24 = vor.u32 %v1695_v16, %v1503_v18  ;;  %v1450_v41 = vor.u32 %v1680_v33, %v1447_v34  ;;  %v1664_v45 = vld [vmem:[%s2562_s1 + $0x22c] sm:$0xf]  ;;  %v1655_v51 = vld [vmem:[%s2562_s1 + $0x1dc] sm:$0xf0] }
  0x34   :  { %v1510_v25 = vor.u32 %v1704_v20, %v1509_v19  ;;  %v1383_v46 = vld [vmem:[%s2562_s1 + $0x268] sm:$0xf0]  ;;  %v1647_v52 = vld [vmem:[%s2562_s1 + $0x1a4] sm:$0xf]  ;;  %v1317_v55 = vld [vmem:[%s2562_s1 + $0x1a8] sm:$0xf] }
  0x35   :  { %876 = vmatpush.bf16.msrb.mxu0 %v1294_v26  ;;  %889 = vmatpush.bf16.msrb.mxu1 %v1298_v27  ;;  %v1437_v26 = vld [vmem:[%s2562_s1 + $0x2a0] sm:$0xf]  ;;  %v1656_v56 = vld [vmem:[%s2562_s1 + $0x1e4] sm:$0xf0]  ;;  %v1648_v57 = vld [vmem:[%s2562_s1 + $0x1ac] sm:$0xf] }
  0x36   :  { %902 = vmatpush.bf16.msrb.mxu2 %v1302_v28  ;;  %v1687_v27 = vld [vmem:[%s2562_s1 + $0x2dc] sm:$0xf0]  ;;  %v1679_v28 = vld [vmem:[%s2562_s1 + $0x2a4] sm:$0xf]  ;;  %v1318_v61 = vor.u32 %v1656_v56, %v1317_v55  ;;  %v1253_v3 = vld [vmem:[%s2562_s1 + $0x128] sm:$0xf] }
  0x37   :  { %915 = vmatpush.bf16.msrb.mxu3 %v1306_v32  ;;  %v1688_v32 = vld [vmem:[%s2562_s1 + $0x2e4] sm:$0xf0]  ;;  %v1438_v35 = vor.u32 %v1687_v27, %v1437_v26  ;;  %v1442_v36 = vor.u32 %v1679_v28, %v1439_v30  ;;  %v1245_v62 = vld [vmem:[%s2562_s1 + $0x120] sm:$0xf]  ;;  %v1631_v0 = vld [vmem:[%s2562_s1 + $0x124] sm:$0xf] }
  0x38   :  { %v1446_v37 = vor.u32 %v1688_v32, %v1445_v31  ;;  %v1639_v63 = vld [vmem:[%s2562_s1 + $0x15c] sm:$0xf0]  ;;  %v1247_v2 = vld [vmem:[%s2562_s1 + $0x160] sm:$0xf0]  ;;  %v1640_v4 = vld [vmem:[%s2562_s1 + $0x164] sm:$0xf0] }
  0x39   :  { %877 = vmatpush.bf16.msrb.mxu0 %v1230_v38  ;;  %890 = vmatpush.bf16.msrb.mxu1 %v1234_v39  ;;  %v1373_v38 = vld [vmem:[%s2562_s1 + $0x220] sm:$0xf]  ;;  %v1246_v8 = vor.u32 %v1639_v63, %v1245_v62  ;;  %v1250_v9 = vor.u32 %v1631_v0, %v1247_v2  ;;  %v1183_v15 = vld [vmem:[%s2562_s1 + $0xe0] sm:$0xf0]  ;;  %v1189_v16 = vld [vmem:[%s2562_s1 + $0xa8] sm:$0xf] }
  0x3a   :  { %903 = vmatpush.bf16.msrb.mxu2 %v1238_v40  ;;  %v1671_v39 = vld [vmem:[%s2562_s1 + $0x25c] sm:$0xf0]  ;;  %v1663_v40 = vld [vmem:[%s2562_s1 + $0x224] sm:$0xf]  ;;  %v1616_v18 = vld [vmem:[%s2562_s1 + $0xac] sm:$0xf] }
  0x3b   :  { %916 = vmatpush.bf16.msrb.mxu3 %v1242_v44  ;;  %v1672_v44 = vld [vmem:[%s2562_s1 + $0x264] sm:$0xf0]  ;;  %v1374_v47 = vor.u32 %v1671_v39, %v1373_v38  ;;  %v1378_v48 = vor.u32 %v1663_v40, %v1375_v42  ;;  %v1191_v19 = vld [vmem:[%s2562_s1 + $0xe8] sm:$0xf0]  ;;  %v1117_v21 = vld [vmem:[%s2562_s1 + $0x20] sm:$0xf] }
  0x3c   :  { %v1382_v49 = vor.u32 %v1672_v44, %v1381_v43  ;;  %v1607_v22 = vld [vmem:[%s2562_s1 + $0x5c] sm:$0xf0]  ;;  %v1119_v26 = vld [vmem:[%s2562_s1 + $0x60] sm:$0xf0]  ;;  %v1125_v27 = vld [vmem:[%s2562_s1 + $0x28] sm:$0xf]  ;;  %v1194_v28 = vor.u32 %v1616_v18, %v1191_v19 }
  0x3d   :  { %878 = vmatpush.bf16.msrb.mxu0 %v1166_v50  ;;  %891 = vmatpush.bf16.msrb.mxu1 %v1170_v53  ;;  %v1309_v50 = vld [vmem:[%s2562_s1 + $0x1a0] sm:$0xf]  ;;  %v1386_v53 = vor.u32 %v1664_v45, %v1383_v46  ;;  %v1600_v30 = vld [vmem:[%s2562_s1 + $0x2c] sm:$0xf]  ;;  %v1581_v32 = vld [vmem:[%s2562_s1 + $0x3b0] sm:$0xf] }
  0x3e   :  { %904 = vmatpush.bf16.msrb.mxu2 %v1174_v54  ;;  %v1311_v54 = vld [vmem:[%s2562_s1 + $0x1e0] sm:$0xf0]  ;;  %v1310_v59 = vor.u32 %v1655_v51, %v1309_v50  ;;  %v1127_v31 = vld [vmem:[%s2562_s1 + $0x68] sm:$0xf0]  ;;  %v1721_v33 = vld [vmem:[%s2562_s1 + $0x3ec] sm:$0xf0] }
  0x3f   :  { %917 = vmatpush.bf16.msrb.mxu3 %v1178_v58  ;;  %v1319_v58 = vld [vmem:[%s2562_s1 + $0x1e8] sm:$0xf0]  ;;  %v1314_v60 = vor.u32 %v1647_v52, %v1311_v54  ;;  %v1713_v34 = vld [vmem:[%s2562_s1 + $0x3b4] sm:$0xf]  ;;  %v1722_v38 = vld [vmem:[%s2562_s1 + $0x3f4] sm:$0xf0]  ;;  %v1130_v43 = vor.u32 %v1600_v30, %v1127_v31  ;;  %v1582_v44 = vor.u32 %v1721_v33, %v1581_v32 }
  0x40   :  { %v1591_v42 = vld [vmem:[%s2562_s1 + $0x3f8] sm:$0xf0]  ;;  %v1519_v51 = vld [vmem:[%s2562_s1 + $0x370] sm:$0xf0]  ;;  %v1525_v52 = vld [vmem:[%s2562_s1 + $0x338] sm:$0xf] }
  0x41   :  { %879 = vmatpush.bf16.msrb.mxu0 %v1102_v1  ;;  %892 = vmatpush.bf16.msrb.mxu1 %v1106_v5  ;;  %v1322_v1 = vor.u32 %v1648_v57, %v1319_v58  ;;  %v1632_v5 = vld [vmem:[%s2562_s1 + $0x12c] sm:$0xf]  ;;  %v1698_v54 = vld [vmem:[%s2562_s1 + $0x33c] sm:$0xf]  ;;  %v1455_v63 = vld [vmem:[%s2562_s1 + $0x2f0] sm:$0xf0] }
  0x42   :  { %905 = vmatpush.bf16.msrb.mxu2 %v1110_v6  ;;  %v1255_v6 = vld [vmem:[%s2562_s1 + $0x168] sm:$0xf0]  ;;  %v1527_v55 = vld [vmem:[%s2562_s1 + $0x378] sm:$0xf0]  ;;  %v1461_v0 = vld [vmem:[%s2562_s1 + $0x2b8] sm:$0xf] }
  0x43   :  { %918 = vmatpush.bf16.msrb.mxu3 %v1114_v10  ;;  %v1254_v10 = vor.u32 %v1640_v4, %v1253_v3  ;;  %v1258_v14 = vor.u32 %v1632_v5, %v1255_v6  ;;  %v1530_v62 = vor.u32 %v1698_v54, %v1527_v55  ;;  %v1682_v2 = vld [vmem:[%s2562_s1 + $0x2bc] sm:$0xf]  ;;  %v1261_v32 = vld [vmem:[%s2562_s1 + $0x130] sm:$0xf] }
  0x44   :  { %880 = vmatmul.bf16.vlgmr.msrb.gmra.mxu0 %v2019_v7  ;;  %893 = vmatmul.bf16.vlgmr.msrb.gmra.mxu1 %v2019_v7  ;;  %v1463_v3 = vld [vmem:[%s2562_s1 + $0x2f8] sm:$0xf0]  ;;  %v1641_v33 = vld [vmem:[%s2562_s1 + $0x16c] sm:$0xf0] }
  0x45   :  { %924 = vmatpush.bf16.msra.mxu0 %v1566_v11  ;;  %937 = vmatpush.bf16.msra.mxu1 %v1570_v12  ;;  %v1181_v11 = vld [vmem:[%s2562_s1 + $0xa0] sm:$0xf] }
  0x46   :  { %950 = vmatpush.bf16.msra.mxu2 %v1574_v13  ;;  %919 = vmatmul.bf16.vlgmr.msrb.gmra.mxu3 %v2019_v7  ;;  %v1623_v12 = vld [vmem:[%s2562_s1 + $0xdc] sm:$0xf0]  ;;  %v1615_v13 = vld [vmem:[%s2562_s1 + $0xa4] sm:$0xf] }
  0x47   :  { %963 = vmatpush.bf16.msra.mxu3 %v1578_v17  ;;  %906 = vmatmul.bf16.vlgmr.msrb.gmra.mxu2 %v2019_v7  ;;  %v1624_v17 = vld [vmem:[%s2562_s1 + $0xe4] sm:$0xf0]  ;;  %v1182_v20 = vor.u32 %v1623_v12, %v1181_v11  ;;  %v1466_v11 = vor.u32 %v1682_v2, %v1463_v3  ;;  %v1391_v12 = vld [vmem:[%s2562_s1 + $0x270] sm:$0xf0] }
  0x49   :  { %925 = vmatpush.bf16.msra.mxu0 %v1502_v23  ;;  %938 = vmatpush.bf16.msra.mxu1 %v1506_v24  ;;  %v1186_v23 = vor.u32 %v1615_v13, %v1183_v15  ;;  %v1190_v24 = vor.u32 %v1624_v17, %v1189_v16  ;;  %v1397_v13 = vld [vmem:[%s2562_s1 + $0x238] sm:$0xf]  ;;  %v1666_v15 = vld [vmem:[%s2562_s1 + $0x23c] sm:$0xf] }
  0x4a   :  { %951 = vmatpush.bf16.msra.mxu2 %v1510_v25  ;;  %v1599_v25 = vld [vmem:[%s2562_s1 + $0x24] sm:$0xf]  ;;  %v1399_v16 = vld [vmem:[%s2562_s1 + $0x278] sm:$0xf0] }
  0x4b   :  { %964 = vmatpush.bf16.msra.mxu3 %v1514_v29  ;;  %v1608_v29 = vld [vmem:[%s2562_s1 + $0x64] sm:$0xf0]  ;;  %v1122_v39 = vor.u32 %v1599_v25, %v1119_v26  ;;  %v1333_v25 = vld [vmem:[%s2562_s1 + $0x1b8] sm:$0xf] }
  0x4c   :  { %v1126_v40 = vor.u32 %v1608_v29, %v1125_v27  ;;  %v1658_v26 = vld [vmem:[%s2562_s1 + $0x1f4] sm:$0xf0]  ;;  %v1650_v27 = vld [vmem:[%s2562_s1 + $0x1bc] sm:$0xf] }
  0x4d   :  { %926 = vmatpush.bf16.msra.mxu0 %v1438_v35  ;;  %939 = vmatpush.bf16.msra.mxu1 %v1442_v36  ;;  %v1118_v35 = vor.u32 %v1607_v22, %v1117_v21  ;;  %v1583_v36 = vld [vmem:[%s2562_s1 + $0x3f0] sm:$0xf0]  ;;  %v1657_v21 = vld [vmem:[%s2562_s1 + $0x1ec] sm:$0xf0]  ;;  %v1334_v31 = vor.u32 %v1658_v26, %v1333_v25 }
  0x4e   :  { %952 = vmatpush.bf16.msra.mxu2 %v1446_v37  ;;  %v1589_v37 = vld [vmem:[%s2562_s1 + $0x3b8] sm:$0xf]  ;;  %v1586_v45 = vor.u32 %v1713_v34, %v1583_v36  ;;  %v1649_v22 = vld [vmem:[%s2562_s1 + $0x1b4] sm:$0xf] }
  0x4f   :  { %965 = vmatpush.bf16.msra.mxu3 %v1450_v41  ;;  %v1714_v41 = vld [vmem:[%s2562_s1 + $0x3bc] sm:$0xf]  ;;  %v1590_v46 = vor.u32 %v1722_v38, %v1589_v37  ;;  %v1633_v34 = vld [vmem:[%s2562_s1 + $0x134] sm:$0xf]  ;;  %v1269_v37 = vld [vmem:[%s2562_s1 + $0x138] sm:$0xf] }
  0x50   :  { %v1594_v50 = vor.u32 %v1714_v41, %v1591_v42  ;;  %v1263_v36 = vld [vmem:[%s2562_s1 + $0x170] sm:$0xf0]  ;;  %v1642_v38 = vld [vmem:[%s2562_s1 + $0x174] sm:$0xf0]  ;;  %v1262_v41 = vor.u32 %v1641_v33, %v1261_v32 }
  0x51   :  { %927 = vmatpush.bf16.msra.mxu0 %v1374_v47  ;;  %940 = vmatpush.bf16.msra.mxu1 %v1378_v48  ;;  %v1517_v47 = vld [vmem:[%s2562_s1 + $0x330] sm:$0xf]  ;;  %v1266_v42 = vor.u32 %v1633_v34, %v1263_v36 }
  0x52   :  { %953 = vmatpush.bf16.msra.mxu2 %v1382_v49  ;;  %v1705_v48 = vld [vmem:[%s2562_s1 + $0x36c] sm:$0xf0]  ;;  %v1697_v49 = vld [vmem:[%s2562_s1 + $0x334] sm:$0xf] }
  0x53   :  { %966 = vmatpush.bf16.msra.mxu3 %v1386_v53  ;;  %v1706_v53 = vld [vmem:[%s2562_s1 + $0x374] sm:$0xf0]  ;;  %v1518_v56 = vor.u32 %v1705_v48, %v1517_v47  ;;  %v1522_v57 = vor.u32 %v1697_v49, %v1519_v51  ;;  %v1199_v48 = vld [vmem:[%s2562_s1 + $0xf0] sm:$0xf0]  ;;  %v1618_v51 = vld [vmem:[%s2562_s1 + $0xbc] sm:$0xf] }
  0x54   :  { %v1526_v58 = vor.u32 %v1706_v53, %v1525_v52  ;;  %v1205_v49 = vld [vmem:[%s2562_s1 + $0xb8] sm:$0xf]  ;;  %v1207_v52 = vld [vmem:[%s2562_s1 + $0xf8] sm:$0xf0] }
  0x55   :  { %928 = vmatpush.bf16.msra.mxu0 %v1310_v59  ;;  %941 = vmatpush.bf16.msra.mxu1 %v1314_v60  ;;  %v1453_v59 = vld [vmem:[%s2562_s1 + $0x2b0] sm:$0xf] }
  0x56   :  { %954 = vmatpush.bf16.msra.mxu2 %v1318_v61  ;;  %v1689_v60 = vld [vmem:[%s2562_s1 + $0x2ec] sm:$0xf0]  ;;  %v1681_v61 = vld [vmem:[%s2562_s1 + $0x2b4] sm:$0xf] }
  0x57   :  { %967 = vmatpush.bf16.msra.mxu3 %v1322_v1  ;;  %v1690_v1 = vld [vmem:[%s2562_s1 + $0x2f4] sm:$0xf0]  ;;  %v1454_v4 = vor.u32 %v1689_v60, %v1453_v59  ;;  %v1458_v5 = vor.u32 %v1681_v61, %v1455_v63  ;;  %v1210_v59 = vor.u32 %v1618_v51, %v1207_v52  ;;  %v1135_v60 = vld [vmem:[%s2562_s1 + $0x70] sm:$0xf0]  ;;  %v1602_v63 = vld [vmem:[%s2562_s1 + $0x3c] sm:$0xf] }
  0x58   :  { %v1462_v6 = vor.u32 %v1690_v1, %v1461_v0  ;;  %v1141_v61 = vld [vmem:[%s2562_s1 + $0x38] sm:$0xf]  ;;  %v1143_v0 = vld [vmem:[%s2562_s1 + $0x78] sm:$0xf0] }
  0x59   :  { %929 = vmatpush.bf16.msra.mxu0 %v1246_v8  ;;  %942 = vmatpush.bf16.msra.mxu1 %v1250_v9  ;;  %v1389_v8 = vld [vmem:[%s2562_s1 + $0x230] sm:$0xf] }
  0x5a   :  { %955 = vmatpush.bf16.msra.mxu2 %v1254_v10  ;;  %v1673_v9 = vld [vmem:[%s2562_s1 + $0x26c] sm:$0xf0]  ;;  %v1665_v10 = vld [vmem:[%s2562_s1 + $0x234] sm:$0xf] }
  0x5b   :  { %968 = vmatpush.bf16.msra.mxu3 %v1258_v14  ;;  %v1674_v14 = vld [vmem:[%s2562_s1 + $0x274] sm:$0xf0]  ;;  %v1390_v17 = vor.u32 %v1673_v9, %v1389_v8  ;;  %v1394_v18 = vor.u32 %v1665_v10, %v1391_v12 }
  0x5c   :  { %v1398_v19 = vor.u32 %v1674_v14, %v1397_v13 }
  0x5d   :  { %930 = vmatpush.bf16.msra.mxu0 %v1182_v20  ;;  %943 = vmatpush.bf16.msra.mxu1 %v1186_v23  ;;  %v1325_v20 = vld [vmem:[%s2562_s1 + $0x1b0] sm:$0xf]  ;;  %v1402_v23 = vor.u32 %v1666_v15, %v1399_v16 }
  0x5e   :  { %956 = vmatpush.bf16.msra.mxu2 %v1190_v24  ;;  %v1327_v24 = vld [vmem:[%s2562_s1 + $0x1f0] sm:$0xf0]  ;;  %v1326_v29 = vor.u32 %v1657_v21, %v1325_v20 }
  0x5f   :  { %969 = vmatpush.bf16.msra.mxu3 %v1194_v28  ;;  %v1335_v28 = vld [vmem:[%s2562_s1 + $0x1f8] sm:$0xf0]  ;;  %v1330_v30 = vor.u32 %v1649_v22, %v1327_v24 }
  0x61   :  { %931 = vmatpush.bf16.msra.mxu0 %v1118_v35  ;;  %944 = vmatpush.bf16.msra.mxu1 %v1122_v39  ;;  %v1338_v35 = vor.u32 %v1650_v27, %v1335_v28  ;;  %v1634_v39 = vld [vmem:[%s2562_s1 + $0x13c] sm:$0xf] }
  0x62   :  { %957 = vmatpush.bf16.msra.mxu2 %v1126_v40  ;;  %v1271_v40 = vld [vmem:[%s2562_s1 + $0x178] sm:$0xf0] }
  0x63   :  { %970 = vmatpush.bf16.msra.mxu3 %v1130_v43  ;;  %v1270_v43 = vor.u32 %v1642_v38, %v1269_v37  ;;  %v1274_v47 = vor.u32 %v1634_v39, %v1271_v40 }
  0x64   :  { %932 = vmatmul.bf16.vlgmr.msra.gmra.mxu0 %v2019_v7  ;;  %945 = vmatmul.bf16.vlgmr.msra.gmra.mxu1 %v2019_v7 }
  0x65   :  { %976 = vmatpush.bf16.msrb.mxu0 %v1582_v44  ;;  %989 = vmatpush.bf16.msrb.mxu1 %v1586_v45  ;;  %v1197_v44 = vld [vmem:[%s2562_s1 + $0xb0] sm:$0xf] }
  0x66   :  { %1002 = vmatpush.bf16.msrb.mxu2 %v1590_v46  ;;  %971 = vmatmul.bf16.vlgmr.msra.gmra.mxu3 %v2019_v7  ;;  %v1625_v45 = vld [vmem:[%s2562_s1 + $0xec] sm:$0xf0]  ;;  %v1617_v46 = vld [vmem:[%s2562_s1 + $0xb4] sm:$0xf] }
  0x67   :  { %1015 = vmatpush.bf16.msrb.mxu3 %v1594_v50  ;;  %958 = vmatmul.bf16.vlgmr.msra.gmra.mxu2 %v2019_v7  ;;  %v1626_v50 = vld [vmem:[%s2562_s1 + $0xf4] sm:$0xf0]  ;;  %v1198_v53 = vor.u32 %v1625_v45, %v1197_v44  ;;  %v1202_v54 = vor.u32 %v1617_v46, %v1199_v48 }
  0x68   :  { %v1206_v55 = vor.u32 %v1626_v50, %v1205_v49  ;;  %v145_v50 = vld [vmem:[%s2564_s2 + $0x8] sm:$0xff] }
  0x69   :  { %977 = vmatpush.bf16.msrb.mxu0 %v1518_v56  ;;  %990 = vmatpush.bf16.msrb.mxu1 %v1522_v57  ;;  %v1133_v56 = vld [vmem:[%s2562_s1 + $0x30] sm:$0xf]  ;;  %v157_v51 = vperm.slane %v145_v50, 1 }
  0x6a   :  { %1003 = vmatpush.bf16.msrb.mxu2 %v1526_v58  ;;  %v1609_v57 = vld [vmem:[%s2562_s1 + $0x6c] sm:$0xf0]  ;;  %v1601_v58 = vld [vmem:[%s2562_s1 + $0x34] sm:$0xf] }
  0x6b   :  { %1016 = vmatpush.bf16.msrb.mxu3 %v1530_v62  ;;  %v1610_v62 = vld [vmem:[%s2562_s1 + $0x74] sm:$0xf0]  ;;  %v1134_v1 = vor.u32 %v1609_v57, %v1133_v56  ;;  %v1138_v2 = vor.u32 %v1601_v58, %v1135_v60  ;;  %v158_v56 = vperm.slane %v145_v50, 2  ;;  %v159_v57 = vperm.slane %v145_v50, 3 }
  0x6c   :  { %v1142_v3 = vor.u32 %v1610_v62, %v1141_v61 }
  0x6d   :  { %978 = vmatpush.bf16.msrb.mxu0 %v1454_v4  ;;  %991 = vmatpush.bf16.msrb.mxu1 %v1458_v5  ;;  %v1146_v4 = vor.u32 %v1602_v63, %v1143_v0  ;;  %v144_v5 = vld [vmem:[%s2564_s2] sm:$0xff] }
  0x6e   :  { %1004 = vmatpush.bf16.msrb.mxu2 %v1462_v6  ;;  %v149_v6 = vperm.slane %v144_v5, 1  ;;  %v148_v8 = vperm.slane %v144_v5, 0  ;;  %v150_v12 = vperm.slane %v144_v5, 2  ;;  %v151_v13 = vperm.slane %v144_v5, 3 }
  0x6f   :  { %1017 = vmatpush.bf16.msrb.mxu3 %v1466_v11  ;;  %v153_v28 = vperm.slane %v144_v5, 5  ;;  %v154_v33 = vperm.slane %v144_v5, 6  ;;  %v155_v34 = vperm.slane %v144_v5, 7 }
  0x71   :  { %979 = vmatpush.bf16.msrb.mxu0 %v1390_v17  ;;  %992 = vmatpush.bf16.msrb.mxu1 %v1394_v18 }
  0x72   :  { %1005 = vmatpush.bf16.msrb.mxu2 %v1398_v19 }
  0x73   :  { %1018 = vmatpush.bf16.msrb.mxu3 %v1402_v23 }
  0x75   :  { %980 = vmatpush.bf16.msrb.mxu0 %v1326_v29  ;;  %993 = vmatpush.bf16.msrb.mxu1 %v1330_v30  ;;  %v152_v30 = vperm.slane %v144_v5, 4 }
  0x76   :  { %1006 = vmatpush.bf16.msrb.mxu2 %v1334_v31 }
  0x77   :  { %1019 = vmatpush.bf16.msrb.mxu3 %v1338_v35 }
  0x79   :  { %981 = vmatpush.bf16.msrb.mxu0 %v1262_v41  ;;  %994 = vmatpush.bf16.msrb.mxu1 %v1266_v42 }
  0x7a   :  { %1007 = vmatpush.bf16.msrb.mxu2 %v1270_v43 }
  0x7b   :  { %1020 = vmatpush.bf16.msrb.mxu3 %v1274_v47 }
  0x7d   :  { %982 = vmatpush.bf16.msrb.mxu0 %v1198_v53  ;;  %995 = vmatpush.bf16.msrb.mxu1 %v1202_v54  ;;  %v156_v53 = vperm.slane %v145_v50, 0 }
  0x7e   :  { %1008 = vmatpush.bf16.msrb.mxu2 %v1206_v55 }
  0x7f   :  { %1021 = vmatpush.bf16.msrb.mxu3 %v1210_v59 }
  0x81   :  { %983 = vmatpush.bf16.msrb.mxu0 %v1134_v1  ;;  %996 = vmatpush.bf16.msrb.mxu1 %v1138_v2 }
  0x82   :  { %1009 = vmatpush.bf16.msrb.mxu2 %v1142_v3 }
  0x83   :  { %1022 = vmatpush.bf16.msrb.mxu3 %v1146_v4 }
  0x84   :  { %984 = vmatmul.bf16.vlgmr.msrb.gmra.mxu0 %v2019_v7  ;;  %997 = vmatmul.bf16.vlgmr.msrb.gmra.mxu1 %v2019_v7 }
  0x85   :  { %1010 = vmatmul.bf16.vlgmr.msrb.gmra.mxu2 %v2019_v7 }
  0x86   :  { %1023 = vmatmul.bf16.vlgmr.msrb.gmra.mxu3 %v2019_v7 }
  0xa1   :  { %v842_v9 = vpop.f32.mrf.mxu1  ;;  %v829_v11 = vpop.f32.mrf.mxu0 }
  0xa2   :  { %v843_v10 = vadd.f32 %v842_v9, %v149_v6  ;;  %v830_v14 = vadd.f32 %v829_v11, %v148_v8  ;;  %v161_v11 = vperm.slane %v145_v50, 5 }
  0xa4   :  { %v1044_v15 = vrot.slane %v843_v10, 6 }
  0xa6   :  { %v1057_v7 = vsel %vm1056_vm0, %v830_v14, %v1044_v15  ;;  %v160_v14 = vperm.slane %v145_v50, 4 }
  0xa9   :  { %v868_v17 = vpop.f32.mrf.mxu3  ;;  %v844_v22 = vpop.f32.mrf.mxu1 }
  0xaa   :  { %v855_v16 = vpop.f32.mrf.mxu2  ;;  %v869_v19 = vadd.f32 %v868_v17, %v151_v13  ;;  %v831_v24 = vpop.f32.mrf.mxu0  ;;  %v162_v13 = vperm.slane %v145_v50, 6 }
  0xab   :  { %v856_v18 = vadd.f32 %v855_v16, %v150_v12  ;;  %v163_v16 = vperm.slane %v145_v50, 7 }
  0xac   :  { %v1046_v21 = vrot.slane %v869_v19, 2 }
  0xad   :  { %v1045_v20 = vrot.slane %v856_v18, 4 }
  0xaf   :  { %v1059_v23 = vsel %vm1058_vm1, %v1045_v20, %v1046_v21 }
  0xb0   :  { %v1061_v25 = vsel %vm1060_vm2, %v1057_v7, %v1059_v23 }
  0xb1   :  { %1075 = vst [vmem:[%s2565_s3] sm:$0xff] %v1061_v25  ;;  %v870_v27 = vpop.f32.mrf.mxu3 }
  0xb2   :  { %v857_v26 = vpop.f32.mrf.mxu2 }
  0xc1   :  { %v881_v29 = vpop.f32.mrf.mxu0  ;;  %v894_v31 = vpop.f32.mrf.mxu1 }
  0xc2   :  { %v895_v32 = vadd.f32 %v894_v31, %v153_v28  ;;  %v882_v35 = vadd.f32 %v881_v29, %v152_v30 }
  0xc4   :  { %v1047_v36 = vrot.slane %v895_v32, 6 }
  0xc6   :  { %v1062_v43 = vsel %vm1056_vm0, %v882_v35, %v1047_v36 }
  0xc9   :  { %v920_v39 = vpop.f32.mrf.mxu3  ;;  %v883_v42 = vpop.f32.mrf.mxu0 }
  0xca   :  { %v907_v37 = vpop.f32.mrf.mxu2  ;;  %v921_v40 = vadd.f32 %v920_v39, %v155_v34  ;;  %v896_v45 = vpop.f32.mrf.mxu1 }
  0xcb   :  { %v908_v38 = vadd.f32 %v907_v37, %v154_v33 }
  0xcc   :  { %v1049_v44 = vrot.slane %v921_v40, 2 }
  0xcd   :  { %v1048_v41 = vrot.slane %v908_v38, 4 }
  0xcf   :  { %v1063_v46 = vsel %vm1058_vm1, %v1048_v41, %v1049_v44 }
  0xd0   :  { %v1064_v47 = vsel %vm1060_vm2, %v1062_v43, %v1063_v46 }
  0xd1   :  { %1076 = vst [vmem:[%s2565_s3 + $0x8] sm:$0xff] %v1064_v47  ;;  %v922_v49 = vpop.f32.mrf.mxu3 }
  0xd2   :  { %v909_v48 = vpop.f32.mrf.mxu2 }
  0xe1   :  { %v933_v52 = vpop.f32.mrf.mxu0  ;;  %v946_v54 = vpop.f32.mrf.mxu1 }
  0xe2   :  { %v947_v55 = vadd.f32 %v946_v54, %v157_v51  ;;  %v934_v58 = vadd.f32 %v933_v52, %v156_v53 }
  0xe4   :  { %v1050_v59 = vrot.slane %v947_v55, 6 }
  0xe6   :  { %v1065_v2 = vsel %vm1056_vm0, %v934_v58, %v1050_v59 }
  0xe9   :  { %v972_v62 = vpop.f32.mrf.mxu3  ;;  %v935_v1 = vpop.f32.mrf.mxu0 }
  0xea   :  { %v959_v60 = vpop.f32.mrf.mxu2  ;;  %v973_v63 = vadd.f32 %v972_v62, %v159_v57  ;;  %v948_v4 = vpop.f32.mrf.mxu1 }
  0xeb   :  { %v960_v61 = vadd.f32 %v959_v60, %v158_v56 }
  0xec   :  { %v1052_v3 = vrot.slane %v973_v63, 2 }
  0xed   :  { %v1051_v0 = vrot.slane %v960_v61, 4 }
  0xef   :  { %v1066_v5 = vsel %vm1058_vm1, %v1051_v0, %v1052_v3 }
  0xf0   :  { %v1067_v6 = vsel %vm1060_vm2, %v1065_v2, %v1066_v5 }
  0xf1   :  { %1077 = vst [vmem:[%s2565_s3 + $0x10] sm:$0xff] %v1067_v6  ;;  %v974_v9 = vpop.f32.mrf.mxu3 }
  0xf2   :  { %v961_v8 = vpop.f32.mrf.mxu2 }
 0x101   :  { %v985_v10 = vpop.f32.mrf.mxu0  ;;  %v998_v12 = vpop.f32.mrf.mxu1 }
 0x102   :  { %v999_v15 = vadd.f32 %v998_v12, %v161_v11  ;;  %v986_v20 = vadd.f32 %v985_v10, %v160_v14 }
 0x104   :  { %v1053_v21 = vrot.slane %v999_v15, 6 }
 0x106   :  { %v1068_v26 = vsel %vm1056_vm0, %v986_v20, %v1053_v21 }
 0x108   :  { %v1011_v17 = vpop.f32.mrf.mxu2 }
 0x109   :  { %v1012_v18 = vadd.f32 %v1011_v17, %v162_v13  ;;  %v1024_v19 = vpop.f32.mrf.mxu3  ;;  %v987_v7 = vpop.f32.mrf.mxu0 }
 0x10a   :  { %v1025_v22 = vadd.f32 %v1024_v19, %v163_v16  ;;  %v1000_v23 = vpop.f32.mrf.mxu1 }
 0x10b   :  { %v1054_v24 = vrot.slane %v1012_v18, 4 }
 0x10c   :  { %v1055_v25 = vrot.slane %v1025_v22, 2 }
 0x10e   :  { %v1069_v27 = vsel %vm1058_vm1, %v1054_v24, %v1055_v25 }
 0x10f   :  { %v1070_v28 = vsel %vm1060_vm2, %v1068_v26, %v1069_v27 }
 0x110   :  { %1078 = vst [vmem:[%s2565_s3 + $0x18] sm:$0xff] %v1070_v28  ;;  %v1013_v29 = vpop.f32.mrf.mxu2 }
 0x111   :  { %v1026_v30 = vpop.f32.mrf.mxu3 }

// kernel: _lambda_.7
= control target key start
LH: loop header
LB: loop body
LE: loop exit
PB: predicated region body
PF: predicated region fallthrough
CT: control target
= control target key end

     0   :  { %s1716_s27 = smov 0   ;;  %s2322_s0 = inlined_call_operand.vmem [shape: f32[2,64,32], index: 0, kind: input, shape index: {}]   ;;  %s2323_s1 = inlined_call_operand.vmem [shape: s32[2,64,32], index: 1, kind: input, shape index: {}]   ;;  %s2324_s2 = inlined_call_operand.vmem [shape: bf16[4,32,256], index: 2, kind: input, shape index: {}]   ;;  %s2325_s3 = inlined_call_operand.vmem [shape: f32[1,256], index: 3, kind: input, shape index: {}]   ;;  %s2326_s4 = inlined_call_operand.vmem [shape: f32[1,256], index: 4, kind: input, shape index: {}]   ;;  %s2327_s5 = inlined_call_operand.vmem [shape: bf16[256,192], index: 5, kind: input, shape index: {}]   ;;  %s2328_s6 = inlined_call_operand.vmem [shape: f32[1,192], index: 6, kind: input, shape index: {}]   ;;  %s2329_s7 = inlined_call_operand.vmem [shape: f32[1,192], index: 7, kind: input, shape index: {}]   ;;  %s2330_s8 = inlined_call_operand.vmem [shape: f32[2,64,192], index: 8, kind: output, shape index: {}]  }
   0x1 LB: > { %s1355_s28 = sadd.s32 4294967295, %s1669_s27   ;;  %p1359_p0 = scmp.ge.s32.totalorder %s1669_s27, 1  ;;  %s1669_s27 = sphi %s1716_s27, %s18_s27  }
   0x2   : > { %p272_p1 = scmp.lt.s32.totalorder %s1669_s27, 3 }
   0x4   : > { %p273_p2 = pnand %p1359_p0, %p272_p1 }
   0x5   : > { %p311_p3 = scmp.lt.s32.totalorder (!%p273_p2), %s1355_s28, 1 }
   0x6   : > { %276 = sbr.rel (%p273_p2) target bundleno = 440 (0x1b8), region = 52 }
   0xb   : > { %v1380_v0 = vld [vmem:[%s2324_s2 + $0x30] sm:$0xf]  ;;  %v1614_v1 = vld [vmem:[%s2324_s2 + $0x34] sm:$0xf0]  ;;  %v1613_v2 = vld [vmem:[%s2324_s2 + $0x34] sm:$0xf] }
   0xc   : > { %v1381_v3 = vor.u32 %v1614_v1, %v1380_v0  ;;  %v1382_v4 = vld [vmem:[%s2324_s2 + $0x38] sm:$0xf0]  ;;  %v1404_v5 = vld [vmem:[%s2324_s2 + $0x10] sm:$0xf]  ;;  %v1610_v6 = vld [vmem:[%s2324_s2 + $0x14] sm:$0xf0] }
   0xd   : > { %v1385_v7 = vor.u32 %v1613_v2, %v1382_v4  ;;  %v1405_v8 = vor.u32 %v1610_v6, %v1404_v5  ;;  %v1609_v9 = vld [vmem:[%s2324_s2 + $0x14] sm:$0xf]  ;;  %v1406_v10 = vld [vmem:[%s2324_s2 + $0x18] sm:$0xf0]  ;;  %v1372_v11 = vld [vmem:[%s2324_s2 + $0x20] sm:$0xf] }
   0xe   : > { %431 = vmatpush.bf16.msra.mxu0 %v1381_v3  ;;  %v1409_v12 = vor.u32 %v1609_v9, %v1406_v10  ;;  %v1612_v13 = vld [vmem:[%s2324_s2 + $0x24] sm:$0xf0]  ;;  %v1611_v14 = vld [vmem:[%s2324_s2 + $0x24] sm:$0xf]  ;;  %v1374_v15 = vld [vmem:[%s2324_s2 + $0x28] sm:$0xf0] }
   0xf   : > { %460 = vmatpush.bf16.msra.mxu1 %v1385_v7  ;;  %521 = vmatpush.bf16.msra.mxu2 %v1405_v8  ;;  %v1373_v16 = vor.u32 %v1612_v13, %v1372_v11  ;;  %v1377_v17 = vor.u32 %v1611_v14, %v1374_v15  ;;  %v1396_v18 = vld [vmem:[%s2324_s2] sm:$0xf]  ;;  %v1608_v19 = vld [vmem:[%s2324_s2 + $0x4] sm:$0xf0]  ;;  %v1607_v20 = vld [vmem:[%s2324_s2 + $0x4] sm:$0xf] }
  0x10   : > { %550 = vmatpush.bf16.msra.mxu3 %v1409_v12  ;;  %v1397_v21 = vor.u32 %v1608_v19, %v1396_v18  ;;  %v1398_v22 = vld [vmem:[%s2324_s2 + $0x8] sm:$0xf0]  ;;  %v1460_v23 = vld [vmem:[%s2324_s2 + $0x70] sm:$0xf]  ;;  %v1622_v25 = vld [vmem:[%s2324_s2 + $0x74] sm:$0xf0] }
  0x11   : > { %v1401_v24 = vor.u32 %v1607_v20, %v1398_v22  ;;  %v1621_v26 = vld [vmem:[%s2324_s2 + $0x74] sm:$0xf]  ;;  %v1462_v27 = vld [vmem:[%s2324_s2 + $0x78] sm:$0xf0]  ;;  %s2332_s28 = smov (!%p311_p3, %s1355_s28), 1  ;;  %v1461_v28 = vor.u32 %v1622_v25, %v1460_v23  ;;  %vm412_vm4 = vcmask 261120  }
  0x12   : > { %432 = vmatpush.bf16.msra.mxu0 %v1373_v16  ;;  %v1465_v29 = vor.u32 %v1621_v26, %v1462_v27  ;;  %v1432_v30 = vld [vmem:[%s2324_s2 + $0x50] sm:$0xf]  ;;  %v1618_v31 = vld [vmem:[%s2324_s2 + $0x54] sm:$0xf0]  ;;  %v1617_v33 = vld [vmem:[%s2324_s2 + $0x54] sm:$0xf] }
  0x13   : > { %461 = vmatpush.bf16.msra.mxu1 %v1377_v17  ;;  %522 = vmatpush.bf16.msra.mxu2 %v1397_v21  ;;  %v1433_v32 = vor.u32 %v1618_v31, %v1432_v30  ;;  %v1434_v34 = vld [vmem:[%s2324_s2 + $0x58] sm:$0xf0]  ;;  %s1604_s15 = sshll.u32 %s2332_s28, 6  ;;  %v1452_v47 = vld [vmem:[%s2324_s2 + $0x60] sm:$0xf]  ;;  %s1606_s14 = sshll.u32 %s2332_s28, 7 }
  0x14   : > { %551 = vmatpush.bf16.msra.mxu3 %v1401_v24  ;;  %v1437_v35 = vor.u32 %v1617_v33, %v1434_v34  ;;  %s1806_s18 = scalar_lea.vmem %s2322_s0, %s1604_s15  ;;  %s1811_s21 = scalar_lea.vmem %s2323_s1, %s1604_s15  ;;  %v1620_v49 = vld [vmem:[%s2324_s2 + $0x64] sm:$0xf0]  ;;  %v1619_v50 = vld [vmem:[%s2324_s2 + $0x64] sm:$0xf]  ;;  %v1454_v52 = vld [vmem:[%s2324_s2 + $0x68] sm:$0xf0] }
  0x15   : > { %v1814_v36 = vld [vmem:[%s1806_s18] sm:$0xff]  ;;  %v1817_v37 = vld [vmem:[%s1806_s18 + $0x8] sm:$0xff]  ;;  %v1838_v46 = vld [vmem:[%s1811_s21 + $0x10] sm:$0xff]  ;;  %v1453_v51 = vor.u32 %v1620_v49, %v1452_v47  ;;  %v1457_v55 = vor.u32 %v1619_v50, %v1454_v52  ;;  %s2259_s17 = scalar_lea.vmem %s2330_s8, %s1606_s14 }
  0x16   : > { %636 = vmatpush.bf16.msrb.mxu0 %v1433_v32  ;;  %v1820_v38 = vld [vmem:[%s1811_s21] sm:$0xff]  ;;  %v1823_v39 = vld [vmem:[%s1811_s21 + $0x8] sm:$0xff]  ;;  %v1844_v48 = vld [vmem:[%s1811_s21 + $0x18] sm:$0xff]  ;;  %vm369_vm5 = vcmp.eq.s32.totalorder %v1838_v46, 1  ;;  %vm345_vm7 = vcmp.eq.s32.totalorder %v1838_v46, 0 }
  0x17   : > { %767 = vmatpush.bf16.msrb.mxu2 %v1461_v28  ;;  %665 = vmatpush.bf16.msrb.mxu1 %v1437_v35  ;;  %vm367_vm0 = vcmp.eq.s32.totalorder %v1820_v38, 1  ;;  %vm343_vm1 = vcmp.eq.s32.totalorder %v1820_v38, 0  ;;  %vm368_vm2 = vcmp.eq.s32.totalorder %v1823_v39, 1  ;;  %vm344_vm3 = vcmp.eq.s32.totalorder %v1823_v39, 0  ;;  %v1424_v53 = vld [vmem:[%s2324_s2 + $0x40] sm:$0xf] }
  0x18   : > { %796 = vmatpush.bf16.msrb.mxu3 %v1465_v29  ;;  %v375_v40 = vsel %vm367_vm0, %v1814_v36, 0.0  ;;  %v351_v41 = vsel %vm343_vm1, %v1814_v36, 0.0  ;;  %v376_v42 = vsel %vm368_vm2, %v1817_v37, 0.0  ;;  %v352_v43 = vsel %vm344_vm3, %v1817_v37, 0.0  ;;  %v1616_v54 = vld [vmem:[%s2324_s2 + $0x44] sm:$0xf0] }
  0x19   : > { %v383_v44 = vpack.c.bf16 %v376_v42, %v375_v40  ;;  %v359_v45 = vpack.c.bf16 %v352_v43, %v351_v41  ;;  %v1425_v56 = vor.u32 %v1616_v54, %v1424_v53  ;;  %v1615_v57 = vld [vmem:[%s2324_s2 + $0x44] sm:$0xf]  ;;  %v1426_v58 = vld [vmem:[%s2324_s2 + $0x48] sm:$0xf0]  ;;  %v1868_v60 = vld [vmem:[%s1806_s18 + $0x10] sm:$0xff]  ;;  %vm370_vm6 = vcmp.eq.s32.totalorder %v1844_v48, 1 }
  0x1a   : > { %v1429_v59 = vor.u32 %v1615_v57, %v1426_v58  ;;  %v1871_v61 = vld [vmem:[%s1806_s18 + $0x18] sm:$0xff]  ;;  %vm346_vm8 = vcmp.eq.s32.totalorder %v1844_v48, 0  ;;  %v377_v62 = vsel %vm369_vm5, %v1868_v60, 0.0  ;;  %v353_v0 = vsel %vm345_vm7, %v1868_v60, 0.0  ;;  %v339_v6 = vld [vmem:[%s1811_s21 + $0x20] sm:$0xff]  ;;  %v340_v7 = vld [vmem:[%s1811_s21 + $0x28] sm:$0xff] }
  0x1b   : > { %1386 = vmatmul.msk.bf16.vlgmr.msra.gmra.mxu0 %vm412_vm4, %v383_v44  ;;  %1390 = vmatmul.msk.bf16.vlgmr.msra.gmra.mxu1 %vm412_vm4, %v383_v44  ;;  %v378_v63 = vsel %vm370_vm6, %v1871_v61, 0.0  ;;  %v354_v1 = vsel %vm346_vm8, %v1871_v61, 0.0  ;;  %vm573_vm9 = vcmp.eq.s32.totalorder %v1820_v38, 2  ;;  %vm574_vm10 = vcmp.eq.s32.totalorder %v1823_v39, 2  ;;  %v331_v9 = vld [vmem:[%s1806_s18 + $0x20] sm:$0xff]  ;;  %v332_v10 = vld [vmem:[%s1806_s18 + $0x28] sm:$0xff] }
  0x1c   : > { %1410 = vmatmul.msk.bf16.vlgmr.msra.gmra.mxu2 %vm412_vm4, %v359_v45  ;;  %1414 = vmatmul.msk.bf16.vlgmr.msra.gmra.mxu3 %vm412_vm4, %v359_v45  ;;  %v384_v2 = vpack.c.bf16 %v378_v63, %v377_v62  ;;  %v360_v3 = vpack.c.bf16 %v354_v1, %v353_v0  ;;  %v581_v4 = vsel %vm573_vm9, %v1814_v36, 0.0  ;;  %v582_v5 = vsel %vm574_vm10, %v1817_v37, 0.0  ;;  %v341_v22 = vld [vmem:[%s1811_s21 + $0x30] sm:$0xff]  ;;  %v342_v23 = vld [vmem:[%s1811_s21 + $0x38] sm:$0xff]  ;;  %v1526_v62 = vld [vmem:[%s2327_s5 + $0x68] sm:$0xf0] }
  0x1d   : > { %768 = vmatpush.bf16.msrb.mxu2 %v1453_v51  ;;  %797 = vmatpush.bf16.msrb.mxu3 %v1457_v55  ;;  %v589_v8 = vpack.c.bf16 %v582_v5, %v581_v4  ;;  %vm371_vm11 = vcmp.eq.s32.totalorder %v339_v6, 1  ;;  %vm372_vm12 = vcmp.eq.s32.totalorder %v340_v7, 1  ;;  %vm347_vm13 = vcmp.eq.s32.totalorder %v339_v6, 0  ;;  %v333_v25 = vld [vmem:[%s1806_s18 + $0x30] sm:$0xff]  ;;  %v334_v26 = vld [vmem:[%s1806_s18 + $0x38] sm:$0xff] }
  0x1e   : > { %637 = vmatpush.bf16.msrb.mxu0 %v1425_v56  ;;  %666 = vmatpush.bf16.msrb.mxu1 %v1429_v59  ;;  %vm348_vm14 = vcmp.eq.s32.totalorder %v340_v7, 0  ;;  %v379_v11 = vsel %vm371_vm11, %v331_v9, 0.0  ;;  %v380_v12 = vsel %vm372_vm12, %v332_v10, 0.0  ;;  %v355_v13 = vsel %vm347_vm13, %v331_v9, 0.0  ;;  %v1534_v49 = vld [vmem:[%s2327_s5 + $0x78] sm:$0xf0] }
  0x1f   : > { %v356_v14 = vsel %vm348_vm14, %v332_v10, 0.0  ;;  %v385_v15 = vpack.c.bf16 %v380_v12, %v379_v11  ;;  %vm704_vm15 = vcmp.eq.s32.totalorder %v1820_v38, 3  ;;  %vm705_vm0 = vcmp.eq.s32.totalorder %v1823_v39, 3  ;;  %v1653_v50 = vld [vmem:[%s2327_s5 + $0xf4] sm:$0xf] }
  0x20   : > { %v361_v16 = vpack.c.bf16 %v356_v14, %v355_v13  ;;  %v712_v17 = vsel %vm704_vm15, %v1814_v36, 0.0  ;;  %v713_v18 = vsel %vm705_vm0, %v1817_v37, 0.0  ;;  %vm575_vm1 = vcmp.eq.s32.totalorder %v1838_v46, 2  ;;  %v1598_v52 = vld [vmem:[%s2327_s5 + $0xf8] sm:$0xf0] }
  0x21   : > { %v720_v19 = vpack.c.bf16 %v713_v18, %v712_v17  ;;  %vm576_vm2 = vcmp.eq.s32.totalorder %v1844_v48, 2  ;;  %v583_v20 = vsel %vm575_vm1, %v1868_v60, 0.0  ;;  %vm373_vm3 = vcmp.eq.s32.totalorder %v341_v22, 1  ;;  %v1532_v56 = vld [vmem:[%s2327_s5 + $0x70] sm:$0xf] }
  0x22   : > { %v584_v21 = vsel %vm576_vm2, %v1871_v61, 0.0  ;;  %vm374_vm5 = vcmp.eq.s32.totalorder %v342_v23, 1  ;;  %vm349_vm6 = vcmp.eq.s32.totalorder %v341_v22, 0  ;;  %vm350_vm7 = vcmp.eq.s32.totalorder %v342_v23, 0  ;;  %v1638_v57 = vld [vmem:[%s2327_s5 + $0x74] sm:$0xf0] }
  0x23   : > { %v590_v24 = vpack.c.bf16 %v584_v21, %v583_v20  ;;  %v381_v27 = vsel %vm373_vm3, %v333_v25, 0.0  ;;  %v382_v28 = vsel %vm374_vm5, %v334_v26, 0.0  ;;  %v357_v29 = vsel %vm349_vm6, %v333_v25, 0.0  ;;  %v1596_v58 = vld [vmem:[%s2327_s5 + $0xf0] sm:$0xf] }
  0x24   : > { %v358_v30 = vsel %vm350_vm7, %v334_v26, 0.0  ;;  %v386_v31 = vpack.c.bf16 %v382_v28, %v381_v27  ;;  %vm706_vm8 = vcmp.eq.s32.totalorder %v1838_v46, 3  ;;  %vm707_vm9 = vcmp.eq.s32.totalorder %v1844_v48, 3  ;;  %v1637_v48 = vld [vmem:[%s2327_s5 + $0x74] sm:$0xf] }
  0x25   : > { %v362_v32 = vpack.c.bf16 %v358_v30, %v357_v29  ;;  %v714_v33 = vsel %vm706_vm8, %v1868_v60, 0.0  ;;  %v715_v34 = vsel %vm707_vm9, %v1871_v61, 0.0  ;;  %vm577_vm10 = vcmp.eq.s32.totalorder %v339_v6, 2  ;;  %v1654_v60 = vld [vmem:[%s2327_s5 + $0xf4] sm:$0xf0] }
  0x26   : > { %v721_v35 = vpack.c.bf16 %v715_v34, %v714_v33  ;;  %vm578_vm11 = vcmp.eq.s32.totalorder %v340_v7, 2  ;;  %v585_v36 = vsel %vm577_vm10, %v331_v9, 0.0  ;;  %vm708_vm12 = vcmp.eq.s32.totalorder %v339_v6, 3  ;;  %v1635_v61 = vld [vmem:[%s2327_s5 + $0x64] sm:$0xf] }
  0x27   : > { %v586_v37 = vsel %vm578_vm11, %v332_v10, 0.0  ;;  %vm709_vm13 = vcmp.eq.s32.totalorder %v340_v7, 3  ;;  %v716_v39 = vsel %vm708_vm12, %v331_v9, 0.0  ;;  %vm579_vm14 = vcmp.eq.s32.totalorder %v341_v22, 2  ;;  %v1651_v1 = vld [vmem:[%s2327_s5 + $0xe4] sm:$0xf] }
  0x28   : > { %v591_v38 = vpack.c.bf16 %v586_v37, %v585_v36  ;;  %v717_v40 = vsel %vm709_vm13, %v332_v10, 0.0  ;;  %vm580_vm15 = vcmp.eq.s32.totalorder %v342_v23, 2  ;;  %vm710_vm0 = vcmp.eq.s32.totalorder %v341_v22, 3  ;;  %v1524_v10 = vld [vmem:[%s2327_s5 + $0x60] sm:$0xf] }
  0x29   : > { %v722_v41 = vpack.c.bf16 %v717_v40, %v716_v39  ;;  %vm711_vm1 = vcmp.eq.s32.totalorder %v342_v23, 3  ;;  %v587_v42 = vsel %vm579_vm14, %v333_v25, 0.0  ;;  %v588_v43 = vsel %vm580_vm15, %v334_v26, 0.0  ;;  %v1636_v11 = vld [vmem:[%s2327_s5 + $0x64] sm:$0xf0] }
  0x2a   : > { %v718_v44 = vsel %vm710_vm0, %v333_v25, 0.0  ;;  %v719_v45 = vsel %vm711_vm1, %v334_v26, 0.0  ;;  %v592_v46 = vpack.c.bf16 %v588_v43, %v587_v42  ;;  %v1537_v51 = vor.u32 %v1637_v48, %v1534_v49  ;;  %v1588_v12 = vld [vmem:[%s2327_s5 + $0xe0] sm:$0xf]  ;;  %v1652_v14 = vld [vmem:[%s2327_s5 + $0xe4] sm:$0xf0] }
  0x2b   : > { %1387 = vmatmul.msk.bf16.gmra.mxu0 %vm412_vm4, %v384_v2  ;;  %1391 = vmatmul.msk.bf16.gmra.mxu1 %vm412_vm4, %v384_v2  ;;  %v723_v47 = vpack.c.bf16 %v719_v45, %v718_v44  ;;  %v1601_v53 = vor.u32 %v1653_v50, %v1598_v52  ;;  %v1533_v59 = vor.u32 %v1638_v57, %v1532_v56  ;;  %v1590_v2 = vld [vmem:[%s2327_s5 + $0xe8] sm:$0xf0]  ;;  %v1582_v20 = vld [vmem:[%s2327_s5 + $0xd8] sm:$0xf0]  ;;  %v1516_v26 = vld [vmem:[%s2327_s5 + $0x50] sm:$0xf] }
  0x2c   : > { %1411 = vmatmul.msk.bf16.gmra.mxu2 %vm412_vm4, %v360_v3  ;;  %1415 = vmatmul.msk.bf16.gmra.mxu3 %vm412_vm4, %v360_v3  ;;  %v1597_v63 = vor.u32 %v1654_v60, %v1596_v58  ;;  %v1529_v0 = vor.u32 %v1635_v61, %v1526_v62  ;;  %v1593_v3 = vor.u32 %v1651_v1, %v1590_v2  ;;  %v1634_v27 = vld [vmem:[%s2327_s5 + $0x54] sm:$0xf0]  ;;  %v1580_v28 = vld [vmem:[%s2327_s5 + $0xd0] sm:$0xf]  ;;  %v1574_v36 = vld [vmem:[%s2327_s5 + $0xc8] sm:$0xf0] }
  0x2d   : > { %1153 = vmatpush.bf16.msra.mxu2 %v1537_v51  ;;  %1182 = vmatpush.bf16.msra.mxu3 %v1601_v53  ;;  %v1525_v13 = vor.u32 %v1636_v11, %v1524_v10  ;;  %v1589_v17 = vor.u32 %v1652_v14, %v1588_v12  ;;  %v1517_v29 = vor.u32 %v1634_v27, %v1516_v26  ;;  %v1650_v30 = vld [vmem:[%s2327_s5 + $0xd4] sm:$0xf0]  ;;  %v1508_v44 = vld [vmem:[%s2327_s5 + $0x40] sm:$0xf]  ;;  %v1632_v45 = vld [vmem:[%s2327_s5 + $0x44] sm:$0xf0] }
  0x2e   : > { %1095 = vmatpush.bf16.msra.mxu0 %v1533_v59  ;;  %1124 = vmatpush.bf16.msra.mxu1 %v1597_v63  ;;  %v1581_v33 = vor.u32 %v1650_v30, %v1580_v28  ;;  %v1648_v48 = vld [vmem:[%s2327_s5 + $0xc4] sm:$0xf0]  ;;  %v1629_v49 = vld [vmem:[%s2327_s5 + $0x34] sm:$0xf]  ;;  %v1502_v50 = vld [vmem:[%s2327_s5 + $0x38] sm:$0xf0] }
  0x2f   : > { %v1505_v52 = vor.u32 %v1629_v49, %v1502_v50  ;;  %v1645_v53 = vld [vmem:[%s2327_s5 + $0xb4] sm:$0xf]  ;;  %v1500_v60 = vld [vmem:[%s2327_s5 + $0x30] sm:$0xf]  ;;  %v1630_v61 = vld [vmem:[%s2327_s5 + $0x34] sm:$0xf0] }
  0x30   : > { %v1564_v62 = vld [vmem:[%s2327_s5 + $0xb0] sm:$0xf]  ;;  %v1501_v63 = vor.u32 %v1630_v61, %v1500_v60  ;;  %v1627_v1 = vld [vmem:[%s2327_s5 + $0x24] sm:$0xf]  ;;  %v1494_v2 = vld [vmem:[%s2327_s5 + $0x28] sm:$0xf0] }
  0x31   : > { %1154 = vmatpush.bf16.msra.mxu2 %v1529_v0  ;;  %1183 = vmatpush.bf16.msra.mxu3 %v1593_v3  ;;  %v1646_v0 = vld [vmem:[%s2327_s5 + $0xb4] sm:$0xf0]  ;;  %v1558_v10 = vld [vmem:[%s2327_s5 + $0xa8] sm:$0xf0]  ;;  %v1625_v26 = vld [vmem:[%s2327_s5 + $0x14] sm:$0xf] }
  0x32   : > { %1096 = vmatpush.bf16.msra.mxu0 %v1525_v13  ;;  %1125 = vmatpush.bf16.msra.mxu1 %v1589_v17  ;;  %v1565_v3 = vor.u32 %v1646_v0, %v1564_v62  ;;  %v1486_v27 = vld [vmem:[%s2327_s5 + $0x18] sm:$0xf0]  ;;  %v1641_v28 = vld [vmem:[%s2327_s5 + $0x94] sm:$0xf]  ;;  %v1542_v50 = vld [vmem:[%s2327_s5 + $0x88] sm:$0xf0] }
  0x36   : > { %1097 = vmatpush.bf16.msra.mxu0 %v1517_v29  ;;  %1126 = vmatpush.bf16.msra.mxu1 %v1581_v33 }
  0x3b   : > { %1388 = vmatmul.msk.bf16.gmra.mxu0 %vm412_vm4, %v385_v15  ;;  %1392 = vmatmul.msk.bf16.gmra.mxu1 %vm412_vm4, %v385_v15  ;;  %v1633_v15 = vld [vmem:[%s2327_s5 + $0x54] sm:$0xf] }
  0x3c   : > { %1412 = vmatmul.msk.bf16.gmra.mxu2 %vm412_vm4, %v361_v16  ;;  %1416 = vmatmul.msk.bf16.gmra.mxu3 %vm412_vm4, %v361_v16  ;;  %v1518_v16 = vld [vmem:[%s2327_s5 + $0x58] sm:$0xf0] }
  0x3d   : > { %v1521_v18 = vor.u32 %v1633_v15, %v1518_v16 }
  0x3f   : > { %1155 = vmatpush.bf16.msra.mxu2 %v1521_v18  ;;  %v1492_v18 = vld [vmem:[%s2327_s5 + $0x20] sm:$0xf] }
  0x4b   : > { %1389 = vmatmul.msk.bf16.gmra.mxu0 %vm412_vm4, %v386_v31  ;;  %1393 = vmatmul.msk.bf16.gmra.mxu1 %vm412_vm4, %v386_v31  ;;  %v1631_v31 = vld [vmem:[%s2327_s5 + $0x44] sm:$0xf] }
  0x4c   : > { %1413 = vmatmul.msk.bf16.gmra.mxu2 %vm412_vm4, %v362_v32  ;;  %1417 = vmatmul.msk.bf16.gmra.mxu3 %vm412_vm4, %v362_v32  ;;  %v1510_v32 = vld [vmem:[%s2327_s5 + $0x48] sm:$0xf0] }
  0x4d   : > { %v1513_v34 = vor.u32 %v1631_v31, %v1510_v32  ;;  %v1489_v31 = vor.u32 %v1625_v26, %v1486_v27  ;;  %v1550_v32 = vld [vmem:[%s2327_s5 + $0x98] sm:$0xf0] }
  0x4f   : > { %1156 = vmatpush.bf16.msra.mxu2 %v1513_v34 }
  0x53   : > { %1157 = vmatpush.bf16.msra.mxu2 %v1505_v52  ;;  %v1624_v52 = vld [vmem:[%s2327_s5 + $0x4] sm:$0xf0] }
  0x5b   : > { %1438 = vmatmul.msk.bf16.vlgmr.msrb.gmra.mxu0 %vm412_vm4, %v589_v8  ;;  %1442 = vmatmul.msk.bf16.vlgmr.msrb.gmra.mxu1 %vm412_vm4, %v589_v8 }
  0x5c   : > { %1466 = vmatmul.msk.bf16.vlgmr.msrb.gmra.mxu2 %vm412_vm4, %v720_v19  ;;  %1470 = vmatmul.msk.bf16.vlgmr.msrb.gmra.mxu3 %vm412_vm4, %v720_v19  ;;  %v1649_v19 = vld [vmem:[%s2327_s5 + $0xd4] sm:$0xf] }
  0x5d   : > { %v1585_v21 = vor.u32 %v1649_v19, %v1582_v20  ;;  %v1628_v19 = vld [vmem:[%s2327_s5 + $0x24] sm:$0xf0]  ;;  %v1556_v20 = vld [vmem:[%s2327_s5 + $0xa0] sm:$0xf] }
  0x5f   : > { %1184 = vmatpush.bf16.msra.mxu3 %v1585_v21  ;;  %v1493_v21 = vor.u32 %v1628_v19, %v1492_v18 }
  0x6b   : > { %1439 = vmatmul.msk.bf16.gmra.mxu0 %vm412_vm4, %v590_v24  ;;  %1443 = vmatmul.msk.bf16.gmra.mxu1 %vm412_vm4, %v590_v24 }
  0x6c   : > { %1467 = vmatmul.msk.bf16.gmra.mxu2 %vm412_vm4, %v721_v35  ;;  %1471 = vmatmul.msk.bf16.gmra.mxu3 %vm412_vm4, %v721_v35  ;;  %v1647_v35 = vld [vmem:[%s2327_s5 + $0xc4] sm:$0xf] }
  0x6d   : > { %v1577_v37 = vor.u32 %v1647_v35, %v1574_v36  ;;  %v1553_v35 = vor.u32 %v1641_v28, %v1550_v32  ;;  %v1484_v36 = vld [vmem:[%s2327_s5 + $0x10] sm:$0xf] }
  0x6f   : > { %1185 = vmatpush.bf16.msra.mxu3 %v1577_v37  ;;  %v1626_v37 = vld [vmem:[%s2327_s5 + $0x14] sm:$0xf0] }
  0x7b   : > { %1440 = vmatmul.msk.bf16.gmra.mxu0 %vm412_vm4, %v591_v38  ;;  %1444 = vmatmul.msk.bf16.gmra.mxu1 %vm412_vm4, %v591_v38 }
  0x7c   : > { %1468 = vmatmul.msk.bf16.gmra.mxu2 %vm412_vm4, %v722_v41  ;;  %1472 = vmatmul.msk.bf16.gmra.mxu3 %vm412_vm4, %v722_v41 }
  0x8b   : > { %1441 = vmatmul.msk.bf16.gmra.mxu0 %vm412_vm4, %v592_v46  ;;  %1445 = vmatmul.msk.bf16.gmra.mxu1 %vm412_vm4, %v592_v46  ;;  %v1572_v46 = vld [vmem:[%s2327_s5 + $0xc0] sm:$0xf] }
  0x8c   : > { %1469 = vmatmul.msk.bf16.gmra.mxu2 %vm412_vm4, %v723_v47  ;;  %1473 = vmatmul.msk.bf16.gmra.mxu3 %vm412_vm4, %v723_v47  ;;  %v1509_v47 = vor.u32 %v1632_v45, %v1508_v44  ;;  %v1573_v51 = vor.u32 %v1648_v48, %v1572_v46  ;;  %v1642_v44 = vld [vmem:[%s2327_s5 + $0x94] sm:$0xf0]  ;;  %v1623_v46 = vld [vmem:[%s2327_s5 + $0x4] sm:$0xf]  ;;  %vm1272_vm4 = vcmask 523264  }
  0x8d   : > { %v1639_v48 = vld [vmem:[%s2327_s5 + $0x84] sm:$0xf] }
  0x8e   : > { %1098 = vmatpush.bf16.msra.mxu0 %v1509_v47  ;;  %1127 = vmatpush.bf16.msra.mxu1 %v1573_v51  ;;  %v1478_v47 = vld [vmem:[%s2327_s5 + $0x8] sm:$0xf0]  ;;  %v1476_v51 = vld [vmem:[%s2327_s5] sm:$0xf] }
  0x8f   : > { %v1481_v49 = vor.u32 %v1623_v46, %v1478_v47 }
  0x92   : > { %1099 = vmatpush.bf16.msra.mxu0 %v1501_v63  ;;  %1128 = vmatpush.bf16.msra.mxu1 %v1565_v3 }
  0x96   : > { %1100 = vmatpush.bf16.msra.mxu0 %v1493_v21 }
  0x98   : > { %v434_v54 = vpop.f32.mrf.mxu0  ;;  %v463_v55 = vpop.f32.mrf.mxu1 }
  0x9f   : > { %v524_v4 = vpop.f32.mrf.mxu2  ;;  %v553_v5 = vpop.f32.mrf.mxu3 }
  0xa0   : > { %v1969_v6 = vadd.f32 %v524_v4, %v434_v54  ;;  %v1971_v7 = vadd.f32 %v553_v5, %v463_v55  ;;  %v1973_v8 = vpop.f32.mrf.mxu0  ;;  %v1975_v9 = vpop.f32.mrf.mxu1  ;;  %v1566_v54 = vld [vmem:[%s2327_s5 + $0xb8] sm:$0xf0]  ;;  %v1497_v4 = vor.u32 %v1627_v1, %v1494_v2  ;;  %v1643_v5 = vld [vmem:[%s2327_s5 + $0xa4] sm:$0xf] }
  0xa1   : > { %v1569_v55 = vor.u32 %v1645_v53, %v1566_v54  ;;  %v1561_v11 = vor.u32 %v1643_v5, %v1558_v10  ;;  %v1545_v53 = vor.u32 %v1639_v48, %v1542_v50  ;;  %v1477_v54 = vor.u32 %v1624_v52, %v1476_v51 }
  0xa2   : > { %1158 = vmatpush.bf16.msra.mxu2 %v1497_v4 }
  0xa3   : > { %1186 = vmatpush.bf16.msra.mxu3 %v1569_v55  ;;  %v1540_v55 = vld [vmem:[%s2327_s5 + $0x80] sm:$0xf] }
  0xa6   : > { %1159 = vmatpush.bf16.msra.mxu2 %v1489_v31 }
  0xa7   : > { %v2001_v22 = vpop.f32.mrf.mxu2  ;;  %v2003_v23 = vpop.f32.mrf.mxu3  ;;  %1187 = vmatpush.bf16.msra.mxu3 %v1561_v11  ;;  %v835_v11 = vld [vmem:[%s2325_s3] sm:$0x3] }
  0xa8   : > { %v439_v24 = vpop.f32.mrf.mxu0  ;;  %v468_v25 = vpop.f32.mrf.mxu1  ;;  %v2183_v27 = vperm.slane %v835_v11, 1  ;;  %v527_v28 = vadd.f32 %v2001_v22, %v1973_v8 }
  0xaa   : > { %1160 = vmatpush.bf16.msra.mxu2 %v1481_v49 }
  0xab   : > { %1188 = vmatpush.bf16.msra.mxu3 %v1553_v35 }
  0xaf   : > { %v529_v38 = vpop.f32.mrf.mxu2  ;;  %v558_v39 = vpop.f32.mrf.mxu3  ;;  %1189 = vmatpush.bf16.msra.mxu3 %v1545_v53 }
  0xb0   : > { %v2029_v40 = vadd.f32 %v529_v38, %v439_v24  ;;  %v2031_v41 = vadd.f32 %v558_v39, %v468_v25  ;;  %v2033_v42 = vpop.f32.mrf.mxu0  ;;  %v2035_v43 = vpop.f32.mrf.mxu1  ;;  %v1644_v24 = vld [vmem:[%s2327_s5 + $0xa4] sm:$0xf0]  ;;  %v1548_v38 = vld [vmem:[%s2327_s5 + $0x90] sm:$0xf]  ;;  %v1485_v39 = vor.u32 %v1626_v37, %v1484_v36 }
  0xb1   : > { %v1557_v25 = vor.u32 %v1644_v24, %v1556_v20  ;;  %v1549_v45 = vor.u32 %v1642_v44, %v1548_v38  ;;  %v2178_v24 = vperm.slane %v835_v11, 0 }
  0xb2   : > { %1101 = vmatpush.bf16.msra.mxu0 %v1485_v39 }
  0xb3   : > { %1129 = vmatpush.bf16.msra.mxu1 %v1557_v25  ;;  %v857_v25 = vld [vmem:[%s2326_s4] sm:$0x3] }
  0xb4   : > { %v2189_v31 = vperm.slane %v857_v25, 0 }
  0xb6   : > { %1102 = vmatpush.bf16.msra.mxu0 %v1477_v54 }
  0xb7   : > { %v2061_v56 = vpop.f32.mrf.mxu2  ;;  %v2063_v57 = vpop.f32.mrf.mxu3  ;;  %1130 = vmatpush.bf16.msra.mxu1 %v1549_v45 }
  0xb8   : > { %v444_v58 = vpop.f32.mrf.mxu0  ;;  %v473_v59 = vpop.f32.mrf.mxu1  ;;  %v561_v11 = vadd.f32 %v2063_v57, %v2035_v43 }
  0xbf   : > { %v534_v12 = vpop.f32.mrf.mxu2  ;;  %v563_v13 = vpop.f32.mrf.mxu3 }
  0xc0   : > { %v2089_v14 = vadd.f32 %v534_v12, %v444_v58  ;;  %v2091_v15 = vadd.f32 %v563_v13, %v473_v59  ;;  %v2093_v16 = vpop.f32.mrf.mxu0  ;;  %v2095_v17 = vpop.f32.mrf.mxu1  ;;  %v1640_v58 = vld [vmem:[%s2327_s5 + $0x84] sm:$0xf0] }
  0xc1   : > { %v1541_v61 = vor.u32 %v1640_v58, %v1540_v55 }
  0xc3   : > { %1131 = vmatpush.bf16.msra.mxu1 %v1541_v61 }
  0xc7   : > { %v2118_v29 = vpop.f32.mrf.mxu2  ;;  %v2120_v30 = vpop.f32.mrf.mxu3 }
  0xc8   : > { %v449_v33 = vpop.f32.mrf.mxu0  ;;  %v478_v34 = vpop.f32.mrf.mxu1 }
  0xcf   : > { %v539_v59 = vpop.f32.mrf.mxu2  ;;  %v568_v60 = vpop.f32.mrf.mxu3 }
  0xd0   : > { %v2161_v62 = vadd.f32 %v539_v59, %v449_v33  ;;  %v2163_v63 = vadd.f32 %v568_v60, %v478_v34  ;;  %v2165_v0 = vpop.f32.mrf.mxu0  ;;  %v2167_v1 = vpop.f32.mrf.mxu1 }
  0xd7   : > { %v2169_v2 = vpop.f32.mrf.mxu2  ;;  %v2171_v3 = vpop.f32.mrf.mxu3 }
  0xd8   : > { %v639_v4 = vpop.f32.mrf.mxu0  ;;  %v668_v5 = vpop.f32.mrf.mxu1 }
  0xd9   : > { %v688_v13 = vadd.f32 %v639_v4, %v1969_v6  ;;  %v689_v18 = vadd.f32 %v668_v5, %v1971_v7  ;;  %v556_v6 = vadd.f32 %v2003_v23, %v1975_v9  ;;  %v2191_v7 = vperm.slane %v857_v25, 1 }
  0xdf   : > { %v770_v10 = vpop.f32.mrf.mxu2  ;;  %v799_v12 = vpop.f32.mrf.mxu3 }
  0xe0   : > { %v641_v19 = vpop.f32.mrf.mxu0  ;;  %v670_v20 = vpop.f32.mrf.mxu1  ;;  %v819_v21 = vadd.f32 %v770_v10, %v688_v13  ;;  %v820_v26 = vadd.f32 %v799_v12, %v689_v18  ;;  %v532_v10 = vadd.f32 %v2061_v56, %v2033_v42 }
  0xe1   : > { %v690_v34 = vadd.f32 %v641_v19, %v527_v28  ;;  %v691_v35 = vadd.f32 %v670_v20, %v556_v6 }
  0xe2   : > { %v841_v32 = vmul.f32 %v2178_v24, %v819_v21  ;;  %v842_v33 = vmul.f32 %v2183_v27, %v820_v26 }
  0xe4   : > { %v863_v8 = vadd.f32 %v2189_v31, %v841_v32  ;;  %v864_v9 = vadd.f32 %v2191_v7, %v842_v33 }
  0xe6   : > { %v879_v48 = vmax.f32 %v863_v8, 0.0  ;;  %v880_v49 = vmax.f32 %v864_v9, 0.0 }
  0xe7   : > { %v772_v36 = vpop.f32.mrf.mxu2  ;;  %v801_v37 = vpop.f32.mrf.mxu3 }
  0xe8   : > { %v821_v38 = vadd.f32 %v772_v36, %v690_v34  ;;  %v822_v39 = vadd.f32 %v801_v37, %v691_v35  ;;  %v644_v44 = vpop.f32.mrf.mxu0  ;;  %v673_v45 = vpop.f32.mrf.mxu1 }
  0xe9   : > { %v692_v58 = vadd.f32 %v644_v44, %v2029_v40  ;;  %v693_v59 = vadd.f32 %v673_v45, %v2031_v41 }
  0xea   : > { %v843_v22 = vmul.f32 %v2178_v24, %v821_v38  ;;  %v844_v23 = vmul.f32 %v2183_v27, %v822_v39 }
  0xec   : > { %v865_v46 = vadd.f32 %v2189_v31, %v843_v22  ;;  %v866_v47 = vadd.f32 %v2191_v7, %v844_v23 }
  0xee   : > { %v881_v50 = vmax.f32 %v865_v46, 0.0  ;;  %v882_v51 = vmax.f32 %v866_v47, 0.0  ;;  %v537_v46 = vadd.f32 %v2118_v29, %v2093_v16  ;;  %v566_v47 = vadd.f32 %v2120_v30, %v2095_v17 }
  0xef   : > { %v775_v52 = vpop.f32.mrf.mxu2  ;;  %v804_v53 = vpop.f32.mrf.mxu3 }
  0xf0   : > { %v895_v54 = vpack.c.bf16 %v881_v50, %v879_v48  ;;  %v896_v55 = vpack.c.bf16 %v882_v51, %v880_v49  ;;  %v646_v60 = vpop.f32.mrf.mxu0  ;;  %v675_v61 = vpop.f32.mrf.mxu1  ;;  %v823_v4 = vadd.f32 %v775_v52, %v692_v58  ;;  %v824_v5 = vadd.f32 %v804_v53, %v693_v59 }
  0xf1   : > { %v694_v13 = vadd.f32 %v646_v60, %v532_v10  ;;  %v695_v41 = vadd.f32 %v675_v61, %v561_v11 }
  0xf2   : > { %1103 = vmatmul.bf16.vlgmr.msra.gmra.mxu0 %v895_v54  ;;  %1132 = vmatmul.bf16.vlgmr.msra.gmra.mxu1 %v896_v55  ;;  %v845_v12 = vmul.f32 %v2178_v24, %v823_v4  ;;  %v846_v40 = vmul.f32 %v2183_v27, %v824_v5 }
  0xf3   : > { %1161 = vmatmul.bf16.vlgmr.msra.gmra.mxu2 %v895_v54  ;;  %1190 = vmatmul.bf16.vlgmr.msra.gmra.mxu3 %v896_v55 }
  0xf4   : > { %v867_v42 = vadd.f32 %v2189_v31, %v845_v12  ;;  %v868_v43 = vadd.f32 %v2191_v7, %v846_v40 }
  0xf6   : > { %v883_v32 = vmax.f32 %v867_v42, 0.0  ;;  %v884_v34 = vmax.f32 %v868_v43, 0.0 }
  0xf7   : > { %v777_v18 = vpop.f32.mrf.mxu2  ;;  %v806_v19 = vpop.f32.mrf.mxu3 }
  0xf8   : > { %v825_v20 = vadd.f32 %v777_v18, %v694_v13  ;;  %v826_v21 = vadd.f32 %v806_v19, %v695_v41  ;;  %v649_v25 = vpop.f32.mrf.mxu0  ;;  %v678_v26 = vpop.f32.mrf.mxu1 }
  0xf9   : > { %v696_v38 = vadd.f32 %v649_v25, %v2089_v14  ;;  %v697_v39 = vadd.f32 %v678_v26, %v2091_v15  ;;  %v542_v25 = vadd.f32 %v2169_v2, %v2165_v0  ;;  %v571_v26 = vadd.f32 %v2171_v3, %v2167_v1 }
  0xfa   : > { %v847_v28 = vmul.f32 %v2178_v24, %v825_v20  ;;  %v848_v6 = vmul.f32 %v2183_v27, %v826_v21 }
  0xfc   : > { %v869_v56 = vadd.f32 %v2189_v31, %v847_v28  ;;  %v870_v57 = vadd.f32 %v2191_v7, %v848_v6 }
  0xfe   : > { %v885_v33 = vmax.f32 %v869_v56, 0.0  ;;  %v886_v35 = vmax.f32 %v870_v57, 0.0 }
  0xff   : > { %v780_v36 = vpop.f32.mrf.mxu2  ;;  %v809_v37 = vpop.f32.mrf.mxu3 }
 0x100   : > { %v651_v44 = vpop.f32.mrf.mxu0  ;;  %v680_v45 = vpop.f32.mrf.mxu1  ;;  %v897_v8 = vpack.c.bf16 %v885_v33, %v883_v32  ;;  %v898_v9 = vpack.c.bf16 %v886_v35, %v884_v34  ;;  %v827_v22 = vadd.f32 %v780_v36, %v696_v38  ;;  %v828_v23 = vadd.f32 %v809_v37, %v697_v39 }
 0x101   : > { %v698_v48 = vadd.f32 %v651_v44, %v537_v46  ;;  %v699_v49 = vadd.f32 %v680_v45, %v566_v47 }
 0x102   : > { %1108 = vmatmul.bf16.gmra.mxu0 %v897_v8  ;;  %1137 = vmatmul.bf16.gmra.mxu1 %v898_v9  ;;  %v849_v14 = vmul.f32 %v2178_v24, %v827_v22  ;;  %v850_v15 = vmul.f32 %v2183_v27, %v828_v23 }
 0x103   : > { %1166 = vmatmul.bf16.gmra.mxu2 %v897_v8  ;;  %1195 = vmatmul.bf16.gmra.mxu3 %v898_v9 }
 0x104   : > { %v871_v16 = vadd.f32 %v2189_v31, %v849_v14  ;;  %v872_v17 = vadd.f32 %v2191_v7, %v850_v15 }
 0x106   : > { %v887_v60 = vmax.f32 %v871_v16, 0.0  ;;  %v888_v4 = vmax.f32 %v872_v17, 0.0 }
 0x107   : > { %v782_v50 = vpop.f32.mrf.mxu2  ;;  %v811_v51 = vpop.f32.mrf.mxu3 }
 0x108   : > { %v829_v52 = vadd.f32 %v782_v50, %v698_v48  ;;  %v830_v53 = vadd.f32 %v811_v51, %v699_v49  ;;  %v654_v54 = vpop.f32.mrf.mxu0  ;;  %v683_v55 = vpop.f32.mrf.mxu1 }
 0x109   : > { %v700_v12 = vadd.f32 %v654_v54, %v2161_v62  ;;  %v701_v40 = vadd.f32 %v683_v55, %v2163_v63 }
 0x10a   : > { %v851_v58 = vmul.f32 %v2178_v24, %v829_v52  ;;  %v852_v59 = vmul.f32 %v2183_v27, %v830_v53 }
 0x10c   : > { %v873_v29 = vadd.f32 %v2189_v31, %v851_v58  ;;  %v874_v30 = vadd.f32 %v2191_v7, %v852_v59 }
 0x10e   : > { %v889_v61 = vmax.f32 %v873_v29, 0.0  ;;  %v890_v5 = vmax.f32 %v874_v30, 0.0 }
 0x10f   : > { %v785_v10 = vpop.f32.mrf.mxu2  ;;  %v814_v11 = vpop.f32.mrf.mxu3 }
 0x110   : > { %v899_v13 = vpack.c.bf16 %v889_v61, %v887_v60  ;;  %v900_v41 = vpack.c.bf16 %v890_v5, %v888_v4  ;;  %v831_v18 = vadd.f32 %v785_v10, %v700_v12  ;;  %v832_v19 = vadd.f32 %v814_v11, %v701_v40  ;;  %v656_v20 = vpop.f32.mrf.mxu0  ;;  %v685_v21 = vpop.f32.mrf.mxu1 }
 0x111   : > { %v702_v28 = vadd.f32 %v656_v20, %v542_v25  ;;  %v703_v6 = vadd.f32 %v685_v21, %v571_v26 }
 0x112   : > { %1113 = vmatmul.bf16.gmra.mxu0 %v899_v13  ;;  %1142 = vmatmul.bf16.gmra.mxu1 %v900_v41  ;;  %v853_v62 = vmul.f32 %v2178_v24, %v831_v18  ;;  %v854_v63 = vmul.f32 %v2183_v27, %v832_v19 }
 0x113   : > { %1171 = vmatmul.bf16.gmra.mxu2 %v899_v13  ;;  %1200 = vmatmul.bf16.gmra.mxu3 %v900_v41 }
 0x114   : > { %v875_v34 = vadd.f32 %v2189_v31, %v853_v62  ;;  %v876_v0 = vadd.f32 %v2191_v7, %v854_v63 }
 0x116   : > { %v891_v3 = vmax.f32 %v875_v34, 0.0  ;;  %v892_v36 = vmax.f32 %v876_v0, 0.0 }
 0x117   : > { %v787_v42 = vpop.f32.mrf.mxu2  ;;  %v816_v43 = vpop.f32.mrf.mxu3 }
 0x118   : > { %v833_v56 = vadd.f32 %v787_v42, %v702_v28  ;;  %v834_v57 = vadd.f32 %v816_v43, %v703_v6 }
 0x11a   : > { %v855_v32 = vmul.f32 %v2178_v24, %v833_v56  ;;  %v856_v33 = vmul.f32 %v2183_v27, %v834_v57  ;;  %v1211_v24 = vld [vmem:[%s2328_s6] sm:$0x3] }
 0x11b   : > { %v1233_v27 = vld [vmem:[%s2329_s7] sm:$0x3]  ;;  %v2261_v23 = vperm.slane %v1211_v24, 1 }
 0x11c   : > { %v877_v1 = vadd.f32 %v2189_v31, %v855_v32  ;;  %v878_v2 = vadd.f32 %v2191_v7, %v856_v33  ;;  %v2249_v31 = vperm.slane %v1211_v24, 0  ;;  %v2251_v8 = vperm.slane %v1233_v27, 0 }
 0x11d   : > { %v2263_v48 = vperm.slane %v1233_v27, 1 }
 0x11e   : > { %v893_v35 = vmax.f32 %v877_v1, 0.0  ;;  %v894_v37 = vmax.f32 %v878_v2, 0.0 }
 0x120   : > { %v901_v38 = vpack.c.bf16 %v893_v35, %v891_v3  ;;  %v902_v39 = vpack.c.bf16 %v894_v37, %v892_v36 }
 0x122   : > { %1118 = vmatmul.bf16.gmra.mxu0 %v901_v38  ;;  %1147 = vmatmul.bf16.gmra.mxu1 %v902_v39 }
 0x123   : > { %1176 = vmatmul.bf16.gmra.mxu2 %v901_v38  ;;  %1205 = vmatmul.bf16.gmra.mxu3 %v902_v39 }
 0x16f   : > { %v1104_v7 = vpop.f32.mrf.mxu0  ;;  %v1133_v44 = vpop.f32.mrf.mxu1 }
 0x170   : > { %v1134_v45 = vadd.f32 %v1133_v44, %v1104_v7 }
 0x172   : > { %v1217_v9 = vmul.f32 %v2249_v31, %v1134_v45 }
 0x174   : > { %v1239_v22 = vadd.f32 %v2251_v8, %v1217_v9 }
 0x176   : > { %v1255_v46 = vmax.f32 %v1239_v22, 0.0  ;;  %v1162_v47 = vpop.f32.mrf.mxu2  ;;  %v1191_v14 = vpop.f32.mrf.mxu3 }
 0x177   : > { %v1192_v15 = vadd.f32 %v1191_v14, %v1162_v47  ;;  %v1106_v49 = vpop.f32.mrf.mxu0  ;;  %v1135_v50 = vpop.f32.mrf.mxu1 }
 0x178   : > { %1271 = vst [vmem:[%s2259_s17] sm:$0xff] %v1255_v46  ;;  %v1136_v51 = vadd.f32 %v1135_v50, %v1106_v49 }
 0x179   : > { %v1218_v52 = vmul.f32 %v2261_v23, %v1192_v15 }
 0x17a   : > { %v1219_v53 = vmul.f32 %v2249_v31, %v1136_v51 }
 0x17b   : > { %v1240_v54 = vadd.f32 %v2263_v48, %v1218_v52 }
 0x17c   : > { %v1241_v55 = vadd.f32 %v2251_v8, %v1219_v53 }
 0x17d   : > { %v1256_v58 = vmax.f32 %v1240_v54, 0.0 }
 0x17e   : > { %v1257_v59 = vmax.f32 %v1241_v55, 0.0  ;;  %v1164_v16 = vpop.f32.mrf.mxu2  ;;  %v1193_v17 = vpop.f32.mrf.mxu3 }
 0x17f   : > { %1273 = vst.msk [vmem:[%s2259_s17 + $0x8] sm:$0xff] %vm1272_vm4, %v1256_v58  ;;  %v1194_v29 = vadd.f32 %v1193_v17, %v1164_v16  ;;  %v1109_v30 = vpop.f32.mrf.mxu0  ;;  %v1138_v60 = vpop.f32.mrf.mxu1 }
 0x180   : > { %1274 = vst [vmem:[%s2259_s17 + $0x10] sm:$0xff] %v1257_v59  ;;  %v1139_v61 = vadd.f32 %v1138_v60, %v1109_v30 }
 0x181   : > { %v1220_v4 = vmul.f32 %v2261_v23, %v1194_v29 }
 0x182   : > { %v1221_v5 = vmul.f32 %v2249_v31, %v1139_v61 }
 0x183   : > { %v1242_v10 = vadd.f32 %v2263_v48, %v1220_v4 }
 0x184   : > { %v1243_v11 = vadd.f32 %v2251_v8, %v1221_v5 }
 0x185   : > { %v1258_v12 = vmax.f32 %v1242_v10, 0.0 }
 0x186   : > { %v1259_v40 = vmax.f32 %v1243_v11, 0.0  ;;  %v1167_v13 = vpop.f32.mrf.mxu2  ;;  %v1196_v41 = vpop.f32.mrf.mxu3 }
 0x187   : > { %1275 = vst.msk [vmem:[%s2259_s17 + $0x18] sm:$0xff] %vm1272_vm4, %v1258_v12  ;;  %v1197_v18 = vadd.f32 %v1196_v41, %v1167_v13  ;;  %v1111_v19 = vpop.f32.mrf.mxu0  ;;  %v1140_v20 = vpop.f32.mrf.mxu1 }
 0x188   : > { %1276 = vst [vmem:[%s2259_s17 + $0x20] sm:$0xff] %v1259_v40  ;;  %v1141_v21 = vadd.f32 %v1140_v20, %v1111_v19 }
 0x189   : > { %v1222_v25 = vmul.f32 %v2261_v23, %v1197_v18 }
 0x18a   : > { %v1223_v26 = vmul.f32 %v2249_v31, %v1141_v21 }
 0x18b   : > { %v1244_v62 = vadd.f32 %v2263_v48, %v1222_v25 }
 0x18c   : > { %v1245_v63 = vadd.f32 %v2251_v8, %v1223_v26 }
 0x18d   : > { %v1260_v28 = vmax.f32 %v1244_v62, 0.0 }
 0x18e   : > { %v1261_v6 = vmax.f32 %v1245_v63, 0.0  ;;  %v1169_v42 = vpop.f32.mrf.mxu2  ;;  %v1198_v43 = vpop.f32.mrf.mxu3 }
 0x18f   : > { %1277 = vst.msk [vmem:[%s2259_s17 + $0x28] sm:$0xff] %vm1272_vm4, %v1260_v28  ;;  %v1199_v56 = vadd.f32 %v1198_v43, %v1169_v42  ;;  %v1114_v57 = vpop.f32.mrf.mxu0  ;;  %v1143_v32 = vpop.f32.mrf.mxu1 }
 0x190   : > { %1278 = vst [vmem:[%s2259_s17 + $0x30] sm:$0xff] %v1261_v6  ;;  %v1144_v33 = vadd.f32 %v1143_v32, %v1114_v57 }
 0x191   : > { %v1224_v34 = vmul.f32 %v2261_v23, %v1199_v56 }
 0x192   : > { %v1225_v0 = vmul.f32 %v2249_v31, %v1144_v33 }
 0x193   : > { %v1246_v1 = vadd.f32 %v2263_v48, %v1224_v34 }
 0x194   : > { %v1247_v2 = vadd.f32 %v2251_v8, %v1225_v0 }
 0x195   : > { %v1262_v3 = vmax.f32 %v1246_v1, 0.0 }
 0x196   : > { %v1263_v35 = vmax.f32 %v1247_v2, 0.0  ;;  %v1172_v36 = vpop.f32.mrf.mxu2  ;;  %v1201_v37 = vpop.f32.mrf.mxu3 }
 0x197   : > { %1279 = vst.msk [vmem:[%s2259_s17 + $0x38] sm:$0xff] %vm1272_vm4, %v1262_v3  ;;  %v1202_v38 = vadd.f32 %v1201_v37, %v1172_v36  ;;  %v1116_v39 = vpop.f32.mrf.mxu0  ;;  %v1145_v24 = vpop.f32.mrf.mxu1 }
 0x198   : > { %1280 = vst [vmem:[%s2259_s17 + $0x40] sm:$0xff] %v1263_v35  ;;  %v1146_v27 = vadd.f32 %v1145_v24, %v1116_v39 }
 0x199   : > { %v1226_v7 = vmul.f32 %v2261_v23, %v1202_v38 }
 0x19a   : > { %v1227_v44 = vmul.f32 %v2249_v31, %v1146_v27 }
 0x19b   : > { %v1248_v45 = vadd.f32 %v2263_v48, %v1226_v7 }
 0x19c   : > { %v1249_v9 = vadd.f32 %v2251_v8, %v1227_v44 }
 0x19d   : > { %v1264_v22 = vmax.f32 %v1248_v45, 0.0 }
 0x19e   : > { %v1265_v46 = vmax.f32 %v1249_v9, 0.0  ;;  %v1174_v47 = vpop.f32.mrf.mxu2  ;;  %v1203_v14 = vpop.f32.mrf.mxu3 }
 0x19f   : > { %1281 = vst.msk [vmem:[%s2259_s17 + $0x48] sm:$0xff] %vm1272_vm4, %v1264_v22  ;;  %v1204_v15 = vadd.f32 %v1203_v14, %v1174_v47  ;;  %v1119_v49 = vpop.f32.mrf.mxu0  ;;  %v1148_v50 = vpop.f32.mrf.mxu1 }
 0x1a0   : > { %1282 = vst [vmem:[%s2259_s17 + $0x50] sm:$0xff] %v1265_v46  ;;  %v1149_v51 = vadd.f32 %v1148_v50, %v1119_v49 }
 0x1a1   : > { %v1228_v52 = vmul.f32 %v2261_v23, %v1204_v15 }
 0x1a2   : > { %v1229_v53 = vmul.f32 %v2249_v31, %v1149_v51 }
 0x1a3   : > { %v1250_v54 = vadd.f32 %v2263_v48, %v1228_v52 }
 0x1a4   : > { %v1251_v55 = vadd.f32 %v2251_v8, %v1229_v53 }
 0x1a5   : > { %v1266_v58 = vmax.f32 %v1250_v54, 0.0 }
 0x1a6   : > { %v1267_v59 = vmax.f32 %v1251_v55, 0.0  ;;  %v1177_v16 = vpop.f32.mrf.mxu2  ;;  %v1206_v17 = vpop.f32.mrf.mxu3 }
 0x1a7   : > { %1283 = vst.msk [vmem:[%s2259_s17 + $0x58] sm:$0xff] %vm1272_vm4, %v1266_v58  ;;  %v1207_v29 = vadd.f32 %v1206_v17, %v1177_v16  ;;  %v1121_v30 = vpop.f32.mrf.mxu0  ;;  %v1150_v60 = vpop.f32.mrf.mxu1 }
 0x1a8   : > { %1284 = vst [vmem:[%s2259_s17 + $0x60] sm:$0xff] %v1267_v59  ;;  %v1151_v61 = vadd.f32 %v1150_v60, %v1121_v30 }
 0x1a9   : > { %v1230_v4 = vmul.f32 %v2261_v23, %v1207_v29 }
 0x1aa   : > { %v1231_v5 = vmul.f32 %v2249_v31, %v1151_v61 }
 0x1ab   : > { %v1252_v10 = vadd.f32 %v2263_v48, %v1230_v4 }
 0x1ac   : > { %v1253_v11 = vadd.f32 %v2251_v8, %v1231_v5 }
 0x1ad   : > { %v1268_v12 = vmax.f32 %v1252_v10, 0.0 }
 0x1ae   : > { %v1269_v40 = vmax.f32 %v1253_v11, 0.0  ;;  %v1179_v13 = vpop.f32.mrf.mxu2  ;;  %v1208_v41 = vpop.f32.mrf.mxu3 }
 0x1af   : > { %1285 = vst.msk [vmem:[%s2259_s17 + $0x68] sm:$0xff] %vm1272_vm4, %v1268_v12  ;;  %v1209_v18 = vadd.f32 %v1208_v41, %v1179_v13 }
 0x1b0   : > { %1286 = vst [vmem:[%s2259_s17 + $0x70] sm:$0xff] %v1269_v40 }
 0x1b1   : > { %v1232_v19 = vmul.f32 %v2261_v23, %v1209_v18 }
 0x1b3   : > { %v1254_v20 = vadd.f32 %v2263_v48, %v1232_v19 }
 0x1b5   : > { %v1270_v21 = vmax.f32 %v1254_v20, 0.0 }
 0x1b7   : > { %1287 = vst.msk [vmem:[%s2259_s17 + $0x78] sm:$0xff] %vm1272_vm4, %v1270_v21 }
 0x1b8 PF: > { %s18_s27 = sadd.s32 1, %s1669_s27  }
 0x1b9   : > { %p15_p4 = scmp.ge.s32.totalorder %s18_s27, 4  }
 0x1bb   :  { %17 = sbr.rel (!%p15_p4) target bundleno = 1 (0x1), region = 88 }

</bundles_post_ra>
